<compile_context>
chip_gen: v7x
topology: tpu7x:2x2x1
jax: 0.10.0
libtpu: 0.0.40
codegen_flags: <defaults>
</compile_context>

<pallas_src>
import functools
import math

import jax
import jax.numpy as jnp
from jax import lax
from jax.experimental import pallas as pl
from jax.experimental.pallas import tpu as pltpu

# ---- small, forward-consistent hparams --------------------------------------
DIM_F0 = 16      # hparams.dim_f0   (257 in the real model)
DIM_ENC = 32     # hparams.dim_enc_3
HIDDEN = 8       # hparams.dim_neck_3
FREQ_3 = 4       # hparams.freq_3
KSIZE = 5
PAD = 2
BATCH = 2
SEQ = 16
CPAD = 128       # lane-padded channel width (all conv channels padded to this)


# ---- Pallas kernel 1: fused conv stack + hoisted LSTM input projection -------
def conv_stack_gates_kernel(x_ref, w0_ref, w1_ref, w2_ref, shift_ref,
                            wih_ref, bih_ref, gf_ref, gb_ref,
                            xpad_sc, xcat_sc, *, batch):
    # x_ref:    (T*Bp, CPAD) f32   time-major input, row = t*Bp + b, channels
    #                              zero-padded to CPAD lanes.
    # w*_ref:   (KSIZE*CPAD, CPAD) bf16  wide-K conv weight (BN scale folded),
    #                              row index = k*CPAD + cin.
    # shift_ref:(3, CPAD) f32      folded BN(+conv bias) shift per layer.
    # wih_ref:  (CPAD, 8H) bf16    concat [W_ih_fwd | W_ih_bwd]^T (rows padded).
    # bih_ref:  (1, 8H) f32        concat summed biases (b_ih + b_hh) per dir.
    # gf_ref/gb_ref: (T*Bp, 4H) bf16  per-direction LSTM gate pre-activations.
    # xpad_sc:  ((T+2*PAD)*Bp, CPAD) f32  halo-padded activation scratch.
    # xcat_sc:  (T*Bp, KSIZE*CPAD) bf16   lane-concatenated taps (matmul LHS).
    TB = x_ref.shape[0]
    Cpad = x_ref.shape[1]
    PB = PAD * batch
    H4 = gf_ref.shape[1]

    # Zero ONLY the halo rows; the interior is fully overwritten every layer.
    xpad_sc[0:PB, :] = jnp.zeros((PB, Cpad), jnp.float32)
    xpad_sc[PB + TB:PB + TB + PB, :] = jnp.zeros((PB, Cpad), jnp.float32)

    def conv_bn_relu(w_ref, layer):
        # Conv1d(k=5, pad=2) as ONE wide-K matmul: concatenate the 5 row-shifted
        # taps along lanes (each tap slice is 8-sublane / 128-lane aligned).
        for k in range(KSIZE):
            xcat_sc[:, k * Cpad:(k + 1) * Cpad] = (
                xpad_sc[k * batch:k * batch + TB, :].astype(jnp.bfloat16))
        acc = jnp.dot(xcat_sc[...], w_ref[...],
                      preferred_element_type=jnp.float32)
        return jnp.maximum(acc + shift_ref[layer:layer + 1, :], 0.0)

    xpad_sc[PB:PB + TB, :] = x_ref[...]
    y = conv_bn_relu(w0_ref, 0)
    xpad_sc[PB:PB + TB, :] = y
    y = conv_bn_relu(w1_ref, 1)
    xpad_sc[PB:PB + TB, :] = y
    y = conv_bn_relu(w2_ref, 2)

    # LSTM input projection for BOTH directions, hoisted out of the time loop
    # into one (T*Bp, CPAD) x (CPAD, 8H) bf16 matmul; bias added in f32.
    g = (jnp.dot(y.astype(jnp.bfloat16), wih_ref[...],
                 preferred_element_type=jnp.float32) + bih_ref[...])
    gf_ref[...] = g[:, 0:H4].astype(jnp.bfloat16)
    gb_ref[...] = g[:, H4:2 * H4].astype(jnp.bfloat16)


# ---- Pallas kernel 2: bidirectional LSTM recurrence + freq_3 decimation ------
def bilstm_decim_kernel(gxf_ref, gxb_ref, whh_ref, of_ref, ob_ref,
                        h_sc, c_sc, *, freq):
    # gxf_ref: (freq, Bp, 4H) bf16  forward gate pre-acts for chunk m.
    # gxb_ref: (freq, Bp, 4H) bf16  backward gate pre-acts, time rows
    #                               [(n_out-1-m)*freq, (n_out-m)*freq).
    # whh_ref: (2H, 8H) f32         block-diagonal [[W_hh_f, 0], [0, W_hh_b]].
    # of_ref/ob_ref: (1, Bp, H) f32 decimated outputs for this chunk.
    # h_sc/c_sc: (Bp, 2H) f32       [h_fwd | h_bwd] state, carried across grid.
    H = whh_ref.shape[0] // 2
    m = pl.program_id(0)

    @pl.when(m == 0)
    def _():
        h_sc[...] = jnp.zeros_like(h_sc)
        c_sc[...] = jnp.zeros_like(c_sc)

    whh = whh_ref[...]                     # hoist loop-invariant weight load

    def cell(gates, c_prev):               # PyTorch gate order: i, f, g, o
        i_g = jax.nn.sigmoid(gates[:, 0 * H:1 * H])
        f_g = jax.nn.sigmoid(gates[:, 1 * H:2 * H])
        g_g = jnp.tanh(gates[:, 2 * H:3 * H])
        o_g = jax.nn.sigmoid(gates[:, 3 * H:4 * H])
        c_new = f_g * c_prev + i_g * g_g
        return o_g * jnp.tanh(c_new), c_new

    for j in range(freq):                  # static unroll of freq LSTM steps
        h = h_sc[...]
        c = c_sc[...]
        # Single fused recurrent matmul for both directions (block-diag W).
        g_rec = jnp.dot(h, whh, preferred_element_type=jnp.float32)  # (Bp, 8H)
        gf = gxf_ref[j].astype(jnp.float32) + g_rec[:, 0:4 * H]
        gb = gxb_ref[freq - 1 - j].astype(jnp.float32) + g_rec[:, 4 * H:8 * H]
        hf, cf = cell(gf, c[:, 0:H])
        hb, cb = cell(gb, c[:, H:2 * H])
        h_sc[...] = jnp.concatenate([hf, hb], axis=1)
        c_sc[...] = jnp.concatenate([cf, cb], axis=1)

    hfin = h_sc[...]
    of_ref[0] = hfin[:, 0:H]               # forward h at t=(m+1)*freq-1
    ob_ref[0] = hfin[:, H:2 * H]           # backward h at t=(n_out-1-m)*freq


# ---- kernel-layout parameter packing -----------------------------------------
def prepare_kernel_params(params):
    H = HIDDEN
    kp = {}
    shift_rows = []
    for l in range(3):
        cin = DIM_F0 if l == 0 else DIM_ENC
        w = params[f"w{l}"]                                  # (K, cin, DIM_ENC)
        w = w * params["scale"][l][None, None, :]            # fold BN scale
        w = jnp.pad(w, ((0, 0), (0, CPAD - cin), (0, CPAD - DIM_ENC)))
        kp[f"w{l}"] = w.reshape(KSIZE * CPAD, CPAD).astype(jnp.bfloat16)
        shift_rows.append(jnp.pad(params["shift"][l], (0, CPAD - DIM_ENC)))
    kp["shift"] = jnp.stack(shift_rows).astype(jnp.float32)  # (3, CPAD)
    kp["wih"] = jnp.pad(params["wih"],
                        ((0, CPAD - DIM_ENC), (0, 0))).astype(jnp.bfloat16)
    kp["bih"] = params["bih"].astype(jnp.float32)            # (1, 8H)
    zero = jnp.zeros((H, 4 * H), jnp.float32)
    kp["whh_blk"] = jnp.concatenate(
        [jnp.concatenate([params["whh_f"], zero], axis=1),
         jnp.concatenate([zero, params["whh_b"]], axis=1)], axis=0)  # (2H, 8H)
    return kp


# ---- full forward -------------------------------------------------------------
def f0_encoder_forward(x, params):
    B, T, F0 = x.shape
    assert T % FREQ_3 == 0, "kernel requires seq_len % freq_3 == 0"
    H = HIDDEN
    n_out = T // FREQ_3
    Bp = ((B + 7) // 8) * 8                 # sublane-aligned batch padding
    TB = T * Bp
    kp = prepare_kernel_params(params)

    # Time-major + pad batch to 8 sublanes and channels to 128 lanes (all tap
    # slices and lane columns inside the kernel are then (8,128)-tile aligned).
    x_tm = jnp.transpose(x, (1, 0, 2))
    x_tm = jnp.pad(x_tm, ((0, 0), (0, Bp - B), (0, CPAD - F0)))
    x_tm = x_tm.reshape(TB, CPAD).astype(jnp.float32)

    k1_cost = pl.CostEstimate(
        flops=2 * TB * KSIZE * CPAD * CPAD * 3 + 2 * TB * CPAD * 8 * H,
        transcendentals=0,
        bytes_accessed=(TB * CPAD * 4 + 3 * KSIZE * CPAD * CPAD * 2
                        + CPAD * 8 * H * 2 + 2 * TB * 4 * H * 2))

    gf, gb = pl.pallas_call(
        functools.partial(conv_stack_gates_kernel, batch=Bp),
        out_shape=(jax.ShapeDtypeStruct((TB, 4 * H), jnp.bfloat16),
                   jax.ShapeDtypeStruct((TB, 4 * H), jnp.bfloat16)),
        grid=(1,),
        in_specs=[
            pl.BlockSpec((TB, CPAD), lambda i: (0, 0)),
            pl.BlockSpec((KSIZE * CPAD, CPAD), lambda i: (0, 0)),
            pl.BlockSpec((KSIZE * CPAD, CPAD), lambda i: (0, 0)),
            pl.BlockSpec((KSIZE * CPAD, CPAD), lambda i: (0, 0)),
            pl.BlockSpec((3, CPAD), lambda i: (0, 0)),
            pl.BlockSpec((CPAD, 8 * H), lambda i: (0, 0)),
            pl.BlockSpec((1, 8 * H), lambda i: (0, 0)),
        ],
        out_specs=(pl.BlockSpec((TB, 4 * H), lambda i: (0, 0)),
                   pl.BlockSpec((TB, 4 * H), lambda i: (0, 0))),
        scratch_shapes=[pltpu.VMEM(((T + 2 * PAD) * Bp, CPAD), jnp.float32),
                        pltpu.VMEM((TB, KSIZE * CPAD), jnp.bfloat16)],
        compiler_params=pltpu.CompilerParams(
            dimension_semantics=("arbitrary",),
            vmem_limit_bytes=64 * 1024 * 1024),
        cost_estimate=k1_cost,
    )(x_tm, kp["w0"], kp["w1"], kp["w2"], kp["shift"], kp["wih"], kp["bih"])

    gf = gf.reshape(T, Bp, 4 * H)           # free: splits the leading dim
    gb = gb.reshape(T, Bp, 4 * H)

    k2_cost = pl.CostEstimate(
        flops=2 * T * Bp * 2 * H * 8 * H,
        transcendentals=T * Bp * 10 * H,
        bytes_accessed=(2 * T * Bp * 4 * H * 2 + 2 * n_out * Bp * H * 4
                        + 2 * H * 8 * H * 4))

    out_f, out_b = pl.pallas_call(
        functools.partial(bilstm_decim_kernel, freq=FREQ_3),
        out_shape=(jax.ShapeDtypeStruct((n_out, Bp, H), jnp.float32),
                   jax.ShapeDtypeStruct((n_out, Bp, H), jnp.float32)),
        grid=(n_out,),
        in_specs=[
            pl.BlockSpec((FREQ_3, Bp, 4 * H), lambda m: (m, 0, 0)),
            pl.BlockSpec((FREQ_3, Bp, 4 * H), lambda m: (n_out - 1 - m, 0, 0)),
            pl.BlockSpec((2 * H, 8 * H), lambda m: (0, 0)),
        ],
        out_specs=(pl.BlockSpec((1, Bp, H), lambda m: (m, 0, 0)),
                   pl.BlockSpec((1, Bp, H), lambda m: (n_out - 1 - m, 0, 0))),
        scratch_shapes=[pltpu.VMEM((Bp, 2 * H), jnp.float32),
                        pltpu.VMEM((Bp, 2 * H), jnp.float32)],
        compiler_params=pltpu.CompilerParams(
            dimension_semantics=("arbitrary",),
            vmem_limit_bytes=32 * 1024 * 1024),
        cost_estimate=k2_cost,
    )(gf, gb, kp["whh_blk"])

    out = jnp.concatenate([out_f, out_b], axis=-1)[:, :B, :]
    return jnp.transpose(out, (1, 0, 2))    # (B, T//freq_3, 2H)


# ---- deterministic parameter init (shapes match the PyTorch module) ----------
def init_params(key):
    keys = jax.random.split(key, 16)
    ki = 0
    params = {}
    gain = math.sqrt(2.0)  # torch.nn.init.calculate_gain('relu')
    scales, shifts = [], []
    cin = DIM_F0
    for l in range(3):
        fan_in = cin * KSIZE
        fan_out = DIM_ENC * KSIZE
        bound = gain * math.sqrt(6.0 / (fan_in + fan_out))
        w_torch = jax.random.uniform(
            keys[ki], (DIM_ENC, cin, KSIZE), minval=-bound, maxval=bound); ki += 1
        bias = jax.random.uniform(
            keys[ki], (DIM_ENC,), minval=-1.0 / math.sqrt(fan_in),
            maxval=1.0 / math.sqrt(fan_in)); ki += 1
        # BatchNorm1d (eval) with default running stats (mean=0, var=1).
        gamma = jnp.ones((DIM_ENC,), jnp.float32)
        beta = jnp.zeros((DIM_ENC,), jnp.float32)
        eps = 1e-5
        scale = gamma / jnp.sqrt(1.0 + eps)
        shift = bias * scale + beta
        params[f"w{l}"] = jnp.transpose(w_torch, (2, 1, 0)).astype(jnp.float32)
        scales.append(scale)
        shifts.append(shift)
        cin = DIM_ENC
    params["scale"] = jnp.stack(scales).astype(jnp.float32)   # (3, DIM_ENC)
    params["shift"] = jnp.stack(shifts).astype(jnp.float32)   # (3, DIM_ENC)

    H = HIDDEN
    k_ = 1.0 / math.sqrt(H)

    def u(shape):
        nonlocal ki
        out = jax.random.uniform(keys[ki], shape, minval=-k_, maxval=k_)
        ki += 1
        return out.astype(jnp.float32)

    wih_list, bih_list = [], []
    for d in ("f", "b"):
        wih_list.append(jnp.transpose(u((4 * H, DIM_ENC))))   # (DIM_ENC, 4H)
        params["whh_" + d] = jnp.transpose(u((4 * H, H)))     # (H, 4H)
        bih_list.append(u((4 * H,)) + u((4 * H,)))            # b_ih + b_hh
    params["wih"] = jnp.concatenate(wih_list, axis=1)         # (DIM_ENC, 8H)
    params["bih"] = jnp.concatenate(bih_list).reshape(1, 8 * H)
    return params


# ---- pure-JAX f32 reference for correctness checking ---------------------------
def ref_forward(x, params):
    B, T, _ = x.shape
    y = x
    ws = [params["w0"], params["w1"], params["w2"]]
    for l in range(3):
        yp = jnp.pad(y, ((0, 0), (PAD, PAD), (0, 0)))
        acc = jnp.zeros((B, T, DIM_ENC), jnp.float32)
        for k in range(KSIZE):
            acc = acc + jnp.einsum("btc,cd->btd", yp[:, k:k + T, :], ws[l][k])
        y = jnp.maximum(acc * params["scale"][l] + params["shift"][l], 0.0)

    H = HIDDEN
    wih_f = params["wih"][:, :4 * H]
    wih_b = params["wih"][:, 4 * H:]
    b_f = params["bih"][:, :4 * H]
    b_b = params["bih"][:, 4 * H:]

    def run(xs, wih, whh, b):
        def step(carry, xt):
            h, c = carry
            gates = xt @ wih + h @ whh + b
            i_g = jax.nn.sigmoid(gates[:, :H])
            f_g = jax.nn.sigmoid(gates[:, H:2 * H])
            g_g = jnp.tanh(gates[:, 2 * H:3 * H])
            o_g = jax.nn.sigmoid(gates[:, 3 * H:])
            c = f_g * c + i_g * g_g
            h = o_g * jnp.tanh(c)
            return (h, c), h
        init = (jnp.zeros((B, H), jnp.float32), jnp.zeros((B, H), jnp.float32))
        _, hs = lax.scan(step, init, xs)
        return hs

    x_tm = jnp.transpose(y, (1, 0, 2))
    out_f = jnp.transpose(run(x_tm, wih_f, params["whh_f"], b_f), (1, 0, 2))
    out_b = jnp.transpose(run(x_tm[::-1], wih_b, params["whh_b"], b_b)[::-1],
                          (1, 0, 2))
    return jnp.concatenate(
        [out_f[:, FREQ_3 - 1::FREQ_3, :], out_b[:, ::FREQ_3, :]], axis=-1)


if __name__ == "__main__":
    key = jax.random.PRNGKey(0)
    pkey, xkey = jax.random.split(key)
    params = init_params(pkey)
    x = jax.random.normal(xkey, (BATCH, SEQ, DIM_F0), dtype=jnp.float32)

    fwd = jax.jit(f0_encoder_forward)
    out = jax.block_until_ready(fwd(x, params))

    assert out.shape == (BATCH, SEQ // FREQ_3, 2 * HIDDEN), out.shape
    ref = ref_forward(x, params)
    max_err = float(jnp.max(jnp.abs(out - ref)))
    if max_err < 5e-2:          # bf16 MXU operands vs. f32 reference
        print("KERNEL_OK")
    else:
        print("MISMATCH max_err=", max_err)
</pallas_src>

<mosaic_0001>
module attributes {stable_mosaic.version = 11 : i64} {
  func.func @conv_stack_gates_kernel(%arg0: i32, %arg1: memref<128x128xf32, #tpu.memory_space<vmem>>, %arg2: memref<640x128xbf16, #tpu.memory_space<vmem>>, %arg3: memref<640x128xbf16, #tpu.memory_space<vmem>>, %arg4: memref<640x128xbf16, #tpu.memory_space<vmem>>, %arg5: memref<3x128xf32, #tpu.memory_space<vmem>>, %arg6: memref<128x64xbf16, #tpu.memory_space<vmem>>, %arg7: memref<1x64xf32, #tpu.memory_space<vmem>>, %arg8: memref<128x32xbf16, #tpu.memory_space<vmem>>, %arg9: memref<128x32xbf16, #tpu.memory_space<vmem>>, %arg10: memref<160x128xf32, #tpu.memory_space<vmem>>, %arg11: memref<128x640xbf16, #tpu.memory_space<vmem>>) attributes {dimension_semantics = [#tpu.dimension_semantics<arbitrary>], iteration_bounds = array<i64: 1>, scalar_prefetch = 0 : i64, scratch_operands = 2 : i64, tpu.core_type = #tpu.core_type<tc>, window_params = [{pipeline_mode = #tpu.pipeline_mode<synchronous>, transform_indices = @transform_0, window_bounds = array<i64: 128, 128>}, {pipeline_mode = #tpu.pipeline_mode<synchronous>, transform_indices = @transform_1, window_bounds = array<i64: 640, 128>}, {pipeline_mode = #tpu.pipeline_mode<synchronous>, transform_indices = @transform_2, window_bounds = array<i64: 640, 128>}, {pipeline_mode = #tpu.pipeline_mode<synchronous>, transform_indices = @transform_3, window_bounds = array<i64: 640, 128>}, {pipeline_mode = #tpu.pipeline_mode<synchronous>, transform_indices = @transform_4, window_bounds = array<i64: 3, 128>}, {pipeline_mode = #tpu.pipeline_mode<synchronous>, transform_indices = @transform_5, window_bounds = array<i64: 128, 64>}, {pipeline_mode = #tpu.pipeline_mode<synchronous>, transform_indices = @transform_6, window_bounds = array<i64: 1, 64>}, {pipeline_mode = #tpu.pipeline_mode<synchronous>, transform_indices = @transform_7, window_bounds = array<i64: 128, 32>}, {pipeline_mode = #tpu.pipeline_mode<synchronous>, transform_indices = @transform_8, window_bounds = array<i64: 128, 32>}]} {
    %cst = arith.constant 0.000000e+00 : f32
    %0 = vector.broadcast %cst : f32 to vector<16x128xf32>
    %c0 = arith.constant 0 : index
    %c0_0 = arith.constant 0 : index
    %1 = vector.load %arg10[%c0, %c0_0] : memref<160x128xf32, #tpu.memory_space<vmem>>, vector<16x128xf32>
    tpu.vector_store %arg10[%c0, %c0_0], %0 {strides = array<i32>} : memref<160x128xf32, #tpu.memory_space<vmem>>, vector<16x128xf32>,
    %cst_1 = arith.constant 0.000000e+00 : f32
    %2 = vector.broadcast %cst_1 : f32 to vector<16x128xf32>
    %c144 = arith.constant 144 : index
    %c0_2 = arith.constant 0 : index
    %3 = vector.load %arg10[%c144, %c0_2] : memref<160x128xf32, #tpu.memory_space<vmem>>, vector<16x128xf32>
    tpu.vector_store %arg10[%c144, %c0_2], %2 {strides = array<i32>} : memref<160x128xf32, #tpu.memory_space<vmem>>, vector<16x128xf32>,
    %c0_3 = arith.constant 0 : index
    %c0_4 = arith.constant 0 : index
    %4 = vector.load %arg1[%c0_3, %c0_4] : memref<128x128xf32, #tpu.memory_space<vmem>>, vector<128x128xf32>
    %c16 = arith.constant 16 : index
    %c0_5 = arith.constant 0 : index
    %5 = vector.load %arg10[%c16, %c0_5] : memref<160x128xf32, #tpu.memory_space<vmem>>, vector<128x128xf32>
    tpu.vector_store %arg10[%c16, %c0_5], %4 {strides = array<i32>} : memref<160x128xf32, #tpu.memory_space<vmem>>, vector<128x128xf32>,
    %c0_6 = arith.constant 0 : index
    %c0_7 = arith.constant 0 : index
    %6 = vector.load %arg10[%c0_6, %c0_7] : memref<160x128xf32, #tpu.memory_space<vmem>>, vector<128x128xf32>
    %7 = arith.truncf %6 : vector<128x128xf32> to vector<128x128xbf16>
    %c0_8 = arith.constant 0 : index
    %c0_9 = arith.constant 0 : index
    %8 = vector.load %arg11[%c0_8, %c0_9] : memref<128x640xbf16, #tpu.memory_space<vmem>>, vector<128x128xbf16>
    tpu.vector_store %arg11[%c0_8, %c0_9], %7 {strides = array<i32>} : memref<128x640xbf16, #tpu.memory_space<vmem>>, vector<128x128xbf16>,
    %c8 = arith.constant 8 : index
    %c0_10 = arith.constant 0 : index
    %9 = vector.load %arg10[%c8, %c0_10] : memref<160x128xf32, #tpu.memory_space<vmem>>, vector<128x128xf32>
    %10 = arith.truncf %9 : vector<128x128xf32> to vector<128x128xbf16>
    %c0_11 = arith.constant 0 : index
    %c128 = arith.constant 128 : index
    %11 = vector.load %arg11[%c0_11, %c128] : memref<128x640xbf16, #tpu.memory_space<vmem>>, vector<128x128xbf16>
    tpu.vector_store %arg11[%c0_11, %c128], %10 {strides = array<i32>} : memref<128x640xbf16, #tpu.memory_space<vmem>>, vector<128x128xbf16>,
    %c16_12 = arith.constant 16 : index
    %c0_13 = arith.constant 0 : index
    %12 = vector.load %arg10[%c16_12, %c0_13] : memref<160x128xf32, #tpu.memory_space<vmem>>, vector<128x128xf32>
    %13 = arith.truncf %12 : vector<128x128xf32> to vector<128x128xbf16>
    %c0_14 = arith.constant 0 : index
    %c256 = arith.constant 256 : index
    %14 = vector.load %arg11[%c0_14, %c256] : memref<128x640xbf16, #tpu.memory_space<vmem>>, vector<128x128xbf16>
    tpu.vector_store %arg11[%c0_14, %c256], %13 {strides = array<i32>} : memref<128x640xbf16, #tpu.memory_space<vmem>>, vector<128x128xbf16>,
    %c24 = arith.constant 24 : index
    %c0_15 = arith.constant 0 : index
    %15 = vector.load %arg10[%c24, %c0_15] : memref<160x128xf32, #tpu.memory_space<vmem>>, vector<128x128xf32>
    %16 = arith.truncf %15 : vector<128x128xf32> to vector<128x128xbf16>
    %c0_16 = arith.constant 0 : index
    %c384 = arith.constant 384 : index
    %17 = vector.load %arg11[%c0_16, %c384] : memref<128x640xbf16, #tpu.memory_space<vmem>>, vector<128x128xbf16>
    tpu.vector_store %arg11[%c0_16, %c384], %16 {strides = array<i32>} : memref<128x640xbf16, #tpu.memory_space<vmem>>, vector<128x128xbf16>,
    %c32 = arith.constant 32 : index
    %c0_17 = arith.constant 0 : index
    %18 = vector.load %arg10[%c32, %c0_17] : memref<160x128xf32, #tpu.memory_space<vmem>>, vector<128x128xf32>
    %19 = arith.truncf %18 : vector<128x128xf32> to vector<128x128xbf16>
    %c0_18 = arith.constant 0 : index
    %c512 = arith.constant 512 : index
    %20 = vector.load %arg11[%c0_18, %c512] : memref<128x640xbf16, #tpu.memory_space<vmem>>, vector<128x128xbf16>
    tpu.vector_store %arg11[%c0_18, %c512], %19 {strides = array<i32>} : memref<128x640xbf16, #tpu.memory_space<vmem>>, vector<128x128xbf16>,
    %c0_19 = arith.constant 0 : index
    %c0_20 = arith.constant 0 : index
    %21 = vector.load %arg11[%c0_19, %c0_20] : memref<128x640xbf16, #tpu.memory_space<vmem>>, vector<128x640xbf16>
    %c0_21 = arith.constant 0 : index
    %c0_22 = arith.constant 0 : index
    %22 = vector.load %arg2[%c0_21, %c0_22] : memref<640x128xbf16, #tpu.memory_space<vmem>>, vector<640x128xbf16>
    %cst_23 = arith.constant dense<0.000000e+00> : vector<128x128xf32>
    %23 = tpu.matmul %21, %22, %cst_23 {dimension_numbers = #tpu.dot_dimension_numbers<[1], [0], [0], [1], [0, 0, 1, 1], [], []>} : vector<128x640xbf16>, vector<640x128xbf16>, vector<128x128xf32> -> vector<128x128xf32>
    %c0_24 = arith.constant 0 : index
    %c0_25 = arith.constant 0 : index
    %24 = vector.load %arg5[%c0_24, %c0_25] : memref<3x128xf32, #tpu.memory_space<vmem>>, vector<1x128xf32>
    %25 = vector.broadcast %24 : vector<1x128xf32> to vector<128x128xf32>
    %26 = arith.addf %23, %25 : vector<128x128xf32>
    %cst_26 = arith.constant 0.000000e+00 : f32
    %27 = vector.broadcast %cst_26 : f32 to vector<128x128xf32>
    %28 = arith.maximumf %26, %27 : vector<128x128xf32>
    %c16_27 = arith.constant 16 : index
    %c0_28 = arith.constant 0 : index
    %29 = vector.load %arg10[%c16_27, %c0_28] : memref<160x128xf32, #tpu.memory_space<vmem>>, vector<128x128xf32>
    tpu.vector_store %arg10[%c16_27, %c0_28], %28 {strides = array<i32>} : memref<160x128xf32, #tpu.memory_space<vmem>>, vector<128x128xf32>,
    %c0_29 = arith.constant 0 : index
    %c0_30 = arith.constant 0 : index
    %30 = vector.load %arg10[%c0_29, %c0_30] : memref<160x128xf32, #tpu.memory_space<vmem>>, vector<128x128xf32>
    %31 = arith.truncf %30 : vector<128x128xf32> to vector<128x128xbf16>
    %c0_31 = arith.constant 0 : index
    %c0_32 = arith.constant 0 : index
    %32 = vector.load %arg11[%c0_31, %c0_32] : memref<128x640xbf16, #tpu.memory_space<vmem>>, vector<128x128xbf16>
    tpu.vector_store %arg11[%c0_31, %c0_32], %31 {strides = array<i32>} : memref<128x640xbf16, #tpu.memory_space<vmem>>, vector<128x128xbf16>,
    %c8_33 = arith.constant 8 : index
    %c0_34 = arith.constant 0 : index
    %33 = vector.load %arg10[%c8_33, %c0_34] : memref<160x128xf32, #tpu.memory_space<vmem>>, vector<128x128xf32>
    %34 = arith.truncf %33 : vector<128x128xf32> to vector<128x128xbf16>
    %c0_35 = arith.constant 0 : index
    %c128_36 = arith.constant 128 : index
    %35 = vector.load %arg11[%c0_35, %c128_36] : memref<128x640xbf16, #tpu.memory_space<vmem>>, vector<128x128xbf16>
    tpu.vector_store %arg11[%c0_35, %c128_36], %34 {strides = array<i32>} : memref<128x640xbf16, #tpu.memory_space<vmem>>, vector<128x128xbf16>,
    %c16_37 = arith.constant 16 : index
    %c0_38 = arith.constant 0 : index
    %36 = vector.load %arg10[%c16_37, %c0_38] : memref<160x128xf32, #tpu.memory_space<vmem>>, vector<128x128xf32>
    %37 = arith.truncf %36 : vector<128x128xf32> to vector<128x128xbf16>
    %c0_39 = arith.constant 0 : index
    %c256_40 = arith.constant 256 : index
    %38 = vector.load %arg11[%c0_39, %c256_40] : memref<128x640xbf16, #tpu.memory_space<vmem>>, vector<128x128xbf16>
    tpu.vector_store %arg11[%c0_39, %c256_40], %37 {strides = array<i32>} : memref<128x640xbf16, #tpu.memory_space<vmem>>, vector<128x128xbf16>,
    %c24_41 = arith.constant 24 : index
    %c0_42 = arith.constant 0 : index
    %39 = vector.load %arg10[%c24_41, %c0_42] : memref<160x128xf32, #tpu.memory_space<vmem>>, vector<128x128xf32>
    %40 = arith.truncf %39 : vector<128x128xf32> to vector<128x128xbf16>
    %c0_43 = arith.constant 0 : index
    %c384_44 = arith.constant 384 : index
    %41 = vector.load %arg11[%c0_43, %c384_44] : memref<128x640xbf16, #tpu.memory_space<vmem>>, vector<128x128xbf16>
    tpu.vector_store %arg11[%c0_43, %c384_44], %40 {strides = array<i32>} : memref<128x640xbf16, #tpu.memory_space<vmem>>, vector<128x128xbf16>,
    %c32_45 = arith.constant 32 : index
    %c0_46 = arith.constant 0 : index
    %42 = vector.load %arg10[%c32_45, %c0_46] : memref<160x128xf32, #tpu.memory_space<vmem>>, vector<128x128xf32>
    %43 = arith.truncf %42 : vector<128x128xf32> to vector<128x128xbf16>
    %c0_47 = arith.constant 0 : index
    %c512_48 = arith.constant 512 : index
    %44 = vector.load %arg11[%c0_47, %c512_48] : memref<128x640xbf16, #tpu.memory_space<vmem>>, vector<128x128xbf16>
    tpu.vector_store %arg11[%c0_47, %c512_48], %43 {strides = array<i32>} : memref<128x640xbf16, #tpu.memory_space<vmem>>, vector<128x128xbf16>,
    %c0_49 = arith.constant 0 : index
    %c0_50 = arith.constant 0 : index
    %45 = vector.load %arg11[%c0_49, %c0_50] : memref<128x640xbf16, #tpu.memory_space<vmem>>, vector<128x640xbf16>
    %c0_51 = arith.constant 0 : index
    %c0_52 = arith.constant 0 : index
    %46 = vector.load %arg3[%c0_51, %c0_52] : memref<640x128xbf16, #tpu.memory_space<vmem>>, vector<640x128xbf16>
    %cst_53 = arith.constant dense<0.000000e+00> : vector<128x128xf32>
    %47 = tpu.matmul %45, %46, %cst_53 {dimension_numbers = #tpu.dot_dimension_numbers<[1], [0], [0], [1], [0, 0, 1, 1], [], []>} : vector<128x640xbf16>, vector<640x128xbf16>, vector<128x128xf32> -> vector<128x128xf32>
    %c1 = arith.constant 1 : index
    %c0_54 = arith.constant 0 : index
    %48 = vector.load %arg5[%c1, %c0_54] : memref<3x128xf32, #tpu.memory_space<vmem>>, vector<1x128xf32>
    %49 = vector.broadcast %48 : vector<1x128xf32> to vector<128x128xf32>
    %50 = arith.addf %47, %49 : vector<128x128xf32>
    %cst_55 = arith.constant 0.000000e+00 : f32
    %51 = vector.broadcast %cst_55 : f32 to vector<128x128xf32>
    %52 = arith.maximumf %50, %51 : vector<128x128xf32>
    %c16_56 = arith.constant 16 : index
    %c0_57 = arith.constant 0 : index
    %53 = vector.load %arg10[%c16_56, %c0_57] : memref<160x128xf32, #tpu.memory_space<vmem>>, vector<128x128xf32>
    tpu.vector_store %arg10[%c16_56, %c0_57], %52 {strides = array<i32>} : memref<160x128xf32, #tpu.memory_space<vmem>>, vector<128x128xf32>,
    %c0_58 = arith.constant 0 : index
    %c0_59 = arith.constant 0 : index
    %54 = vector.load %arg10[%c0_58, %c0_59] : memref<160x128xf32, #tpu.memory_space<vmem>>, vector<128x128xf32>
    %55 = arith.truncf %54 : vector<128x128xf32> to vector<128x128xbf16>
    %c0_60 = arith.constant 0 : index
    %c0_61 = arith.constant 0 : index
    %56 = vector.load %arg11[%c0_60, %c0_61] : memref<128x640xbf16, #tpu.memory_space<vmem>>, vector<128x128xbf16>
    tpu.vector_store %arg11[%c0_60, %c0_61], %55 {strides = array<i32>} : memref<128x640xbf16, #tpu.memory_space<vmem>>, vector<128x128xbf16>,
    %c8_62 = arith.constant 8 : index
    %c0_63 = arith.constant 0 : index
    %57 = vector.load %arg10[%c8_62, %c0_63] : memref<160x128xf32, #tpu.memory_space<vmem>>, vector<128x128xf32>
    %58 = arith.truncf %57 : vector<128x128xf32> to vector<128x128xbf16>
    %c0_64 = arith.constant 0 : index
    %c128_65 = arith.constant 128 : index
    %59 = vector.load %arg11[%c0_64, %c128_65] : memref<128x640xbf16, #tpu.memory_space<vmem>>, vector<128x128xbf16>
    tpu.vector_store %arg11[%c0_64, %c128_65], %58 {strides = array<i32>} : memref<128x640xbf16, #tpu.memory_space<vmem>>, vector<128x128xbf16>,
    %c16_66 = arith.constant 16 : index
    %c0_67 = arith.constant 0 : index
    %60 = vector.load %arg10[%c16_66, %c0_67] : memref<160x128xf32, #tpu.memory_space<vmem>>, vector<128x128xf32>
    %61 = arith.truncf %60 : vector<128x128xf32> to vector<128x128xbf16>
    %c0_68 = arith.constant 0 : index
    %c256_69 = arith.constant 256 : index
    %62 = vector.load %arg11[%c0_68, %c256_69] : memref<128x640xbf16, #tpu.memory_space<vmem>>, vector<128x128xbf16>
    tpu.vector_store %arg11[%c0_68, %c256_69], %61 {strides = array<i32>} : memref<128x640xbf16, #tpu.memory_space<vmem>>, vector<128x128xbf16>,
    %c24_70 = arith.constant 24 : index
    %c0_71 = arith.constant 0 : index
    %63 = vector.load %arg10[%c24_70, %c0_71] : memref<160x128xf32, #tpu.memory_space<vmem>>, vector<128x128xf32>
    %64 = arith.truncf %63 : vector<128x128xf32> to vector<128x128xbf16>
    %c0_72 = arith.constant 0 : index
    %c384_73 = arith.constant 384 : index
    %65 = vector.load %arg11[%c0_72, %c384_73] : memref<128x640xbf16, #tpu.memory_space<vmem>>, vector<128x128xbf16>
    tpu.vector_store %arg11[%c0_72, %c384_73], %64 {strides = array<i32>} : memref<128x640xbf16, #tpu.memory_space<vmem>>, vector<128x128xbf16>,
    %c32_74 = arith.constant 32 : index
    %c0_75 = arith.constant 0 : index
    %66 = vector.load %arg10[%c32_74, %c0_75] : memref<160x128xf32, #tpu.memory_space<vmem>>, vector<128x128xf32>
    %67 = arith.truncf %66 : vector<128x128xf32> to vector<128x128xbf16>
    %c0_76 = arith.constant 0 : index
    %c512_77 = arith.constant 512 : index
    %68 = vector.load %arg11[%c0_76, %c512_77] : memref<128x640xbf16, #tpu.memory_space<vmem>>, vector<128x128xbf16>
    tpu.vector_store %arg11[%c0_76, %c512_77], %67 {strides = array<i32>} : memref<128x640xbf16, #tpu.memory_space<vmem>>, vector<128x128xbf16>,
    %c0_78 = arith.constant 0 : index
    %c0_79 = arith.constant 0 : index
    %69 = vector.load %arg11[%c0_78, %c0_79] : memref<128x640xbf16, #tpu.memory_space<vmem>>, vector<128x640xbf16>
    %c0_80 = arith.constant 0 : index
    %c0_81 = arith.constant 0 : index
    %70 = vector.load %arg4[%c0_80, %c0_81] : memref<640x128xbf16, #tpu.memory_space<vmem>>, vector<640x128xbf16>
    %cst_82 = arith.constant dense<0.000000e+00> : vector<128x128xf32>
    %71 = tpu.matmul %69, %70, %cst_82 {dimension_numbers = #tpu.dot_dimension_numbers<[1], [0], [0], [1], [0, 0, 1, 1], [], []>} : vector<128x640xbf16>, vector<640x128xbf16>, vector<128x128xf32> -> vector<128x128xf32>
    %c2 = arith.constant 2 : index
    %c0_83 = arith.constant 0 : index
    %72 = vector.load %arg5[%c2, %c0_83] : memref<3x128xf32, #tpu.memory_space<vmem>>, vector<1x128xf32>
    %73 = vector.broadcast %72 : vector<1x128xf32> to vector<128x128xf32>
    %74 = arith.addf %71, %73 : vector<128x128xf32>
    %cst_84 = arith.constant 0.000000e+00 : f32
    %75 = vector.broadcast %cst_84 : f32 to vector<128x128xf32>
    %76 = arith.maximumf %74, %75 : vector<128x128xf32>
    %77 = arith.truncf %76 : vector<128x128xf32> to vector<128x128xbf16>
    %c0_85 = arith.constant 0 : index
    %c0_86 = arith.constant 0 : index
    %78 = vector.load %arg6[%c0_85, %c0_86] : memref<128x64xbf16, #tpu.memory_space<vmem>>, vector<128x64xbf16>
    %cst_87 = arith.constant dense<0.000000e+00> : vector<128x64xf32>
    %79 = tpu.matmul %77, %78, %cst_87 {dimension_numbers = #tpu.dot_dimension_numbers<[1], [0], [0], [1], [0, 0, 1, 1], [], []>} : vector<128x128xbf16>, vector<128x64xbf16>, vector<128x64xf32> -> vector<128x64xf32>
    %c0_88 = arith.constant 0 : index
    %c0_89 = arith.constant 0 : index
    %80 = vector.load %arg7[%c0_88, %c0_89] : memref<1x64xf32, #tpu.memory_space<vmem>>, vector<1x64xf32>
    %81 = vector.broadcast %80 : vector<1x64xf32> to vector<128x64xf32>
    %82 = arith.addf %79, %81 : vector<128x64xf32>
    %83 = vector.extract_strided_slice %82 {offsets = [0, 0], sizes = [128, 32], strides = [1, 1]} : vector<128x64xf32> to vector<128x32xf32>
    %84 = arith.truncf %83 : vector<128x32xf32> to vector<128x32xbf16>
    %c0_90 = arith.constant 0 : index
    %c0_91 = arith.constant 0 : index
    %85 = vector.load %arg8[%c0_90, %c0_91] : memref<128x32xbf16, #tpu.memory_space<vmem>>, vector<128x32xbf16>
    tpu.vector_store %arg8[%c0_90, %c0_91], %84 {strides = array<i32>} : memref<128x32xbf16, #tpu.memory_space<vmem>>, vector<128x32xbf16>,
    %86 = vector.extract_strided_slice %82 {offsets = [0, 32], sizes = [128, 32], strides = [1, 1]} : vector<128x64xf32> to vector<128x32xf32>
    %87 = arith.truncf %86 : vector<128x32xf32> to vector<128x32xbf16>
    %c0_92 = arith.constant 0 : index
    %c0_93 = arith.constant 0 : index
    %88 = vector.load %arg9[%c0_92, %c0_93] : memref<128x32xbf16, #tpu.memory_space<vmem>>, vector<128x32xbf16>
    tpu.vector_store %arg9[%c0_92, %c0_93], %87 {strides = array<i32>} : memref<128x32xbf16, #tpu.memory_space<vmem>>, vector<128x32xbf16>,
    return
  }
  func.func @transform_0(%arg0: i32) -> (i32, i32) {
    %c0_i32 = arith.constant 0 : i32
    %c0_i32_0 = arith.constant 0 : i32
    %c0_i32_1 = arith.constant 0 : i32
    return %c0_i32, %c0_i32_0 : i32, i32
  }
  func.func @transform_1(%arg0: i32) -> (i32, i32) {
    %c0_i32 = arith.constant 0 : i32
    %c0_i32_0 = arith.constant 0 : i32
    %c0_i32_1 = arith.constant 0 : i32
    return %c0_i32, %c0_i32_0 : i32, i32
  }
  func.func @transform_2(%arg0: i32) -> (i32, i32) {
    %c0_i32 = arith.constant 0 : i32
    %c0_i32_0 = arith.constant 0 : i32
    %c0_i32_1 = arith.constant 0 : i32
    return %c0_i32, %c0_i32_0 : i32, i32
  }
  func.func @transform_3(%arg0: i32) -> (i32, i32) {
    %c0_i32 = arith.constant 0 : i32
    %c0_i32_0 = arith.constant 0 : i32
    %c0_i32_1 = arith.constant 0 : i32
    return %c0_i32, %c0_i32_0 : i32, i32
  }
  func.func @transform_4(%arg0: i32) -> (i32, i32) {
    %c0_i32 = arith.constant 0 : i32
    %c0_i32_0 = arith.constant 0 : i32
    %c0_i32_1 = arith.constant 0 : i32
    return %c0_i32, %c0_i32_0 : i32, i32
  }
  func.func @transform_5(%arg0: i32) -> (i32, i32) {
    %c0_i32 = arith.constant 0 : i32
    %c0_i32_0 = arith.constant 0 : i32
    %c0_i32_1 = arith.constant 0 : i32
    return %c0_i32, %c0_i32_0 : i32, i32
  }
  func.func @transform_6(%arg0: i32) -> (i32, i32) {
    %c0_i32 = arith.constant 0 : i32
    %c0_i32_0 = arith.constant 0 : i32
    %c0_i32_1 = arith.constant 0 : i32
    return %c0_i32, %c0_i32_0 : i32, i32
  }
  func.func @transform_7(%arg0: i32) -> (i32, i32) {
    %c0_i32 = arith.constant 0 : i32
    %c0_i32_0 = arith.constant 0 : i32
    %c0_i32_1 = arith.constant 0 : i32
    return %c0_i32, %c0_i32_0 : i32, i32
  }
  func.func @transform_8(%arg0: i32) -> (i32, i32) {
    %c0_i32 = arith.constant 0 : i32
    %c0_i32_0 = arith.constant 0 : i32
    %c0_i32_1 = arith.constant 0 : i32
    return %c0_i32, %c0_i32_0 : i32, i32
  }
}

module attributes {stable_mosaic.version = 11 : i64} {
  func.func @bilstm_decim_kernel(%arg0: i32, %arg1: memref<4x8x32xbf16, #tpu.memory_space<vmem>>, %arg2: memref<4x8x32xbf16, #tpu.memory_space<vmem>>, %arg3: memref<16x64xf32, #tpu.memory_space<vmem>>, %arg4: memref<1x8x8xf32, #tpu.memory_space<vmem>>, %arg5: memref<1x8x8xf32, #tpu.memory_space<vmem>>, %arg6: memref<8x16xf32, #tpu.memory_space<vmem>>, %arg7: memref<8x16xf32, #tpu.memory_space<vmem>>) attributes {dimension_semantics = [#tpu.dimension_semantics<arbitrary>], iteration_bounds = array<i64: 4>, scalar_prefetch = 0 : i64, scratch_operands = 2 : i64, tpu.core_type = #tpu.core_type<tc>, window_params = [{transform_indices = @transform_0, window_bounds = array<i64: 4, 8, 32>}, {transform_indices = @transform_1, window_bounds = array<i64: 4, 8, 32>}, {pipeline_mode = #tpu.pipeline_mode<synchronous>, transform_indices = @transform_2, window_bounds = array<i64: 16, 64>}, {transform_indices = @transform_3, window_bounds = array<i64: 1, 8, 8>}, {transform_indices = @transform_4, window_bounds = array<i64: 1, 8, 8>}]} {
    %c0_i32 = arith.constant 0 : i32
    %0 = arith.cmpi eq, %arg0, %c0_i32 : i32
    %1 = arith.extui %0 : i1 to i32
    %c0_i32_0 = arith.constant 0 : i32
    %2 = arith.cmpi ne, %1, %c0_i32_0 : i32
    scf.if %2 {
      %cst_90 = arith.constant 0.000000e+00 : f32
      %289 = vector.broadcast %cst_90 : f32 to vector<8x16xf32>
      %c0_91 = arith.constant 0 : index
      %c0_92 = arith.constant 0 : index
      %290 = vector.load %arg6[%c0_91, %c0_92] : memref<8x16xf32, #tpu.memory_space<vmem>>, vector<8x16xf32>
      tpu.vector_store %arg6[%c0_91, %c0_92], %289 {strides = array<i32>} : memref<8x16xf32, #tpu.memory_space<vmem>>, vector<8x16xf32>,
      %cst_93 = arith.constant 0.000000e+00 : f32
      %291 = vector.broadcast %cst_93 : f32 to vector<8x16xf32>
      %c0_94 = arith.constant 0 : index
      %c0_95 = arith.constant 0 : index
      %292 = vector.load %arg7[%c0_94, %c0_95] : memref<8x16xf32, #tpu.memory_space<vmem>>, vector<8x16xf32>
      tpu.vector_store %arg7[%c0_94, %c0_95], %291 {strides = array<i32>} : memref<8x16xf32, #tpu.memory_space<vmem>>, vector<8x16xf32>,
    } else {
    }
    %c0 = arith.constant 0 : index
    %c0_1 = arith.constant 0 : index
    %3 = vector.load %arg3[%c0, %c0_1] : memref<16x64xf32, #tpu.memory_space<vmem>>, vector<16x64xf32>
    %c0_2 = arith.constant 0 : index
    %c0_3 = arith.constant 0 : index
    %4 = vector.load %arg6[%c0_2, %c0_3] : memref<8x16xf32, #tpu.memory_space<vmem>>, vector<8x16xf32>
    %c0_4 = arith.constant 0 : index
    %c0_5 = arith.constant 0 : index
    %5 = vector.load %arg7[%c0_4, %c0_5] : memref<8x16xf32, #tpu.memory_space<vmem>>, vector<8x16xf32>
    %cst = arith.constant dense<0.000000e+00> : vector<8x64xf32>
    %6 = tpu.matmul %4, %3, %cst {dimension_numbers = #tpu.dot_dimension_numbers<[1], [0], [0], [1], [0, 0, 1, 1], [], []>} : vector<8x16xf32>, vector<16x64xf32>, vector<8x64xf32> -> vector<8x64xf32>
    %c0_6 = arith.constant 0 : index
    %c0_7 = arith.constant 0 : index
    %c0_8 = arith.constant 0 : index
    %7 = vector.load %arg1[%c0_6, %c0_7, %c0_8] : memref<4x8x32xbf16, #tpu.memory_space<vmem>>, vector<1x8x32xbf16>
    %8 = vector.shape_cast %7 : vector<1x8x32xbf16> to vector<8x32xbf16>
    %9 = arith.extf %8 : vector<8x32xbf16> to vector<8x32xf32>
    %10 = vector.extract_strided_slice %6 {offsets = [0, 0], sizes = [8, 32], strides = [1, 1]} : vector<8x64xf32> to vector<8x32xf32>
    %11 = arith.addf %9, %10 : vector<8x32xf32>
    %c3 = arith.constant 3 : index
    %c0_9 = arith.constant 0 : index
    %c0_10 = arith.constant 0 : index
    %12 = vector.load %arg2[%c3, %c0_9, %c0_10] : memref<4x8x32xbf16, #tpu.memory_space<vmem>>, vector<1x8x32xbf16>
    %13 = vector.shape_cast %12 : vector<1x8x32xbf16> to vector<8x32xbf16>
    %14 = arith.extf %13 : vector<8x32xbf16> to vector<8x32xf32>
    %15 = vector.extract_strided_slice %6 {offsets = [0, 32], sizes = [8, 32], strides = [1, 1]} : vector<8x64xf32> to vector<8x32xf32>
    %16 = arith.addf %14, %15 : vector<8x32xf32>
    %17 = vector.extract_strided_slice %5 {offsets = [0, 0], sizes = [8, 8], strides = [1, 1]} : vector<8x16xf32> to vector<8x8xf32>
    %18 = vector.extract_strided_slice %11 {offsets = [0, 0], sizes = [8, 8], strides = [1, 1]} : vector<8x32xf32> to vector<8x8xf32>
    %19 = arith.negf %18 : vector<8x8xf32>
    %20 = math.exp %19 : vector<8x8xf32>
    %cst_11 = arith.constant 1.000000e+00 : f32
    %21 = vector.broadcast %cst_11 : f32 to vector<8x8xf32>
    %22 = arith.addf %21, %20 : vector<8x8xf32>
    %23 = arith.divf %21, %22 : vector<8x8xf32>
    %24 = vector.extract_strided_slice %11 {offsets = [0, 8], sizes = [8, 8], strides = [1, 1]} : vector<8x32xf32> to vector<8x8xf32>
    %25 = arith.negf %24 : vector<8x8xf32>
    %26 = math.exp %25 : vector<8x8xf32>
    %cst_12 = arith.constant 1.000000e+00 : f32
    %27 = vector.broadcast %cst_12 : f32 to vector<8x8xf32>
    %28 = arith.addf %27, %26 : vector<8x8xf32>
    %29 = arith.divf %27, %28 : vector<8x8xf32>
    %30 = vector.extract_strided_slice %11 {offsets = [0, 16], sizes = [8, 8], strides = [1, 1]} : vector<8x32xf32> to vector<8x8xf32>
    %31 = math.tanh %30 : vector<8x8xf32>
    %32 = vector.extract_strided_slice %11 {offsets = [0, 24], sizes = [8, 8], strides = [1, 1]} : vector<8x32xf32> to vector<8x8xf32>
    %33 = arith.negf %32 : vector<8x8xf32>
    %34 = math.exp %33 : vector<8x8xf32>
    %cst_13 = arith.constant 1.000000e+00 : f32
    %35 = vector.broadcast %cst_13 : f32 to vector<8x8xf32>
    %36 = arith.addf %35, %34 : vector<8x8xf32>
    %37 = arith.divf %35, %36 : vector<8x8xf32>
    %38 = arith.mulf %29, %17 : vector<8x8xf32>
    %39 = arith.mulf %23, %31 : vector<8x8xf32>
    %40 = arith.addf %38, %39 : vector<8x8xf32>
    %41 = math.tanh %40 : vector<8x8xf32>
    %42 = arith.mulf %37, %41 : vector<8x8xf32>
    %43 = vector.extract_strided_slice %5 {offsets = [0, 8], sizes = [8, 8], strides = [1, 1]} : vector<8x16xf32> to vector<8x8xf32>
    %44 = vector.extract_strided_slice %16 {offsets = [0, 0], sizes = [8, 8], strides = [1, 1]} : vector<8x32xf32> to vector<8x8xf32>
    %45 = arith.negf %44 : vector<8x8xf32>
    %46 = math.exp %45 : vector<8x8xf32>
    %cst_14 = arith.constant 1.000000e+00 : f32
    %47 = vector.broadcast %cst_14 : f32 to vector<8x8xf32>
    %48 = arith.addf %47, %46 : vector<8x8xf32>
    %49 = arith.divf %47, %48 : vector<8x8xf32>
    %50 = vector.extract_strided_slice %16 {offsets = [0, 8], sizes = [8, 8], strides = [1, 1]} : vector<8x32xf32> to vector<8x8xf32>
    %51 = arith.negf %50 : vector<8x8xf32>
    %52 = math.exp %51 : vector<8x8xf32>
    %cst_15 = arith.constant 1.000000e+00 : f32
    %53 = vector.broadcast %cst_15 : f32 to vector<8x8xf32>
    %54 = arith.addf %53, %52 : vector<8x8xf32>
    %55 = arith.divf %53, %54 : vector<8x8xf32>
    %56 = vector.extract_strided_slice %16 {offsets = [0, 16], sizes = [8, 8], strides = [1, 1]} : vector<8x32xf32> to vector<8x8xf32>
    %57 = math.tanh %56 : vector<8x8xf32>
    %58 = vector.extract_strided_slice %16 {offsets = [0, 24], sizes = [8, 8], strides = [1, 1]} : vector<8x32xf32> to vector<8x8xf32>
    %59 = arith.negf %58 : vector<8x8xf32>
    %60 = math.exp %59 : vector<8x8xf32>
    %cst_16 = arith.constant 1.000000e+00 : f32
    %61 = vector.broadcast %cst_16 : f32 to vector<8x8xf32>
    %62 = arith.addf %61, %60 : vector<8x8xf32>
    %63 = arith.divf %61, %62 : vector<8x8xf32>
    %64 = arith.mulf %55, %43 : vector<8x8xf32>
    %65 = arith.mulf %49, %57 : vector<8x8xf32>
    %66 = arith.addf %64, %65 : vector<8x8xf32>
    %67 = math.tanh %66 : vector<8x8xf32>
    %68 = arith.mulf %63, %67 : vector<8x8xf32>
    %69 = tpu.concatenate %42, %68 in 1 : vector<8x8xf32>, vector<8x8xf32> -> vector<8x16xf32>
    %c0_17 = arith.constant 0 : index
    %c0_18 = arith.constant 0 : index
    %70 = vector.load %arg6[%c0_17, %c0_18] : memref<8x16xf32, #tpu.memory_space<vmem>>, vector<8x16xf32>
    tpu.vector_store %arg6[%c0_17, %c0_18], %69 {strides = array<i32>} : memref<8x16xf32, #tpu.memory_space<vmem>>, vector<8x16xf32>,
    %71 = tpu.concatenate %40, %66 in 1 : vector<8x8xf32>, vector<8x8xf32> -> vector<8x16xf32>
    %c0_19 = arith.constant 0 : index
    %c0_20 = arith.constant 0 : index
    %72 = vector.load %arg7[%c0_19, %c0_20] : memref<8x16xf32, #tpu.memory_space<vmem>>, vector<8x16xf32>
    tpu.vector_store %arg7[%c0_19, %c0_20], %71 {strides = array<i32>} : memref<8x16xf32, #tpu.memory_space<vmem>>, vector<8x16xf32>,
    %c0_21 = arith.constant 0 : index
    %c0_22 = arith.constant 0 : index
    %73 = vector.load %arg6[%c0_21, %c0_22] : memref<8x16xf32, #tpu.memory_space<vmem>>, vector<8x16xf32>
    %c0_23 = arith.constant 0 : index
    %c0_24 = arith.constant 0 : index
    %74 = vector.load %arg7[%c0_23, %c0_24] : memref<8x16xf32, #tpu.memory_space<vmem>>, vector<8x16xf32>
    %cst_25 = arith.constant dense<0.000000e+00> : vector<8x64xf32>
    %75 = tpu.matmul %73, %3, %cst_25 {dimension_numbers = #tpu.dot_dimension_numbers<[1], [0], [0], [1], [0, 0, 1, 1], [], []>} : vector<8x16xf32>, vector<16x64xf32>, vector<8x64xf32> -> vector<8x64xf32>
    %c1 = arith.constant 1 : index
    %c0_26 = arith.constant 0 : index
    %c0_27 = arith.constant 0 : index
    %76 = vector.load %arg1[%c1, %c0_26, %c0_27] : memref<4x8x32xbf16, #tpu.memory_space<vmem>>, vector<1x8x32xbf16>
    %77 = vector.shape_cast %76 : vector<1x8x32xbf16> to vector<8x32xbf16>
    %78 = arith.extf %77 : vector<8x32xbf16> to vector<8x32xf32>
    %79 = vector.extract_strided_slice %75 {offsets = [0, 0], sizes = [8, 32], strides = [1, 1]} : vector<8x64xf32> to vector<8x32xf32>
    %80 = arith.addf %78, %79 : vector<8x32xf32>
    %c2 = arith.constant 2 : index
    %c0_28 = arith.constant 0 : index
    %c0_29 = arith.constant 0 : index
    %81 = vector.load %arg2[%c2, %c0_28, %c0_29] : memref<4x8x32xbf16, #tpu.memory_space<vmem>>, vector<1x8x32xbf16>
    %82 = vector.shape_cast %81 : vector<1x8x32xbf16> to vector<8x32xbf16>
    %83 = arith.extf %82 : vector<8x32xbf16> to vector<8x32xf32>
    %84 = vector.extract_strided_slice %75 {offsets = [0, 32], sizes = [8, 32], strides = [1, 1]} : vector<8x64xf32> to vector<8x32xf32>
    %85 = arith.addf %83, %84 : vector<8x32xf32>
    %86 = vector.extract_strided_slice %74 {offsets = [0, 0], sizes = [8, 8], strides = [1, 1]} : vector<8x16xf32> to vector<8x8xf32>
    %87 = vector.extract_strided_slice %80 {offsets = [0, 0], sizes = [8, 8], strides = [1, 1]} : vector<8x32xf32> to vector<8x8xf32>
    %88 = arith.negf %87 : vector<8x8xf32>
    %89 = math.exp %88 : vector<8x8xf32>
    %cst_30 = arith.constant 1.000000e+00 : f32
    %90 = vector.broadcast %cst_30 : f32 to vector<8x8xf32>
    %91 = arith.addf %90, %89 : vector<8x8xf32>
    %92 = arith.divf %90, %91 : vector<8x8xf32>
    %93 = vector.extract_strided_slice %80 {offsets = [0, 8], sizes = [8, 8], strides = [1, 1]} : vector<8x32xf32> to vector<8x8xf32>
    %94 = arith.negf %93 : vector<8x8xf32>
    %95 = math.exp %94 : vector<8x8xf32>
    %cst_31 = arith.constant 1.000000e+00 : f32
    %96 = vector.broadcast %cst_31 : f32 to vector<8x8xf32>
    %97 = arith.addf %96, %95 : vector<8x8xf32>
    %98 = arith.divf %96, %97 : vector<8x8xf32>
    %99 = vector.extract_strided_slice %80 {offsets = [0, 16], sizes = [8, 8], strides = [1, 1]} : vector<8x32xf32> to vector<8x8xf32>
    %100 = math.tanh %99 : vector<8x8xf32>
    %101 = vector.extract_strided_slice %80 {offsets = [0, 24], sizes = [8, 8], strides = [1, 1]} : vector<8x32xf32> to vector<8x8xf32>
    %102 = arith.negf %101 : vector<8x8xf32>
    %103 = math.exp %102 : vector<8x8xf32>
    %cst_32 = arith.constant 1.000000e+00 : f32
    %104 = vector.broadcast %cst_32 : f32 to vector<8x8xf32>
    %105 = arith.addf %104, %103 : vector<8x8xf32>
    %106 = arith.divf %104, %105 : vector<8x8xf32>
    %107 = arith.mulf %98, %86 : vector<8x8xf32>
    %108 = arith.mulf %92, %100 : vector<8x8xf32>
    %109 = arith.addf %107, %108 : vector<8x8xf32>
    %110 = math.tanh %109 : vector<8x8xf32>
    %111 = arith.mulf %106, %110 : vector<8x8xf32>
    %112 = vector.extract_strided_slice %74 {offsets = [0, 8], sizes = [8, 8], strides = [1, 1]} : vector<8x16xf32> to vector<8x8xf32>
    %113 = vector.extract_strided_slice %85 {offsets = [0, 0], sizes = [8, 8], strides = [1, 1]} : vector<8x32xf32> to vector<8x8xf32>
    %114 = arith.negf %113 : vector<8x8xf32>
    %115 = math.exp %114 : vector<8x8xf32>
    %cst_33 = arith.constant 1.000000e+00 : f32
    %116 = vector.broadcast %cst_33 : f32 to vector<8x8xf32>
    %117 = arith.addf %116, %115 : vector<8x8xf32>
    %118 = arith.divf %116, %117 : vector<8x8xf32>
    %119 = vector.extract_strided_slice %85 {offsets = [0, 8], sizes = [8, 8], strides = [1, 1]} : vector<8x32xf32> to vector<8x8xf32>
    %120 = arith.negf %119 : vector<8x8xf32>
    %121 = math.exp %120 : vector<8x8xf32>
    %cst_34 = arith.constant 1.000000e+00 : f32
    %122 = vector.broadcast %cst_34 : f32 to vector<8x8xf32>
    %123 = arith.addf %122, %121 : vector<8x8xf32>
    %124 = arith.divf %122, %123 : vector<8x8xf32>
    %125 = vector.extract_strided_slice %85 {offsets = [0, 16], sizes = [8, 8], strides = [1, 1]} : vector<8x32xf32> to vector<8x8xf32>
    %126 = math.tanh %125 : vector<8x8xf32>
    %127 = vector.extract_strided_slice %85 {offsets = [0, 24], sizes = [8, 8], strides = [1, 1]} : vector<8x32xf32> to vector<8x8xf32>
    %128 = arith.negf %127 : vector<8x8xf32>
    %129 = math.exp %128 : vector<8x8xf32>
    %cst_35 = arith.constant 1.000000e+00 : f32
    %130 = vector.broadcast %cst_35 : f32 to vector<8x8xf32>
    %131 = arith.addf %130, %129 : vector<8x8xf32>
    %132 = arith.divf %130, %131 : vector<8x8xf32>
    %133 = arith.mulf %124, %112 : vector<8x8xf32>
    %134 = arith.mulf %118, %126 : vector<8x8xf32>
    %135 = arith.addf %133, %134 : vector<8x8xf32>
    %136 = math.tanh %135 : vector<8x8xf32>
    %137 = arith.mulf %132, %136 : vector<8x8xf32>
    %138 = tpu.concatenate %111, %137 in 1 : vector<8x8xf32>, vector<8x8xf32> -> vector<8x16xf32>
    %c0_36 = arith.constant 0 : index
    %c0_37 = arith.constant 0 : index
    %139 = vector.load %arg6[%c0_36, %c0_37] : memref<8x16xf32, #tpu.memory_space<vmem>>, vector<8x16xf32>
    tpu.vector_store %arg6[%c0_36, %c0_37], %138 {strides = array<i32>} : memref<8x16xf32, #tpu.memory_space<vmem>>, vector<8x16xf32>,
    %140 = tpu.concatenate %109, %135 in 1 : vector<8x8xf32>, vector<8x8xf32> -> vector<8x16xf32>
    %c0_38 = arith.constant 0 : index
    %c0_39 = arith.constant 0 : index
    %141 = vector.load %arg7[%c0_38, %c0_39] : memref<8x16xf32, #tpu.memory_space<vmem>>, vector<8x16xf32>
    tpu.vector_store %arg7[%c0_38, %c0_39], %140 {strides = array<i32>} : memref<8x16xf32, #tpu.memory_space<vmem>>, vector<8x16xf32>,
    %c0_40 = arith.constant 0 : index
    %c0_41 = arith.constant 0 : index
    %142 = vector.load %arg6[%c0_40, %c0_41] : memref<8x16xf32, #tpu.memory_space<vmem>>, vector<8x16xf32>
    %c0_42 = arith.constant 0 : index
    %c0_43 = arith.constant 0 : index
    %143 = vector.load %arg7[%c0_42, %c0_43] : memref<8x16xf32, #tpu.memory_space<vmem>>, vector<8x16xf32>
    %cst_44 = arith.constant dense<0.000000e+00> : vector<8x64xf32>
    %144 = tpu.matmul %142, %3, %cst_44 {dimension_numbers = #tpu.dot_dimension_numbers<[1], [0], [0], [1], [0, 0, 1, 1], [], []>} : vector<8x16xf32>, vector<16x64xf32>, vector<8x64xf32> -> vector<8x64xf32>
    %c2_45 = arith.constant 2 : index
    %c0_46 = arith.constant 0 : index
    %c0_47 = arith.constant 0 : index
    %145 = vector.load %arg1[%c2_45, %c0_46, %c0_47] : memref<4x8x32xbf16, #tpu.memory_space<vmem>>, vector<1x8x32xbf16>
    %146 = vector.shape_cast %145 : vector<1x8x32xbf16> to vector<8x32xbf16>
    %147 = arith.extf %146 : vector<8x32xbf16> to vector<8x32xf32>
    %148 = vector.extract_strided_slice %144 {offsets = [0, 0], sizes = [8, 32], strides = [1, 1]} : vector<8x64xf32> to vector<8x32xf32>
    %149 = arith.addf %147, %148 : vector<8x32xf32>
    %c1_48 = arith.constant 1 : index
    %c0_49 = arith.constant 0 : index
    %c0_50 = arith.constant 0 : index
    %150 = vector.load %arg2[%c1_48, %c0_49, %c0_50] : memref<4x8x32xbf16, #tpu.memory_space<vmem>>, vector<1x8x32xbf16>
    %151 = vector.shape_cast %150 : vector<1x8x32xbf16> to vector<8x32xbf16>
    %152 = arith.extf %151 : vector<8x32xbf16> to vector<8x32xf32>
    %153 = vector.extract_strided_slice %144 {offsets = [0, 32], sizes = [8, 32], strides = [1, 1]} : vector<8x64xf32> to vector<8x32xf32>
    %154 = arith.addf %152, %153 : vector<8x32xf32>
    %155 = vector.extract_strided_slice %143 {offsets = [0, 0], sizes = [8, 8], strides = [1, 1]} : vector<8x16xf32> to vector<8x8xf32>
    %156 = vector.extract_strided_slice %149 {offsets = [0, 0], sizes = [8, 8], strides = [1, 1]} : vector<8x32xf32> to vector<8x8xf32>
    %157 = arith.negf %156 : vector<8x8xf32>
    %158 = math.exp %157 : vector<8x8xf32>
    %cst_51 = arith.constant 1.000000e+00 : f32
    %159 = vector.broadcast %cst_51 : f32 to vector<8x8xf32>
    %160 = arith.addf %159, %158 : vector<8x8xf32>
    %161 = arith.divf %159, %160 : vector<8x8xf32>
    %162 = vector.extract_strided_slice %149 {offsets = [0, 8], sizes = [8, 8], strides = [1, 1]} : vector<8x32xf32> to vector<8x8xf32>
    %163 = arith.negf %162 : vector<8x8xf32>
    %164 = math.exp %163 : vector<8x8xf32>
    %cst_52 = arith.constant 1.000000e+00 : f32
    %165 = vector.broadcast %cst_52 : f32 to vector<8x8xf32>
    %166 = arith.addf %165, %164 : vector<8x8xf32>
    %167 = arith.divf %165, %166 : vector<8x8xf32>
    %168 = vector.extract_strided_slice %149 {offsets = [0, 16], sizes = [8, 8], strides = [1, 1]} : vector<8x32xf32> to vector<8x8xf32>
    %169 = math.tanh %168 : vector<8x8xf32>
    %170 = vector.extract_strided_slice %149 {offsets = [0, 24], sizes = [8, 8], strides = [1, 1]} : vector<8x32xf32> to vector<8x8xf32>
    %171 = arith.negf %170 : vector<8x8xf32>
    %172 = math.exp %171 : vector<8x8xf32>
    %cst_53 = arith.constant 1.000000e+00 : f32
    %173 = vector.broadcast %cst_53 : f32 to vector<8x8xf32>
    %174 = arith.addf %173, %172 : vector<8x8xf32>
    %175 = arith.divf %173, %174 : vector<8x8xf32>
    %176 = arith.mulf %167, %155 : vector<8x8xf32>
    %177 = arith.mulf %161, %169 : vector<8x8xf32>
    %178 = arith.addf %176, %177 : vector<8x8xf32>
    %179 = math.tanh %178 : vector<8x8xf32>
    %180 = arith.mulf %175, %179 : vector<8x8xf32>
    %181 = vector.extract_strided_slice %143 {offsets = [0, 8], sizes = [8, 8], strides = [1, 1]} : vector<8x16xf32> to vector<8x8xf32>
    %182 = vector.extract_strided_slice %154 {offsets = [0, 0], sizes = [8, 8], strides = [1, 1]} : vector<8x32xf32> to vector<8x8xf32>
    %183 = arith.negf %182 : vector<8x8xf32>
    %184 = math.exp %183 : vector<8x8xf32>
    %cst_54 = arith.constant 1.000000e+00 : f32
    %185 = vector.broadcast %cst_54 : f32 to vector<8x8xf32>
    %186 = arith.addf %185, %184 : vector<8x8xf32>
    %187 = arith.divf %185, %186 : vector<8x8xf32>
    %188 = vector.extract_strided_slice %154 {offsets = [0, 8], sizes = [8, 8], strides = [1, 1]} : vector<8x32xf32> to vector<8x8xf32>
    %189 = arith.negf %188 : vector<8x8xf32>
    %190 = math.exp %189 : vector<8x8xf32>
    %cst_55 = arith.constant 1.000000e+00 : f32
    %191 = vector.broadcast %cst_55 : f32 to vector<8x8xf32>
    %192 = arith.addf %191, %190 : vector<8x8xf32>
    %193 = arith.divf %191, %192 : vector<8x8xf32>
    %194 = vector.extract_strided_slice %154 {offsets = [0, 16], sizes = [8, 8], strides = [1, 1]} : vector<8x32xf32> to vector<8x8xf32>
    %195 = math.tanh %194 : vector<8x8xf32>
    %196 = vector.extract_strided_slice %154 {offsets = [0, 24], sizes = [8, 8], strides = [1, 1]} : vector<8x32xf32> to vector<8x8xf32>
    %197 = arith.negf %196 : vector<8x8xf32>
    %198 = math.exp %197 : vector<8x8xf32>
    %cst_56 = arith.constant 1.000000e+00 : f32
    %199 = vector.broadcast %cst_56 : f32 to vector<8x8xf32>
    %200 = arith.addf %199, %198 : vector<8x8xf32>
    %201 = arith.divf %199, %200 : vector<8x8xf32>
    %202 = arith.mulf %193, %181 : vector<8x8xf32>
    %203 = arith.mulf %187, %195 : vector<8x8xf32>
    %204 = arith.addf %202, %203 : vector<8x8xf32>
    %205 = math.tanh %204 : vector<8x8xf32>
    %206 = arith.mulf %201, %205 : vector<8x8xf32>
    %207 = tpu.concatenate %180, %206 in 1 : vector<8x8xf32>, vector<8x8xf32> -> vector<8x16xf32>
    %c0_57 = arith.constant 0 : index
    %c0_58 = arith.constant 0 : index
    %208 = vector.load %arg6[%c0_57, %c0_58] : memref<8x16xf32, #tpu.memory_space<vmem>>, vector<8x16xf32>
    tpu.vector_store %arg6[%c0_57, %c0_58], %207 {strides = array<i32>} : memref<8x16xf32, #tpu.memory_space<vmem>>, vector<8x16xf32>,
    %209 = tpu.concatenate %178, %204 in 1 : vector<8x8xf32>, vector<8x8xf32> -> vector<8x16xf32>
    %c0_59 = arith.constant 0 : index
    %c0_60 = arith.constant 0 : index
    %210 = vector.load %arg7[%c0_59, %c0_60] : memref<8x16xf32, #tpu.memory_space<vmem>>, vector<8x16xf32>
    tpu.vector_store %arg7[%c0_59, %c0_60], %209 {strides = array<i32>} : memref<8x16xf32, #tpu.memory_space<vmem>>, vector<8x16xf32>,
    %c0_61 = arith.constant 0 : index
    %c0_62 = arith.constant 0 : index
    %211 = vector.load %arg6[%c0_61, %c0_62] : memref<8x16xf32, #tpu.memory_space<vmem>>, vector<8x16xf32>
    %c0_63 = arith.constant 0 : index
    %c0_64 = arith.constant 0 : index
    %212 = vector.load %arg7[%c0_63, %c0_64] : memref<8x16xf32, #tpu.memory_space<vmem>>, vector<8x16xf32>
    %cst_65 = arith.constant dense<0.000000e+00> : vector<8x64xf32>
    %213 = tpu.matmul %211, %3, %cst_65 {dimension_numbers = #tpu.dot_dimension_numbers<[1], [0], [0], [1], [0, 0, 1, 1], [], []>} : vector<8x16xf32>, vector<16x64xf32>, vector<8x64xf32> -> vector<8x64xf32>
    %c3_66 = arith.constant 3 : index
    %c0_67 = arith.constant 0 : index
    %c0_68 = arith.constant 0 : index
    %214 = vector.load %arg1[%c3_66, %c0_67, %c0_68] : memref<4x8x32xbf16, #tpu.memory_space<vmem>>, vector<1x8x32xbf16>
    %215 = vector.shape_cast %214 : vector<1x8x32xbf16> to vector<8x32xbf16>
    %216 = arith.extf %215 : vector<8x32xbf16> to vector<8x32xf32>
    %217 = vector.extract_strided_slice %213 {offsets = [0, 0], sizes = [8, 32], strides = [1, 1]} : vector<8x64xf32> to vector<8x32xf32>
    %218 = arith.addf %216, %217 : vector<8x32xf32>
    %c0_69 = arith.constant 0 : index
    %c0_70 = arith.constant 0 : index
    %c0_71 = arith.constant 0 : index
    %219 = vector.load %arg2[%c0_69, %c0_70, %c0_71] : memref<4x8x32xbf16, #tpu.memory_space<vmem>>, vector<1x8x32xbf16>
    %220 = vector.shape_cast %219 : vector<1x8x32xbf16> to vector<8x32xbf16>
    %221 = arith.extf %220 : vector<8x32xbf16> to vector<8x32xf32>
    %222 = vector.extract_strided_slice %213 {offsets = [0, 32], sizes = [8, 32], strides = [1, 1]} : vector<8x64xf32> to vector<8x32xf32>
    %223 = arith.addf %221, %222 : vector<8x32xf32>
    %224 = vector.extract_strided_slice %212 {offsets = [0, 0], sizes = [8, 8], strides = [1, 1]} : vector<8x16xf32> to vector<8x8xf32>
    %225 = vector.extract_strided_slice %218 {offsets = [0, 0], sizes = [8, 8], strides = [1, 1]} : vector<8x32xf32> to vector<8x8xf32>
    %226 = arith.negf %225 : vector<8x8xf32>
    %227 = math.exp %226 : vector<8x8xf32>
    %cst_72 = arith.constant 1.000000e+00 : f32
    %228 = vector.broadcast %cst_72 : f32 to vector<8x8xf32>
    %229 = arith.addf %228, %227 : vector<8x8xf32>
    %230 = arith.divf %228, %229 : vector<8x8xf32>
    %231 = vector.extract_strided_slice %218 {offsets = [0, 8], sizes = [8, 8], strides = [1, 1]} : vector<8x32xf32> to vector<8x8xf32>
    %232 = arith.negf %231 : vector<8x8xf32>
    %233 = math.exp %232 : vector<8x8xf32>
    %cst_73 = arith.constant 1.000000e+00 : f32
    %234 = vector.broadcast %cst_73 : f32 to vector<8x8xf32>
    %235 = arith.addf %234, %233 : vector<8x8xf32>
    %236 = arith.divf %234, %235 : vector<8x8xf32>
    %237 = vector.extract_strided_slice %218 {offsets = [0, 16], sizes = [8, 8], strides = [1, 1]} : vector<8x32xf32> to vector<8x8xf32>
    %238 = math.tanh %237 : vector<8x8xf32>
    %239 = vector.extract_strided_slice %218 {offsets = [0, 24], sizes = [8, 8], strides = [1, 1]} : vector<8x32xf32> to vector<8x8xf32>
    %240 = arith.negf %239 : vector<8x8xf32>
    %241 = math.exp %240 : vector<8x8xf32>
    %cst_74 = arith.constant 1.000000e+00 : f32
    %242 = vector.broadcast %cst_74 : f32 to vector<8x8xf32>
    %243 = arith.addf %242, %241 : vector<8x8xf32>
    %244 = arith.divf %242, %243 : vector<8x8xf32>
    %245 = arith.mulf %236, %224 : vector<8x8xf32>
    %246 = arith.mulf %230, %238 : vector<8x8xf32>
    %247 = arith.addf %245, %246 : vector<8x8xf32>
    %248 = math.tanh %247 : vector<8x8xf32>
    %249 = arith.mulf %244, %248 : vector<8x8xf32>
    %250 = vector.extract_strided_slice %212 {offsets = [0, 8], sizes = [8, 8], strides = [1, 1]} : vector<8x16xf32> to vector<8x8xf32>
    %251 = vector.extract_strided_slice %223 {offsets = [0, 0], sizes = [8, 8], strides = [1, 1]} : vector<8x32xf32> to vector<8x8xf32>
    %252 = arith.negf %251 : vector<8x8xf32>
    %253 = math.exp %252 : vector<8x8xf32>
    %cst_75 = arith.constant 1.000000e+00 : f32
    %254 = vector.broadcast %cst_75 : f32 to vector<8x8xf32>
    %255 = arith.addf %254, %253 : vector<8x8xf32>
    %256 = arith.divf %254, %255 : vector<8x8xf32>
    %257 = vector.extract_strided_slice %223 {offsets = [0, 8], sizes = [8, 8], strides = [1, 1]} : vector<8x32xf32> to vector<8x8xf32>
    %258 = arith.negf %257 : vector<8x8xf32>
    %259 = math.exp %258 : vector<8x8xf32>
    %cst_76 = arith.constant 1.000000e+00 : f32
    %260 = vector.broadcast %cst_76 : f32 to vector<8x8xf32>
    %261 = arith.addf %260, %259 : vector<8x8xf32>
    %262 = arith.divf %260, %261 : vector<8x8xf32>
    %263 = vector.extract_strided_slice %223 {offsets = [0, 16], sizes = [8, 8], strides = [1, 1]} : vector<8x32xf32> to vector<8x8xf32>
    %264 = math.tanh %263 : vector<8x8xf32>
    %265 = vector.extract_strided_slice %223 {offsets = [0, 24], sizes = [8, 8], strides = [1, 1]} : vector<8x32xf32> to vector<8x8xf32>
    %266 = arith.negf %265 : vector<8x8xf32>
    %267 = math.exp %266 : vector<8x8xf32>
    %cst_77 = arith.constant 1.000000e+00 : f32
    %268 = vector.broadcast %cst_77 : f32 to vector<8x8xf32>
    %269 = arith.addf %268, %267 : vector<8x8xf32>
    %270 = arith.divf %268, %269 : vector<8x8xf32>
    %271 = arith.mulf %262, %250 : vector<8x8xf32>
    %272 = arith.mulf %256, %264 : vector<8x8xf32>
    %273 = arith.addf %271, %272 : vector<8x8xf32>
    %274 = math.tanh %273 : vector<8x8xf32>
    %275 = arith.mulf %270, %274 : vector<8x8xf32>
    %276 = tpu.concatenate %249, %275 in 1 : vector<8x8xf32>, vector<8x8xf32> -> vector<8x16xf32>
    %c0_78 = arith.constant 0 : index
    %c0_79 = arith.constant 0 : index
    %277 = vector.load %arg6[%c0_78, %c0_79] : memref<8x16xf32, #tpu.memory_space<vmem>>, vector<8x16xf32>
    tpu.vector_store %arg6[%c0_78, %c0_79], %276 {strides = array<i32>} : memref<8x16xf32, #tpu.memory_space<vmem>>, vector<8x16xf32>,
    %278 = tpu.concatenate %247, %273 in 1 : vector<8x8xf32>, vector<8x8xf32> -> vector<8x16xf32>
    %c0_80 = arith.constant 0 : index
    %c0_81 = arith.constant 0 : index
    %279 = vector.load %arg7[%c0_80, %c0_81] : memref<8x16xf32, #tpu.memory_space<vmem>>, vector<8x16xf32>
    tpu.vector_store %arg7[%c0_80, %c0_81], %278 {strides = array<i32>} : memref<8x16xf32, #tpu.memory_space<vmem>>, vector<8x16xf32>,
    %c0_82 = arith.constant 0 : index
    %c0_83 = arith.constant 0 : index
    %280 = vector.load %arg6[%c0_82, %c0_83] : memref<8x16xf32, #tpu.memory_space<vmem>>, vector<8x16xf32>
    %281 = vector.extract_strided_slice %280 {offsets = [0, 0], sizes = [8, 8], strides = [1, 1]} : vector<8x16xf32> to vector<8x8xf32>
    %c0_84 = arith.constant 0 : index
    %c0_85 = arith.constant 0 : index
    %c0_86 = arith.constant 0 : index
    %282 = vector.load %arg4[%c0_84, %c0_85, %c0_86] : memref<1x8x8xf32, #tpu.memory_space<vmem>>, vector<1x8x8xf32>
    %283 = vector.shape_cast %282 : vector<1x8x8xf32> to vector<8x8xf32>
    %284 = vector.shape_cast %281 : vector<8x8xf32> to vector<1x8x8xf32>
    tpu.vector_store %arg4[%c0_84, %c0_85, %c0_86], %284 {strides = array<i32>} : memref<1x8x8xf32, #tpu.memory_space<vmem>>, vector<1x8x8xf32>,
    %285 = vector.extract_strided_slice %280 {offsets = [0, 8], sizes = [8, 8], strides = [1, 1]} : vector<8x16xf32> to vector<8x8xf32>
    %c0_87 = arith.constant 0 : index
    %c0_88 = arith.constant 0 : index
    %c0_89 = arith.constant 0 : index
    %286 = vector.load %arg5[%c0_87, %c0_88, %c0_89] : memref<1x8x8xf32, #tpu.memory_space<vmem>>, vector<1x8x8xf32>
    %287 = vector.shape_cast %286 : vector<1x8x8xf32> to vector<8x8xf32>
    %288 = vector.shape_cast %285 : vector<8x8xf32> to vector<1x8x8xf32>
    tpu.vector_store %arg5[%c0_87, %c0_88, %c0_89], %288 {strides = array<i32>} : memref<1x8x8xf32, #tpu.memory_space<vmem>>, vector<1x8x8xf32>,
    return
  }
  func.func @transform_0(%arg0: i32) -> (i32, i32, i32) {
    %c0_i32 = arith.constant 0 : i32
    %c0_i32_0 = arith.constant 0 : i32
    %c0_i32_1 = arith.constant 0 : i32
    return %arg0, %c0_i32, %c0_i32_0 : i32, i32, i32
  }
  func.func @transform_1(%arg0: i32) -> (i32, i32, i32) {
    %c3_i32 = arith.constant 3 : i32
    %0 = arith.subi %c3_i32, %arg0 : i32
    %c0_i32 = arith.constant 0 : i32
    %c0_i32_0 = arith.constant 0 : i32
    %c0_i32_1 = arith.constant 0 : i32
    return %0, %c0_i32, %c0_i32_0 : i32, i32, i32
  }
  func.func @transform_2(%arg0: i32) -> (i32, i32) {
    %c0_i32 = arith.constant 0 : i32
    %c0_i32_0 = arith.constant 0 : i32
    %c0_i32_1 = arith.constant 0 : i32
    return %c0_i32, %c0_i32_0 : i32, i32
  }
  func.func @transform_3(%arg0: i32) -> (i32, i32, i32) {
    %c0_i32 = arith.constant 0 : i32
    %c0_i32_0 = arith.constant 0 : i32
    %c0_i32_1 = arith.constant 0 : i32
    return %arg0, %c0_i32, %c0_i32_0 : i32, i32, i32
  }
  func.func @transform_4(%arg0: i32) -> (i32, i32, i32) {
    %c3_i32 = arith.constant 3 : i32
    %0 = arith.subi %c3_i32, %arg0 : i32
    %c0_i32 = arith.constant 0 : i32
    %c0_i32_0 = arith.constant 0 : i32
    %c0_i32_1 = arith.constant 0 : i32
    return %0, %c0_i32, %c0_i32_0 : i32, i32, i32
  }
}

</mosaic_0001>

<bundles_post_ra>
// kernel: f0_encoder_forward.3
= control target key start
LH: loop header
LB: loop body
LE: loop exit
PB: predicated region body
PF: predicated region fallthrough
CT: control target
= control target key end

     0   :  { %10 = vsyncpa [#allocation5], 0  ;;  %s1775_s0 = inlined_call_operand.hbm [shape: bf16[16,8,32], index: 0, kind: input, shape index: {}]   ;;  %s1776_s1 = inlined_call_operand.hbm [shape: bf16[16,8,32], index: 1, kind: input, shape index: {}]   ;;  %s1777_s2 = inlined_call_operand.vmem [shape: f32[16,64], index: 2, kind: input, shape index: {}]   ;;  %s1778_s3 = inlined_call_operand.vmem [shape: f32[4,8,8], index: 3, kind: output, shape index: {0}]   ;;  %s1779_s4 = inlined_call_operand.vmem [shape: f32[4,8,8], index: 4, kind: output, shape index: {1}]  }
   0x1   :  { %12 = vsyncpa [#allocation5 + $0x1], 0 }
   0x2   :  { %13 = vsyncpa [#allocation7], 0 }
   0x3   :  { %15 = vsyncpa [#allocation7 + $0x1], 0  ;;  %s1432_s15 = smov 0   ;;  %s1434_s16 = smov 0  }
   0x4   :  { %s1436_s17 = smov 0   ;;  %s1438_s18 = smov 0  }
   0x5   :  { %s1440_s19 = smov 0   ;;  %s1442_s20 = smov 0  }
   0x6   :  { %s1444_s21 = smov 0  }
   0x7 LB: > { %s1466_s22 = sadd.s32 4294967295, %s1391_s21   ;;  %s28_s23 = sadd.s32 1, %s1387_s20  ;;  %s1391_s21 = sphi %s1444_s21, %s1801_s21   ;;  %s1387_s20 = sphi %s1442_s20, %s1800_s20   ;;  %s1383_s19 = sphi %s1440_s19, %s1799_s19   ;;  %s1379_s18 = sphi %s1438_s18, %s1798_s18   ;;  %s1375_s17 = sphi %s1436_s17, %s1797_s17   ;;  %s1371_s16 = sphi %s1434_s16, %s1796_s16   ;;  %s1367_s15 = sphi %s1432_s15, %s1795_s15  }
   0x8   : > { %p35_p0 = scmp.ne.s32.totalorder %s1387_s20, %s1383_s19  ;;  %p1782_p1 = scmp.eq.s32.totalorder %s1391_s21, 0 }
   0x9   : > { %p41_p2 = scmp.ne.s32.totalorder %s1383_s19, %s1379_s18  ;;  %p1781_p3 = scmp.eq.s32.totalorder %s1466_s22, 0 }
   0xa   : > { %p37_p4 = por %p1782_p1, %p35_p0  ;;  %p1780_p6 = scmp.lt.s32.totalorder %s1391_s21, 4 }
   0xb   : > { %p1478_p5 = por %p1781_p3, %p41_p2  ;;  %s171_s25 = sand.u32 1, %s1387_s20  }
   0xc   : > { %s1071_s26 = sshll.u32 %s1391_s21, 8  ;;  %s1039_s27 = sshll.u32 %s171_s25, 4 }
   0xd   : > { %s1785_s24 = scalar_select %p1478_p5, 1, 0 }
   0xe   : > { %s1488_s30 = scalar_lea.hbm %s1775_s0, %s1071_s26  ;;  %s175_s5 = scalar_lea.vmem [#allocation4], %s1039_s27 }
   0xf   : > { %s182_s6 = sshll.u32 %s175_s5, 4  ;;  %p1492_p7 = pnand %p1780_p6, %p37_p4  ;;  %s1496_s6 = int_to_ptr.vmem [resolvable:$true] %s182_s6 }
  0x10   : > { %s1498_s8 = scalar_lea.sflag [#allocation5], %s171_s25  ;;  %s1269_s9 = scalar_lea.hbm %s1488_s30, 256 }
  0x11   : > { %p1270_p8 = scmp.ne.s32.totalorder %s1488_s30, %s1269_s9  ;;  %p1271_p9 = pneg %p1492_p7 }
  0x12   : > { %s1274_s12 = scalar_lea.hbm %s1775_s0, 1024  ;;  %p1275_p12 = scmp.lt.u32.totalorder %s1488_s30, %s1775_s0 }
  0x13   : > { %p1272_p10 = pnand %p1271_p9, %p1270_p8  ;;  %p1276_p13 = scmp.lt.u32.totalorder %s1274_s12, %s1269_s9 }
  0x14   : > { %p1278_p2 = scmp.lt.u32.totalorder %s1269_s9, %s1488_s30 }
  0x15   : > { %p1273_p11 = pneg %p1272_p10  ;;  %p1277_p0 = por %p1276_p13, %p1275_p12 }
  0x17   : > { %p1279_p4 = por %p1278_p2, %p1277_p0 }
  0x19   : > { %p1280_p6 = pnand %p1279_p4, %p1273_p11 }
  0x1b   : > { %1283 = shalt.err (!%p1280_p6)
}
  0x1c   : > { %s1284_s18 = scalar_lea.vmem %s1496_s6, 256  ;;  %s1393_s25 = smov [#allocation4]  }
  0x1d   : > { %p1285_p8 = scmp.ne.s32.totalorder %s1496_s6, %s1284_s18  ;;  %s1289_s26 = sshll.u32 %s1393_s25, 4  ;;  %s1290_s26 = int_to_ptr.vmem [resolvable:$false] %s1289_s26 }
  0x1e   : > { %s1291_s27 = scalar_lea.vmem %s1290_s26, 512  ;;  %p1292_p1 = scmp.lt.s32.totalorder %s1496_s6, %s1290_s26 }
  0x1f   : > { %p1287_p10 = pnand %p1285_p8, %p1271_p9  ;;  %p1293_p12 = scmp.lt.s32.totalorder %s1291_s27, %s1284_s18 }
  0x21   : > { %p1288_p3 = pneg %p1287_p10  ;;  %p1294_p13 = por %p1293_p12, %p1292_p1 }
  0x23   : > { %p1295_p0 = pnand %p1294_p13, %p1288_p3 }
  0x25   : > { %1298 = shalt.err (!%p1295_p0)
}
  0x26   : > { %s1394_s28 = smov 64   ;;  %s1395_s29 = smov 4  }
  0x27   : > { %1132 = dma.hbm_to_vmem [thread:$0]  (!%p1492_p7), %s1488_s30, 256, %s1496_s6, %s1498_s8, %s1394_s28, %s1394_s28, %s1395_s29  }
  0x28   : > { %p1045_p1 = scmp.ge.s32.totalorder %s1391_s21, 1  ;;  %p212_p3 = scmp.lt.s32.totalorder %s1391_s21, 5 }
  0x29   : > { %s1536_s9 = sadd.s32 1, %s1391_s21   ;;  %s51_s7 = ssub.s32 3, %s1391_s21 }
  0x2a   : > { %p1531_p6 = pnand %p1045_p1, %p212_p3  ;;  %s25_s10 = ssub.s32 %s1391_s21, %s1536_s9 }
  0x2b   : > { %p26_p9 = scmp.eq.s32.totalorder %s25_s10, 0  ;;  %s52_s11 = ssub.s32 3, %s1536_s9 }
  0x2c   : > { %s53_s12 = ssub.s32 %s51_s7, %s52_s11  ;;  %s56_s30 = sadd.s32 1, %s1375_s17 }
  0x2d   : > { %s1546_s6 = scalar_select %p26_p9, %s1387_s20, %s28_s23  }
  0x2e   : > { %p54_p7 = scmp.eq.s32.totalorder %s53_s12, 0  ;;  %p63_p11 = scmp.ne.s32.totalorder %s1375_s17, %s1371_s16 }
  0x2f   : > { %p69_p2 = scmp.ne.s32.totalorder %s1371_s16, %s1367_s15  ;;  %s192_s8 = sand.u32 1, %s1375_s17  }
  0x30   : > { %s1554_s13 = scalar_select %p54_p7, %s1375_s17, %s56_s30  }
  0x31   : > { %p1788_p4 = scmp.eq.s32.totalorder %s1391_s21, 0  ;;  %p1789_p10 = scmp.eq.s32.totalorder %s1466_s22, 0 }
  0x32   : > { %s1042_s18 = sshll.u32 %s192_s8, 4  ;;  %s1072_s25 = sshll.u32 %s51_s7, 8 }
  0x33   : > { %p65_p8 = por %p63_p11, %p1788_p4  ;;  %p1560_p12 = por %p69_p2, %p1789_p10 }
  0x34   : > { %s1567_s23 = scalar_lea.hbm %s1776_s1, %s1072_s25  ;;  %s196_s15 = scalar_lea.vmem [#allocation6], %s1042_s18 }
  0x35   : > { %s1790_s14 = scalar_select %p1560_p12, 1, 0 }
  0x36   : > { %s204_s10 = sshll.u32 %s196_s15, 4  ;;  %p1791_p13 = scmp.lt.s32.totalorder %s1391_s21, 4  ;;  %s1569_s10 = int_to_ptr.vmem [resolvable:$true] %s204_s10 }
  0x37   : > { %s1577_s7 = scalar_lea.sflag [#allocation7], %s192_s8  ;;  %s1299_s12 = scalar_lea.hbm %s1567_s23, 256 }
  0x38   : > { %p1573_p0 = pnand %p1791_p13, %p65_p8  ;;  %p1300_p1 = scmp.ne.s32.totalorder %s1567_s23, %s1299_s12 }
  0x39   : > { %s1304_s21 = scalar_lea.hbm %s1776_s1, 1024  ;;  %p1305_p11 = scmp.lt.u32.totalorder %s1567_s23, %s1776_s1 }
  0x3a   : > { %p1301_p3 = pneg %p1573_p0  ;;  %p1306_p2 = scmp.lt.u32.totalorder %s1304_s21, %s1299_s12 }
  0x3b   : > { %p1308_p8 = scmp.lt.u32.totalorder %s1299_s12, %s1567_s23 }
  0x3c   : > { %p1302_p9 = pnand %p1301_p3, %p1300_p1  ;;  %p1307_p4 = por %p1306_p2, %p1305_p11 }
  0x3e   : > { %p1303_p7 = pneg %p1302_p9  ;;  %p1309_p10 = por %p1308_p8, %p1307_p4 }
  0x40   : > { %p1310_p13 = pnand %p1309_p10, %p1303_p7 }
  0x42   : > { %1313 = shalt.err (!%p1310_p13)
}
  0x43   : > { %s1314_s8 = scalar_lea.vmem %s1569_s10, 256  ;;  %s1396_s27 = smov [#allocation6]  }
  0x44   : > { %p1315_p1 = scmp.ne.s32.totalorder %s1569_s10, %s1314_s8  ;;  %s1319_s15 = sshll.u32 %s1396_s27, 4  ;;  %s1320_s15 = int_to_ptr.vmem [resolvable:$false] %s1319_s15 }
  0x45   : > { %s1321_s30 = scalar_lea.vmem %s1320_s15, 512  ;;  %p1322_p5 = scmp.lt.s32.totalorder %s1569_s10, %s1320_s15 }
  0x46   : > { %p1317_p9 = pnand %p1315_p1, %p1301_p3  ;;  %p1323_p11 = scmp.lt.s32.totalorder %s1321_s30, %s1314_s8 }
  0x48   : > { %p1318_p12 = pneg %p1317_p9  ;;  %p1324_p2 = por %p1323_p11, %p1322_p5 }
  0x4a   : > { %p1325_p4 = pnand %p1324_p2, %p1318_p12 }
  0x4c   : > { %1328 = shalt.err (!%p1325_p4)
}
  0x4d   : > { %1135 = dma.hbm_to_vmem [thread:$0]  (!%p1573_p0), %s1567_s23, 256, %s1569_s10, %s1577_s7, %s1394_s28, %s1394_s28, %s1395_s29  }
  0x4e   : > { %216 = sbr.rel (%p1531_p6) target bundleno = 3526 (0xdc6), region = 32  ;;  %s218_s12 = sand.u32 (!%p1531_p6), 1, %s1383_s19  }
  0x4f   : > { %s1611_s18 = sshll.u32 (!%p1531_p6), %s218_s12, 4  ;;  %s219_s21 = scalar_lea.sflag (!%p1531_p6), [#allocation5], %s218_s12 }
  0x50   : > { %s222_s25 = scalar_lea.vmem (!%p1531_p6), [#allocation4], %s1611_s18  ;;  %p1793_p5 = scmp.ne.s32.totalorder (!%p1531_p6), %s1785_s24, 0 }
  0x55   : > { %1358 = dma.done.wait (%p1793_p5), %s219_s21, 256  }
  0x56   : > { %1360 = vsyncadd (%p1793_p5), %s219_s21, 4294967040  ;;  %s227_s11 = sand.u32 1, %s1371_s16   ;;  %p1794_p6 = scmp.ne.s32.totalorder %s1790_s14, 0 }
  0x57   : > { %s1619_s28 = sshll.u32 %s227_s11, 4  ;;  %s228_s29 = scalar_lea.sflag [#allocation7], %s227_s11 }
  0x58   : > { %s231_s5 = scalar_lea.vmem [#allocation6], %s1619_s28 }
  0x59   : > { %1362 = dma.done.wait (%p1794_p6), %s228_s29, 256  }
  0x5a   : > { %1364 = vsyncadd (%p1794_p6), %s228_s29, 4294967040  ;;  %p268_p12 = scmp.lt.s32.totalorder %s1466_s22, 3  ;;  %s272_s23 = ssub.s32 3, %s1466_s22 }
  0x5b   : > { %p273_p0 = scmp.lt.s32.totalorder %s272_s23, 3  ;;  %p1050_p3 = scmp.ne.s32.totalorder %s1466_s22, 0 }
  0x5c   : > { %s269_s24 = scalar_select %p268_p12, %s1466_s22, 3 }
  0x5d   : > { %s1803_s23 = smov (!%p273_p0, %s272_s23), 3  ;;  %281 = sbr.rel (%p1050_p3) target bundleno = 100 (0x64), region = 44 }
  0x5e   : > { %s1048_s10 = sshll.u32 %s269_s24, 3  ;;  %s1049_s27 = sshll.u32 %s1803_s23, 3  ;;  %vm282_vm0 = vcmask (!%p1050_p3), 130048   ;;  %v1397_v0 = vmov (!%p1050_p3), 0.0  }
  0x5f   : > { %s1632_s8 = scalar_lea.vmem %s1778_s3, %s1048_s10  ;;  %s1637_s14 = scalar_lea.vmem %s1779_s4, %s1049_s27  ;;  %283 = vst.msk [vmem:[#allocation2] sm:$0xff] (!%p1050_p3), %vm282_vm0, %v1397_v0  ;;  %284 = vst.msk [vmem:[#allocation3] sm:$0xff] (!%p1050_p3), %vm282_vm0, %v1397_v0 }
  0x64 PF: > { %v285_v1 = vld [vmem:[%s1777_s2] sm:$0xff]  ;;  %v286_v2 = vld [vmem:[%s1777_s2 + $0x8] sm:$0xff]  ;;  %v1398_v3 = vmov 0.0|0.0   ;;  %vm1399_vm1 = vmmov 0   ;;  %v1400_v5 = vmov 0.0   ;;  %vm289_vm2 = vcmask 130048  }
  0x65   : > { %1113 = vmatprep.subr.bf16.mxu0 %v1398_v3  ;;  %v1646_v4 = vpack.c.bf16 %v286_v2, %v285_v1  ;;  %1089 = vmatprep.mubr.msk.f32.mxu0 %vm1399_vm1, %v1400_v5  ;;  %v1660_v7 = vld [vmem:[%s222_s25] sm:$0xff]   ;;  %s1401_s22 = smov 96   ;;  %s1402_s23 = smov 112   ;;  %v1667_v14 = vld [vmem:[%s231_s5 + $0x8] sm:$0xff]   ;;  %vm434_vm3 = vcmask 64512  }
  0x66   : > { %1116 = vmatprep.subr.bf16.mxu1 %v1398_v3  ;;  %1096 = vmatprep.mubr.msk.f32.mxu1 %vm1399_vm1, %v1400_v5  ;;  %v287_v6 = vld [vmem:[#allocation2] sm:$0xff]  ;;  %v364_v8 = vunpack.c.l.bf16 %v1660_v7  ;;  %v368_v16 = vunpack.c.h.bf16 %v1667_v14  ;;  %v288_v24 = vld [vmem:[#allocation3] sm:$0xff]  ;;  %s1403_s24 = smov 8   ;;  %s1404_s10 = smov 16   ;;  %v520_v50 = vunpack.c.h.bf16 %v1660_v7  ;;  %v524_v57 = vunpack.c.l.bf16 %v1667_v14 }
  0x67   : > { %1115 = vmatpush3.bf16.msra.mxu0 %v1646_v4  ;;  %1118 = vmatpush3.bf16.msra.mxu1 %v1646_v4  ;;  %s1405_s7 = smov 104   ;;  %s1406_s26 = smov 120  }
  0x68   : > { %1119 = vmatprep.subr.bf16.mxu0 %v1398_v3  ;;  %1122 = vmatprep.subr.bf16.mxu1 %v1398_v3 }
  0x6a   : > { %1090 = vmatmul.mubr.msk.f32.vlgmr.msra.gmra.mrb[0].mxu0 %vm289_vm2, %v287_v6 }
  0x6b   : > { %1121 = vmatpush3.bf16.msra.mxu0 %v1646_v4  ;;  %1103 = vmatprep.mubr.msk.f32.mxu0 %vm1399_vm1, %v1400_v5 }
 0x13d   : > { %v359_v9 = vpop.f32.mrb[0].mxu0 }
 0x13e   : > { %v365_v10 = vadd.f32 %v364_v8, %v359_v9  ;;  %370 = vrot.lane.b32.xlu0 %v359_v9, %s1401_s22  ;;  %v1091_v11 = vpop.f32.mrb[1].mxu0 }
 0x140   : > { %1205 = vtanh.f32 %v365_v10  ;;  %v1053_v13 = vmul.f32 -1.442695, %v365_v10 }
 0x142   : > { %1207 = vpow2.f32 %v1053_v13 }
 0x14a   : > { %v1206_v12 = vpop.eup %1205 }
 0x14b   : > { %387 = vrot.lane.b32.xlu0 %v1206_v12, %s1402_s23 }
 0x14c   : > { %v1208_v15 = vpop.eup %1207 }
 0x14d   : > { %v377_v17 = vadd.f32 1.0, %v1208_v15 }
 0x14f   : > { %1209 = vrcp.f32 %v377_v17 }
 0x159   : > { %v1210_v20 = vpop.eup %1209 }
 0x1b0   : > { %v371_v18 = vpop.permute.xlu0 %370 }
 0x1b1   : > { %v373_v19 = vadd.f32 %v371_v18, %v368_v16 }
 0x1b3   : > { %1211 = vtanh.f32 %v373_v19  ;;  %v1054_v25 = vmul.f32 -1.442695, %v373_v19 }
 0x1b5   : > { %1213 = vpow2.f32 %v1054_v25 }
 0x1bd   : > { %v1212_v21 = vpop.eup %1211  ;;  %v388_v22 = vpop.permute.xlu0 %387 }
 0x1be   : > { %v390_v23 = vmul.f32 %v1210_v20, %v388_v22  ;;  %411 = vrot.lane.b32.xlu1 %v1212_v21, %s1402_s23 }
 0x1bf   : > { %v1214_v26 = vpop.eup %1213 }
 0x1c0   : > { %392 = vrot.lane.b32.xlu0 %v390_v23, %s1403_s24  ;;  %v405_v27 = vadd.f32 1.0, %v1214_v26 }
 0x1c2   : > { %382 = vrot.lane.b32.xlu1 %v288_v24, %s1403_s24  ;;  %1215 = vrcp.f32 %v405_v27  ;;  %v1707_v27 = vld [vmem:[%s222_s25 + $0x8] sm:$0xff]  }
 0x1cc   : > { %v1216_v28 = vpop.eup %1215 }
 0x1cd   : > { %v409_v36 = vmul.f32 %v1216_v28, %v288_v24 }
 0x230   : > { %v412_v29 = vpop.permute.xlu1 %411 }
 0x231   : > { %v414_v30 = vmul.f32 %v1216_v28, %v412_v29 }
 0x232   : > { %v393_v33 = vpop.permute.xlu0 %392 }
 0x233   : > { %416 = vrot.lane.b32.xlu1 %v414_v30, %s1403_s24 }
 0x234   : > { %v383_v31 = vpop.permute.xlu1 %382 }
 0x235   : > { %v385_v32 = vmul.f32 %v1210_v20, %v383_v31 }
 0x237   : > { %v395_v34 = vadd.f32 %v393_v33, %v385_v32 }
 0x239   : > { %1217 = vtanh.f32 %v395_v34 }
 0x243   : > { %v1218_v35 = vpop.eup %1217 }
 0x244   : > { %398 = vrot.lane.b32.xlu0 %v1218_v35, %s1404_s10  ;;  %v1715_v35 = vld [vmem:[%s231_s5] sm:$0xff]  }
 0x2a5   : > { %v417_v37 = vpop.permute.xlu1 %416 }
 0x2a6   : > { %v419_v38 = vadd.f32 %v417_v37, %v409_v36  ;;  %v679_v36 = vunpack.c.h.bf16 %v1715_v35 }
 0x2a8   : > { %1219 = vtanh.f32 %v419_v38 }
 0x2b2   : > { %v1220_v39 = vpop.eup %1219 }
 0x2b3   : > { %422 = vrot.lane.b32.xlu1 %v1220_v39, %s1404_s10 }
 0x2b6   : > { %v399_v40 = vpop.permute.xlu0 %398 }
 0x2b7   : > { %v401_v41 = vmul.f32 %v1210_v20, %v399_v40 }
 0x2b9   : > { %427 = vrot.lane.b32.xlu0 %v401_v41, %s1405_s7 }
 0x325   : > { %v423_v42 = vpop.permute.xlu1 %422 }
 0x326   : > { %v425_v43 = vmul.f32 %v1216_v28, %v423_v42  ;;  %v675_v28 = vunpack.c.l.bf16 %v1707_v27 }
 0x328   : > { %431 = vrot.lane.b32.xlu1 %v425_v43, %s1402_s23 }
 0x32b   : > { %v428_v44 = vpop.permute.xlu0 %427 }
 0x32c   : > { %438 = vrot.lane.b32.xlu1 %v395_v34, %s1406_s26 }
 0x39a   : > { %v432_v45 = vpop.permute.xlu1 %431 }
 0x39b   : > { %v435_v46 = vsel %vm434_vm3, %v428_v44, %v432_v45 }
 0x39c   : > { %436 = vst.msk [vmem:[#allocation2] sm:$0xff] %vm289_vm2, %v435_v46 }
 0x39e   : > { %v439_v47 = vpop.permute.xlu1 %438 }
 0x39f   : > { %v441_v48 = vsel %vm434_vm3, %v439_v47, %v419_v38 }
 0x3a0   : > { %442 = vst.msk [vmem:[#allocation3] sm:$0xff] %vm289_vm2, %v441_v48 }
 0x3a3   : > { %v443_v49 = vld [vmem:[#allocation2] sm:$0xff] }
 0x3a4   : > { %1097 = vmatmul.mubr.msk.f32.vlgmr.msra.gmra.mrb[0].mxu1 %vm289_vm2, %v443_v49 }
 0x3a5   : > { %1124 = vmatpush3.bf16.msra.mxu1 %v1646_v4  ;;  %1110 = vmatprep.mubr.msk.f32.mxu1 %vm1399_vm1, %v1400_v5 }
 0x3a7   : > { %v444_v55 = vld [vmem:[#allocation3] sm:$0xff] }
 0x477   : > { %v514_v51 = vpop.f32.mrb[0].mxu1 }
 0x478   : > { %v521_v52 = vadd.f32 %v520_v50, %v514_v51  ;;  %526 = vrot.lane.b32.xlu0 %v514_v51, %s1401_s22  ;;  %v1098_v53 = vpop.f32.mrb[1].mxu1 }
 0x47a   : > { %1221 = vtanh.f32 %v521_v52  ;;  %v1058_v56 = vmul.f32 -1.442695, %v521_v52 }
 0x47c   : > { %1223 = vpow2.f32 %v1058_v56 }
 0x484   : > { %v1222_v54 = vpop.eup %1221 }
 0x485   : > { %543 = vrot.lane.b32.xlu0 %v1222_v54, %s1402_s23 }
 0x486   : > { %v1224_v58 = vpop.eup %1223 }
 0x487   : > { %v533_v60 = vadd.f32 1.0, %v1224_v58 }
 0x489   : > { %538 = vrot.lane.b32.xlu0 %v444_v55, %s1403_s24 }
 0x4ea   : > { %v527_v59 = vpop.permute.xlu0 %526 }
 0x4eb   : > { %v529_v61 = vadd.f32 %v527_v59, %v524_v57 }
 0x4ed   : > { %1225 = vtanh.f32 %v529_v61  ;;  %v1059_v2 = vmul.f32 -1.442695, %v529_v61 }
 0x4ee   : > { %1227 = vrcp.f32 %v533_v60 }
 0x4ef   : > { %1229 = vpow2.f32 %v1059_v2 }
 0x4f7   : > { %v1226_v62 = vpop.eup %1225  ;;  %v544_v63 = vpop.permute.xlu0 %543 }
 0x4f8   : > { %567 = vrot.lane.b32.xlu1 %v1226_v62, %s1402_s23  ;;  %v1228_v0 = vpop.eup %1227 }
 0x4f9   : > { %v546_v1 = vmul.f32 %v1228_v0, %v544_v63  ;;  %v1230_v3 = vpop.eup %1229 }
 0x4fa   : > { %v561_v4 = vadd.f32 1.0, %v1230_v3 }
 0x4fb   : > { %v539_v6 = vpop.permute.xlu0 %538 }
 0x4fc   : > { %548 = vrot.lane.b32.xlu1 %v546_v1, %s1403_s24  ;;  %1231 = vrcp.f32 %v561_v4  ;;  %v541_v9 = vmul.f32 %v1228_v0, %v539_v6  ;;  %v830_v6 = vunpack.c.h.bf16 %v1707_v27 }
 0x506   : > { %v1232_v5 = vpop.eup %1231 }
 0x507   : > { %v565_v13 = vmul.f32 %v1232_v5, %v444_v55 }
 0x56a   : > { %v568_v7 = vpop.permute.xlu1 %567 }
 0x56b   : > { %v570_v8 = vmul.f32 %v1232_v5, %v568_v7 }
 0x56d   : > { %572 = vrot.lane.b32.xlu0 %v570_v8, %s1403_s24 }
 0x56e   : > { %v549_v10 = vpop.permute.xlu1 %548 }
 0x56f   : > { %v551_v11 = vadd.f32 %v549_v10, %v541_v9 }
 0x571   : > { %1233 = vtanh.f32 %v551_v11 }
 0x57b   : > { %v1234_v12 = vpop.eup %1233 }
 0x57c   : > { %554 = vrot.lane.b32.xlu1 %v1234_v12, %s1404_s10 }
 0x5df   : > { %v573_v14 = vpop.permute.xlu0 %572 }
 0x5e0   : > { %v575_v15 = vadd.f32 %v573_v14, %v565_v13  ;;  %v833_v13 = vunpack.c.l.bf16 %v1715_v35 }
 0x5e2   : > { %1235 = vtanh.f32 %v575_v15 }
 0x5ec   : > { %v1236_v16 = vpop.eup %1235 }
 0x5ed   : > { %578 = vrot.lane.b32.xlu0 %v1236_v16, %s1404_s10 }
 0x5ee   : > { %v555_v17 = vpop.permute.xlu1 %554 }
 0x5ef   : > { %v557_v18 = vmul.f32 %v1228_v0, %v555_v17 }
 0x5f1   : > { %583 = vrot.lane.b32.xlu1 %v557_v18, %s1405_s7 }
 0x65f   : > { %v579_v19 = vpop.permute.xlu0 %578 }
 0x660   : > { %v581_v20 = vmul.f32 %v1232_v5, %v579_v19 }
 0x662   : > { %587 = vrot.lane.b32.xlu0 %v581_v20, %s1402_s23 }
 0x663   : > { %v584_v21 = vpop.permute.xlu1 %583 }
 0x666   : > { %593 = vrot.lane.b32.xlu0 %v551_v11, %s1406_s26 }
 0x6d4   : > { %v588_v22 = vpop.permute.xlu0 %587 }
 0x6d5   : > { %v590_v23 = vsel %vm434_vm3, %v584_v21, %v588_v22 }
 0x6d6   : > { %591 = vst.msk [vmem:[#allocation2] sm:$0xff] %vm289_vm2, %v590_v23 }
 0x6d8   : > { %v594_v24 = vpop.permute.xlu0 %593 }
 0x6d9   : > { %v596_v25 = vsel %vm434_vm3, %v594_v24, %v575_v15 }
 0x6da   : > { %597 = vst.msk [vmem:[#allocation3] sm:$0xff] %vm289_vm2, %v596_v25 }
 0x6dd   : > { %v598_v26 = vld [vmem:[#allocation2] sm:$0xff] }
 0x6de   : > { %1104 = vmatmul.mubr.msk.f32.vlgmr.msra.gmra.mrb[2].mxu0 %vm289_vm2, %v598_v26 }
 0x6e1   : > { %v599_v33 = vld [vmem:[#allocation3] sm:$0xff] }
 0x7b1   : > { %v669_v29 = vpop.f32.mrb[2].mxu0 }
 0x7b2   : > { %v676_v30 = vadd.f32 %v675_v28, %v669_v29  ;;  %681 = vrot.lane.b32.xlu1 %v669_v29, %s1401_s22  ;;  %v1105_v31 = vpop.f32.mrb[3].mxu0 }
 0x7b4   : > { %1237 = vtanh.f32 %v676_v30  ;;  %v1063_v34 = vmul.f32 -1.442695, %v676_v30 }
 0x7b6   : > { %1239 = vpow2.f32 %v1063_v34 }
 0x7be   : > { %v1238_v32 = vpop.eup %1237 }
 0x7bf   : > { %698 = vrot.lane.b32.xlu1 %v1238_v32, %s1402_s23 }
 0x7c0   : > { %v1240_v37 = vpop.eup %1239 }
 0x7c1   : > { %v688_v39 = vadd.f32 1.0, %v1240_v37 }
 0x7c3   : > { %693 = vrot.lane.b32.xlu1 %v599_v33, %s1403_s24 }
 0x824   : > { %v682_v38 = vpop.permute.xlu1 %681 }
 0x825   : > { %v684_v40 = vadd.f32 %v682_v38, %v679_v36 }
 0x827   : > { %1241 = vtanh.f32 %v684_v40  ;;  %v1064_v45 = vmul.f32 -1.442695, %v684_v40 }
 0x828   : > { %1243 = vrcp.f32 %v688_v39 }
 0x829   : > { %1245 = vpow2.f32 %v1064_v45 }
 0x831   : > { %v1242_v41 = vpop.eup %1241  ;;  %v699_v42 = vpop.permute.xlu1 %698 }
 0x832   : > { %722 = vrot.lane.b32.xlu0 %v1242_v41, %s1402_s23  ;;  %v1244_v43 = vpop.eup %1243 }
 0x833   : > { %v701_v44 = vmul.f32 %v1244_v43, %v699_v42  ;;  %v1246_v46 = vpop.eup %1245 }
 0x834   : > { %v716_v47 = vadd.f32 1.0, %v1246_v46 }
 0x835   : > { %v694_v49 = vpop.permute.xlu1 %693 }
 0x836   : > { %703 = vrot.lane.b32.xlu0 %v701_v44, %s1403_s24  ;;  %1247 = vrcp.f32 %v716_v47  ;;  %v696_v52 = vmul.f32 %v1244_v43, %v694_v49 }
 0x840   : > { %v1248_v48 = vpop.eup %1247 }
 0x841   : > { %v720_v56 = vmul.f32 %v1248_v48, %v599_v33 }
 0x8a4   : > { %v723_v50 = vpop.permute.xlu0 %722 }
 0x8a5   : > { %v725_v51 = vmul.f32 %v1248_v48, %v723_v50 }
 0x8a7   : > { %727 = vrot.lane.b32.xlu1 %v725_v51, %s1403_s24 }
 0x8a8   : > { %v704_v53 = vpop.permute.xlu0 %703 }
 0x8a9   : > { %v706_v54 = vadd.f32 %v704_v53, %v696_v52 }
 0x8ab   : > { %1249 = vtanh.f32 %v706_v54 }
 0x8b5   : > { %v1250_v55 = vpop.eup %1249 }
 0x8b6   : > { %709 = vrot.lane.b32.xlu0 %v1250_v55, %s1404_s10 }
 0x919   : > { %v728_v57 = vpop.permute.xlu1 %727 }
 0x91a   : > { %v730_v58 = vadd.f32 %v728_v57, %v720_v56 }
 0x91c   : > { %1251 = vtanh.f32 %v730_v58 }
 0x926   : > { %v1252_v59 = vpop.eup %1251 }
 0x927   : > { %733 = vrot.lane.b32.xlu1 %v1252_v59, %s1404_s10 }
 0x928   : > { %v710_v60 = vpop.permute.xlu0 %709 }
 0x929   : > { %v712_v61 = vmul.f32 %v1244_v43, %v710_v60 }
 0x92b   : > { %738 = vrot.lane.b32.xlu0 %v712_v61, %s1405_s7 }
 0x999   : > { %v734_v62 = vpop.permute.xlu1 %733 }
 0x99a   : > { %v736_v63 = vmul.f32 %v1248_v48, %v734_v62 }
 0x99c   : > { %742 = vrot.lane.b32.xlu1 %v736_v63, %s1402_s23 }
 0x99d   : > { %v739_v0 = vpop.permute.xlu0 %738 }
 0x9a0   : > { %748 = vrot.lane.b32.xlu1 %v706_v54, %s1406_s26 }
 0xa0e   : > { %v743_v1 = vpop.permute.xlu1 %742 }
 0xa0f   : > { %v745_v2 = vsel %vm434_vm3, %v739_v0, %v743_v1 }
 0xa10   : > { %746 = vst.msk [vmem:[#allocation2] sm:$0xff] %vm289_vm2, %v745_v2 }
 0xa12   : > { %v749_v3 = vpop.permute.xlu1 %748 }
 0xa13   : > { %v751_v4 = vsel %vm434_vm3, %v749_v3, %v730_v58 }
 0xa14   : > { %752 = vst.msk [vmem:[#allocation3] sm:$0xff] %vm289_vm2, %v751_v4 }
 0xa17   : > { %v753_v5 = vld [vmem:[#allocation2] sm:$0xff] }
 0xa18   : > { %1111 = vmatmul.mubr.msk.f32.vlgmr.msra.gmra.mrb[2].mxu1 %vm289_vm2, %v753_v5 }
 0xa1b   : > { %v754_v11 = vld [vmem:[#allocation3] sm:$0xff] }
 0xaeb   : > { %v824_v7 = vpop.f32.mrb[2].mxu1 }
 0xaec   : > { %v831_v8 = vadd.f32 %v830_v6, %v824_v7  ;;  %835 = vrot.lane.b32.xlu0 %v824_v7, %s1401_s22  ;;  %v1112_v9 = vpop.f32.mrb[3].mxu1 }
 0xaee   : > { %1253 = vtanh.f32 %v831_v8  ;;  %v1067_v12 = vmul.f32 -1.442695, %v831_v8 }
 0xaf0   : > { %1255 = vpow2.f32 %v1067_v12 }
 0xaf8   : > { %v1254_v10 = vpop.eup %1253 }
 0xaf9   : > { %852 = vrot.lane.b32.xlu0 %v1254_v10, %s1402_s23 }
 0xafa   : > { %v1256_v14 = vpop.eup %1255 }
 0xafb   : > { %v842_v16 = vadd.f32 1.0, %v1256_v14 }
 0xafd   : > { %847 = vrot.lane.b32.xlu0 %v754_v11, %s1403_s24 }
 0xb5e   : > { %v836_v15 = vpop.permute.xlu0 %835 }
 0xb5f   : > { %v838_v17 = vadd.f32 %v836_v15, %v833_v13 }
 0xb61   : > { %1257 = vtanh.f32 %v838_v17  ;;  %v1068_v22 = vmul.f32 -1.442695, %v838_v17 }
 0xb62   : > { %1259 = vrcp.f32 %v842_v16 }
 0xb63   : > { %1261 = vpow2.f32 %v1068_v22 }
 0xb6b   : > { %v1258_v18 = vpop.eup %1257  ;;  %v853_v19 = vpop.permute.xlu0 %852 }
 0xb6c   : > { %876 = vrot.lane.b32.xlu1 %v1258_v18, %s1402_s23  ;;  %v1260_v20 = vpop.eup %1259 }
 0xb6d   : > { %v855_v21 = vmul.f32 %v1260_v20, %v853_v19  ;;  %v1262_v23 = vpop.eup %1261 }
 0xb6e   : > { %v870_v24 = vadd.f32 1.0, %v1262_v23 }
 0xb6f   : > { %v848_v26 = vpop.permute.xlu0 %847 }
 0xb70   : > { %857 = vrot.lane.b32.xlu1 %v855_v21, %s1403_s24  ;;  %1263 = vrcp.f32 %v870_v24  ;;  %v850_v29 = vmul.f32 %v1260_v20, %v848_v26 }
 0xb7a   : > { %v1264_v25 = vpop.eup %1263 }
 0xb7b   : > { %v874_v33 = vmul.f32 %v1264_v25, %v754_v11 }
 0xbde   : > { %v877_v27 = vpop.permute.xlu1 %876 }
 0xbdf   : > { %v879_v28 = vmul.f32 %v1264_v25, %v877_v27 }
 0xbe1   : > { %881 = vrot.lane.b32.xlu0 %v879_v28, %s1403_s24 }
 0xbe2   : > { %v858_v30 = vpop.permute.xlu1 %857 }
 0xbe3   : > { %v860_v31 = vadd.f32 %v858_v30, %v850_v29 }
 0xbe5   : > { %1265 = vtanh.f32 %v860_v31 }
 0xbef   : > { %v1266_v32 = vpop.eup %1265 }
 0xbf0   : > { %863 = vrot.lane.b32.xlu1 %v1266_v32, %s1404_s10 }
 0xc53   : > { %v882_v34 = vpop.permute.xlu0 %881 }
 0xc54   : > { %v884_v35 = vadd.f32 %v882_v34, %v874_v33 }
 0xc56   : > { %1267 = vtanh.f32 %v884_v35 }
 0xc60   : > { %v1268_v36 = vpop.eup %1267 }
 0xc61   : > { %887 = vrot.lane.b32.xlu0 %v1268_v36, %s1404_s10 }
 0xc62   : > { %v864_v37 = vpop.permute.xlu1 %863 }
 0xc63   : > { %v866_v38 = vmul.f32 %v1260_v20, %v864_v37 }
 0xc65   : > { %892 = vrot.lane.b32.xlu1 %v866_v38, %s1405_s7 }
 0xc69   : > { %902 = vrot.lane.b32.xlu1 %v860_v31, %s1406_s26 }
 0xcd3   : > { %v888_v39 = vpop.permute.xlu0 %887 }
 0xcd4   : > { %v890_v40 = vmul.f32 %v1264_v25, %v888_v39 }
 0xcd6   : > { %896 = vrot.lane.b32.xlu0 %v890_v40, %s1402_s23 }
 0xcd7   : > { %v893_v41 = vpop.permute.xlu1 %892 }
 0xcdb   : > { %v903_v42 = vpop.permute.xlu1 %902 }
 0xcdc   : > { %v905_v43 = vsel %vm434_vm3, %v903_v42, %v884_v35 }
 0xcdd   : > { %906 = vst.msk [vmem:[#allocation3] sm:$0xff] %vm289_vm2, %v905_v43 }
 0xd48   : > { %v897_v44 = vpop.permute.xlu0 %896 }
 0xd49   : > { %v899_v45 = vsel %vm434_vm3, %v893_v41, %v897_v44 }
 0xd4a   : > { %900 = vst.msk [vmem:[#allocation2] sm:$0xff] %vm289_vm2, %v899_v45 }
 0xd51   : > { %v907_v46 = vld [vmem:[#allocation2] sm:$0xff] }
 0xd52   : > { %910 = vrot.lane.b32.xlu0 %v907_v46, %s1406_s26  ;;  %908 = vst.msk [vmem:[%s1632_s8] sm:$0xff] %vm434_vm3, %v907_v46 }
 0xdc4   : > { %v911_v47 = vpop.permute.xlu0 %910 }
 0xdc5   : > { %913 = vst.msk [vmem:[%s1637_s14] sm:$0xff] %vm434_vm3, %v911_v47 }
 0xdc6 PF: > { %p18_p7 = scmp.ge.s32.totalorder %s1536_s9, 6   ;;  %s1795_s15 = smov %s1371_s16 }
 0xdc7   : > { %s1796_s16 = smov %s1375_s17  ;;  %s1797_s17 = smov %s1554_s13 }
 0xdc8   : > { %s1798_s18 = smov %s1383_s19  ;;  %s1799_s19 = smov %s1387_s20 }
 0xdc9   : > { %s1800_s20 = smov %s1546_s6  ;;  %s1801_s21 = smov %s1536_s9 }
 0xdca   :  { %20 = sbr.rel (!%p18_p7) target bundleno = 7 (0x7), region = 107 }
 0xdd1   :  { %950 = vsyncpa [#allocation5], 1 }
 0xdd2   :  { %952 = vsyncpa [#allocation5 + $0x1], 1 }
 0xdd3   :  { %953 = vsyncpa [#allocation7], 1 }
 0xdd4   :  { %955 = vsyncpa [#allocation7 + $0x1], 1 }

// kernel: f0_encoder_forward.2
= control target key start
LH: loop header
LB: loop body
LE: loop exit
PB: predicated region body
PF: predicated region fallthrough
CT: control target
= control target key end

     0   :  { %14 = vsyncpa [#allocation5], 0  ;;  %s4637_s0 = inlined_call_operand.hbm [shape: f32[128,128], index: 0, kind: input, shape index: {}]   ;;  %s4638_s1 = inlined_call_operand.hbm [shape: bf16[640,128], index: 1, kind: input, shape index: {}]   ;;  %s4639_s2 = inlined_call_operand.hbm [shape: bf16[640,128], index: 2, kind: input, shape index: {}]   ;;  %s4640_s3 = inlined_call_operand.hbm [shape: bf16[640,128], index: 3, kind: input, shape index: {}]   ;;  %s4641_s4 = inlined_call_operand.hbm [shape: f32[3,128], index: 4, kind: input, shape index: {}]   ;;  %s4642_s5 = inlined_call_operand.hbm [shape: bf16[128,64], index: 5, kind: input, shape index: {}]   ;;  %s4643_s6 = inlined_call_operand.hbm [shape: f32[1,64], index: 6, kind: input, shape index: {}]   ;;  %s4644_s7 = inlined_call_operand.hbm [shape: bf16[128,32], index: 7, kind: output, shape index: {0}]   ;;  %s4645_s8 = inlined_call_operand.hbm [shape: bf16[128,32], index: 8, kind: output, shape index: {1}]  }
   0x1   :  { %15 = vsyncpa [#allocation8], 0 }
   0x2   :  { %16 = vsyncpa [#allocation11], 0 }
   0x3   :  { %17 = vsyncpa [#allocation14], 0 }
   0x4   :  { %18 = vsyncpa [#allocation6], 0 }
   0x5   :  { %19 = vsyncpa [#allocation18], 0  ;;  %s4137_s27 = smov [#allocation7]   ;;  %s3927_s9 = scalar_lea.hbm %s4638_s1, 5120 }
   0x6   :  { %s37_s28 = sshll.u32 %s4137_s27, 4  ;;  %p3928_p0 = scmp.ne.s32.totalorder %s4638_s1, %s3927_s9  ;;  %s38_s28 = int_to_ptr.vmem [resolvable:$true] %s37_s28 }
   0x7   :  { %p3931_p1 = scmp.lt.u32.totalorder %s3927_s9, %s4638_s1 }
   0x9   :  { %p3933_p2 = pnand %p3931_p1, %p3928_p0 }
   0xb   :  { %3936 = shalt.err (!%p3933_p2)
}
   0xc   :  { %s3937_s14 = scalar_lea.vmem %s38_s28, 5120  ;;  %p3942_p4 = scmp.lt.s32.totalorder %s38_s28, %s38_s28 }
   0xd   :  { %p3938_p3 = scmp.ne.s32.totalorder %s38_s28, %s3937_s14  ;;  %p3943_p5 = scmp.lt.s32.totalorder %s3937_s14, %s3937_s14 }
   0xf   :  { %p3944_p6 = por %p3943_p5, %p3942_p4 }
  0x11   :  { %p3945_p7 = pnand %p3944_p6, %p3938_p3 }
  0x13   :  { %3948 = shalt.err (!%p3945_p7)
}
  0x14   :  { %s4138_s15 = smov 64   ;;  %s4139_s16 = smov 4  }
  0x15   :  { %43 = dma.hbm_to_vmem [thread:$0]  %s4638_s1, 5120, %s38_s28, [#allocation8], %s4138_s15, %s4138_s15, %s4139_s16  }
  0x16   :  { %s4140_s19 = smov [#allocation10]   ;;  %s4141_s21 = smov [#allocation13]  }
  0x17   :  { %s61_s20 = sshll.u32 %s4140_s19, 4  ;;  %s83_s22 = sshll.u32 %s4141_s21, 4  ;;  %s62_s20 = int_to_ptr.vmem [resolvable:$true] %s61_s20  ;;  %s84_s22 = int_to_ptr.vmem [resolvable:$true] %s83_s22 }
  0x18   :  { %s3949_s25 = scalar_lea.hbm %s4640_s3, 5120 }
  0x19   :  { %p3950_p8 = scmp.ne.s32.totalorder %s4640_s3, %s3949_s25  ;;  %p3953_p9 = scmp.lt.u32.totalorder %s3949_s25, %s4640_s3 }
  0x1b   :  { %p3955_p10 = pnand %p3953_p9, %p3950_p8 }
  0x1d   :  { %3958 = shalt.err (!%p3955_p10)
}
  0x1e   :  { %s3959_s1 = scalar_lea.vmem %s62_s20, 5120  ;;  %p3964_p12 = scmp.lt.s32.totalorder %s62_s20, %s62_s20 }
  0x1f   :  { %p3960_p11 = scmp.ne.s32.totalorder %s62_s20, %s3959_s1  ;;  %p3965_p13 = scmp.lt.s32.totalorder %s3959_s1, %s3959_s1 }
  0x21   :  { %p3966_p0 = por %p3965_p13, %p3964_p12 }
  0x23   :  { %p3967_p1 = pnand %p3966_p0, %p3960_p11 }
  0x25   :  { %3970 = shalt.err (!%p3967_p1)
}
  0x26   :  { %67 = dma.hbm_to_vmem [thread:$0]  %s4640_s3, 5120, %s62_s20, [#allocation11], %s4138_s15, %s4138_s15, %s4139_s16  }
  0x27   :  { %s3971_s12 = scalar_lea.hbm %s4642_s5, 1024 }
  0x28   :  { %p3972_p2 = scmp.ne.s32.totalorder %s4642_s5, %s3971_s12  ;;  %p3975_p3 = scmp.lt.u32.totalorder %s3971_s12, %s4642_s5 }
  0x2a   :  { %p3977_p4 = pnand %p3975_p3, %p3972_p2 }
  0x2c   :  { %3980 = shalt.err (!%p3977_p4)
}
  0x2d   :  { %s3981_s19 = scalar_lea.vmem %s84_s22, 1024  ;;  %p3986_p6 = scmp.lt.s32.totalorder %s84_s22, %s84_s22 }
  0x2e   :  { %p3982_p5 = scmp.ne.s32.totalorder %s84_s22, %s3981_s19  ;;  %p3987_p7 = scmp.lt.s32.totalorder %s3981_s19, %s3981_s19 }
  0x30   :  { %p3988_p8 = por %p3987_p7, %p3986_p6 }
  0x32   :  { %p3989_p9 = pnand %p3988_p8, %p3982_p5 }
  0x34   :  { %3992 = shalt.err (!%p3989_p9)
}
  0x35   :  { %89 = dma.hbm_to_vmem [thread:$0]  %s4642_s5, 1024, %s84_s22, [#allocation14], %s4138_s15, %s4138_s15, %s4139_s16  }
  0x36   :  { %s4142_s21 = smov [#allocation4]   ;;  %s3993_s26 = scalar_lea.hbm %s4637_s0, 2048 }
  0x37   :  { %s25_s23 = sshll.u32 %s4142_s21, 4  ;;  %p3994_p10 = scmp.ne.s32.totalorder %s4637_s0, %s3993_s26  ;;  %s26_s23 = int_to_ptr.vmem [resolvable:$true] %s25_s23 }
  0x38   :  { %p3997_p11 = scmp.lt.u32.totalorder %s3993_s26, %s4637_s0 }
  0x3a   :  { %p3999_p12 = pnand %p3997_p11, %p3994_p10 }
  0x3c   :  { %4002 = shalt.err (!%p3999_p12)
}
  0x3d   :  { %s4003_s28 = scalar_lea.vmem %s26_s23, 2048  ;;  %p4008_p0 = scmp.lt.s32.totalorder %s26_s23, %s26_s23 }
  0x3e   :  { %p4004_p13 = scmp.ne.s32.totalorder %s26_s23, %s4003_s28  ;;  %p4009_p1 = scmp.lt.s32.totalorder %s4003_s28, %s4003_s28 }
  0x40   :  { %p4010_p2 = por %p4009_p1, %p4008_p0 }
  0x42   :  { %p4011_p3 = pnand %p4010_p2, %p4004_p13 }
  0x44   :  { %4014 = shalt.err (!%p4011_p3)
}
  0x45   :  { %s4143_s5 = smov 128   ;;  %s4144_s22 = smov 8  }
  0x46   :  { %31 = dma.hbm_to_vmem [thread:$0]  %s4637_s0, 2048, %s26_s23, [#allocation5], %s4143_s5, %s4143_s5, %s4144_s22  }
  0x47   :  { %s4145_s11 = smov [#allocation9]   ;;  %s4146_s13 = smov [#allocation12]  }
  0x48   :  { %s49_s12 = sshll.u32 %s4145_s11, 4  ;;  %s74_s14 = sshll.u32 %s4146_s13, 4  ;;  %s50_s12 = int_to_ptr.vmem [resolvable:$true] %s49_s12  ;;  %s75_s14 = int_to_ptr.vmem [resolvable:$true] %s74_s14 }
  0x49   :  { %s4015_s19 = scalar_lea.hbm %s4639_s2, 5120 }
  0x4a   :  { %p4016_p4 = scmp.ne.s32.totalorder %s4639_s2, %s4015_s19  ;;  %p4019_p5 = scmp.lt.u32.totalorder %s4015_s19, %s4639_s2 }
  0x4c   :  { %p4021_p6 = pnand %p4019_p5, %p4016_p4 }
  0x4e   :  { %4024 = shalt.err (!%p4021_p6)
}
  0x4f   :  { %s4025_s0 = scalar_lea.vmem %s50_s12, 5120  ;;  %p4030_p8 = scmp.lt.s32.totalorder %s50_s12, %s50_s12 }
  0x50   :  { %p4026_p7 = scmp.ne.s32.totalorder %s50_s12, %s4025_s0  ;;  %p4031_p9 = scmp.lt.s32.totalorder %s4025_s0, %s4025_s0 }
  0x52   :  { %p4032_p10 = por %p4031_p9, %p4030_p8 }
  0x54   :  { %p4033_p11 = pnand %p4032_p10, %p4026_p7 }
  0x56   :  { %4036 = shalt.err (!%p4033_p11)
}
  0x57   :  { %55 = dma.hbm_to_vmem [thread:$0]  %s4639_s2, 5120, %s50_s12, [#allocation8], %s4138_s15, %s4138_s15, %s4139_s16  }
  0x58   :  { %s4037_s29 = scalar_lea.hbm %s4641_s4, 64 }
  0x59   :  { %p4038_p12 = scmp.ne.s32.totalorder %s4641_s4, %s4037_s29  ;;  %p4041_p13 = scmp.lt.u32.totalorder %s4037_s29, %s4641_s4 }
  0x5b   :  { %p4043_p0 = pnand %p4041_p13, %p4038_p12 }
  0x5d   :  { %4046 = shalt.err (!%p4043_p0)
}
  0x5e   :  { %s4047_s22 = scalar_lea.vmem %s75_s14, 64  ;;  %p4052_p2 = scmp.lt.s32.totalorder %s75_s14, %s75_s14 }
  0x5f   :  { %p4048_p1 = scmp.ne.s32.totalorder %s75_s14, %s4047_s22  ;;  %p4053_p3 = scmp.lt.s32.totalorder %s4047_s22, %s4047_s22 }
  0x61   :  { %p4054_p4 = por %p4053_p3, %p4052_p2 }
  0x63   :  { %p4055_p5 = pnand %p4054_p4, %p4048_p1 }
  0x65   :  { %4058 = shalt.err (!%p4055_p5)
}
  0x66   :  { %77 = dma.hbm_to_vmem [thread:$0]  %s4641_s4, 64, %s75_s14, [#allocation11]  }
  0x67   :  { %s4147_s10 = smov [#allocation15]   ;;  %s4059_s17 = scalar_lea.hbm %s4643_s6, 16 }
  0x68   :  { %s96_s11 = sshll.u32 %s4147_s10, 4  ;;  %p4060_p6 = scmp.ne.s32.totalorder %s4643_s6, %s4059_s17  ;;  %s97_s11 = int_to_ptr.vmem [resolvable:$true] %s96_s11 }
  0x69   :  { %p4063_p7 = scmp.lt.u32.totalorder %s4059_s17, %s4643_s6 }
  0x6b   :  { %p4065_p8 = pnand %p4063_p7, %p4060_p6 }
  0x6d   :  { %4068 = shalt.err (!%p4065_p8)
}
  0x6e   :  { %s4069_s21 = scalar_lea.vmem %s97_s11, 16  ;;  %s4073_s4 = scalar_lea.vmem %s97_s11, 32 }
  0x6f   :  { %p4070_p9 = scmp.ne.s32.totalorder %s97_s11, %s4069_s21  ;;  %p4074_p10 = scmp.lt.s32.totalorder %s97_s11, %s97_s11 }
  0x70   :  { %p4075_p11 = scmp.lt.s32.totalorder %s4073_s4, %s4069_s21 }
  0x72   :  { %p4076_p12 = por %p4075_p11, %p4074_p10 }
  0x74   :  { %p4077_p13 = pnand %p4076_p12, %p4070_p9 }
  0x76   :  { %4080 = shalt.err (!%p4077_p13)
}
  0x77   :  { %99 = dma.hbm_to_vmem [thread:$0]  %s4643_s6, 16, %s97_s11, [#allocation14]  }
  0x78   :  { %4125 = dma.done.wait [#allocation5], 2048  }
  0x79   :  { %4126 = vsyncadd [#allocation5], 4294965248 }
  0x7a   :  { %4127 = dma.done.wait [#allocation8], 10240  }
  0x7b   :  { %4128 = vsyncadd [#allocation8], 4294957056 }
  0x7c   :  { %4129 = dma.done.wait [#allocation11], 5184  }
  0x7d   :  { %4130 = vsyncadd [#allocation11], 4294962112 }
  0x7e   :  { %4131 = dma.done.wait [#allocation14], 1040  }
  0x7f   :  { %4132 = vsyncadd [#allocation14], 4294966256  ;;  %v3799_v0 = vld [vmem:[#allocation7 + $0x40] sm:$0xff]   ;;  %v3803_v4 = vld [vmem:[#allocation7 + $0x48] sm:$0xff]   ;;  %v4148_v33 = vmov 0.0   ;;  %v4149_v41 = vmov 0.0|0.0  }
  0x80   :  { %v3800_v1 = vld [vmem:[#allocation7] sm:$0xff]   ;;  %3207 = vmatprep.subr.bf16.mxu0 %v3799_v0  ;;  %v3804_v5 = vld [vmem:[#allocation7 + $0x8] sm:$0xff]   ;;  %v3807_v8 = vld [vmem:[#allocation7 + $0x50] sm:$0xff]   ;;  %vm2926_vm0 = vcmask 257024   ;;  %s4150_s6 = smov 96   ;;  %s4151_s0 = smov [#allocation16]  }
  0x81   :  { %v3801_v2 = vld [vmem:[#allocation7 + $0xc0] sm:$0xff]   ;;  %3208 = vmatpush3.bf16.msra.mxu0 %v3800_v1  ;;  %v3805_v6 = vld [vmem:[#allocation7 + $0xc8] sm:$0xff]   ;;  %v3808_v9 = vld [vmem:[#allocation7 + $0x10] sm:$0xff]   ;;  %s3012_s23 = sshll.u32 %s4151_s0, 4  ;;  %s3013_s23 = int_to_ptr.vmem [resolvable:$true] %s3012_s23 }
  0x82   :  { %v3802_v3 = vld [vmem:[#allocation7 + $0x80] sm:$0xff]   ;;  %3271 = vmatprep.subr.bf16.mxu1 %v3801_v2  ;;  %3209 = vmatprep.subr.bf16.mxu0 %v3803_v4  ;;  %v3806_v7 = vld [vmem:[#allocation7 + $0x88] sm:$0xff]   ;;  %v3809_v10 = vld [vmem:[#allocation7 + $0xd0] sm:$0xff]   ;;  %s4081_s25 = scalar_lea.vmem %s3013_s23, 1024  ;;  %p4086_p1 = scmp.lt.s32.totalorder %s3013_s23, %s3013_s23 }
  0x83   :  { %3272 = vmatpush3.bf16.msra.mxu1 %v3802_v3  ;;  %v3810_v11 = vld [vmem:[#allocation7 + $0x90] sm:$0xff]   ;;  %v3811_v12 = vld [vmem:[#allocation7 + $0x58] sm:$0xff]   ;;  %v3815_v16 = vld [vmem:[#allocation7 + $0x60] sm:$0xff]   ;;  %p4082_p0 = scmp.ne.s32.totalorder %s3013_s23, %s4081_s25  ;;  %p4087_p2 = scmp.lt.s32.totalorder %s4081_s25, %s4081_s25 }
  0x84   :  { %3273 = vmatprep.subr.bf16.mxu1 %v3805_v6  ;;  %v3812_v13 = vld [vmem:[#allocation7 + $0x18] sm:$0xff]   ;;  %v3816_v17 = vld [vmem:[#allocation7 + $0x20] sm:$0xff]   ;;  %v3819_v20 = vld [vmem:[#allocation7 + $0x68] sm:$0xff]  }
  0x85   :  { %3210 = vmatpush3.bf16.msra.mxu0 %v3804_v5  ;;  %v3813_v14 = vld [vmem:[#allocation7 + $0xd8] sm:$0xff]   ;;  %v3817_v18 = vld [vmem:[#allocation7 + $0xe0] sm:$0xff]   ;;  %v3820_v21 = vld [vmem:[#allocation7 + $0x28] sm:$0xff]   ;;  %p4088_p3 = por %p4087_p2, %p4086_p1 }
  0x86   :  { %3211 = vmatprep.subr.bf16.mxu0 %v3807_v8  ;;  %v3814_v15 = vld [vmem:[#allocation7 + $0x98] sm:$0xff]   ;;  %v3818_v19 = vld [vmem:[#allocation7 + $0xa0] sm:$0xff]   ;;  %v3821_v22 = vld [vmem:[#allocation7 + $0xe8] sm:$0xff]  }
  0x87   :  { %3274 = vmatpush3.bf16.msra.mxu1 %v3806_v7  ;;  %v3822_v23 = vld [vmem:[#allocation7 + $0xa8] sm:$0xff]   ;;  %v3823_v24 = vld [vmem:[#allocation7 + $0x70] sm:$0xff]   ;;  %v3827_v28 = vld [vmem:[#allocation7 + $0x78] sm:$0xff]   ;;  %p4089_p4 = pnand %p4088_p3, %p4082_p0 }
  0x88   :  { %3275 = vmatprep.subr.bf16.mxu1 %v3809_v10  ;;  %v3824_v25 = vld [vmem:[#allocation7 + $0x30] sm:$0xff]   ;;  %v3828_v29 = vld [vmem:[#allocation7 + $0x38] sm:$0xff]   ;;  %v126_v31 = vld [vmem:[#allocation4] sm:$0xff] }
  0x89   :  { %3212 = vmatpush3.bf16.msra.mxu0 %v3808_v9  ;;  %v3825_v26 = vld [vmem:[#allocation7 + $0xf0] sm:$0xff]   ;;  %v3829_v30 = vld [vmem:[#allocation7 + $0xf8] sm:$0xff]   ;;  %v127_v32 = vld [vmem:[#allocation4 + $0x8] sm:$0xff]  ;;  %v206_v34 = vpack.c.bf16 %v126_v31, %v4148_v33 }
  0x8a   :  { %3213 = vmatprep.subr.bf16.mxu0 %v3811_v12  ;;  %v3826_v27 = vld [vmem:[#allocation7 + $0xb0] sm:$0xff]   ;;  %v3830_v35 = vld [vmem:[#allocation7 + $0xb8] sm:$0xff]   ;;  %v175_v36 = vpack.c.bf16 %v127_v32, %v126_v31  ;;  %v3831_v37 = vld [vmem:[#allocation7 + $0x100] sm:$0xff]  }
  0x8b   :  { %3276 = vmatpush3.bf16.msra.mxu1 %v3810_v11  ;;  %v128_v38 = vld [vmem:[#allocation4 + $0x10] sm:$0xff]  ;;  %715 = vmatprep.mubr.bf16.mxu0 %v206_v34  ;;  %v129_v39 = vld [vmem:[#allocation4 + $0x18] sm:$0xff]  ;;  %v3832_v42 = vld [vmem:[#allocation7 + $0x108] sm:$0xff]  }
  0x8c   :  { %3277 = vmatprep.subr.bf16.mxu1 %v3813_v14  ;;  %v207_v40 = vpack.c.bf16 %v128_v38, %v127_v32  ;;  %v130_v43 = vld [vmem:[#allocation4 + $0x20] sm:$0xff]  ;;  %v3833_v45 = vld [vmem:[#allocation7 + $0x110] sm:$0xff]   ;;  %v131_v46 = vld [vmem:[#allocation4 + $0x28] sm:$0xff]  ;;  %v4296_v48 = vpack.c.bf16 %v129_v39, %v128_v38 }
  0x8d   :  { %3214 = vmatpush3.bf16.msra.mxu0 %v3812_v13  ;;  %v208_v44 = vpack.c.bf16 %v130_v43, %v129_v39  ;;  %v132_v47 = vld [vmem:[#allocation4 + $0x30] sm:$0xff]  ;;  %v3834_v49 = vld [vmem:[#allocation7 + $0x118] sm:$0xff]   ;;  %v134_v52 = vld [vmem:[#allocation4 + $0x40] sm:$0xff]  ;;  %v177_v55 = vpack.c.bf16 %v131_v46, %v130_v43 }
  0x8e   :  { %3215 = vmatprep.subr.bf16.mxu0 %v3815_v16  ;;  %812 = vmatprep.mubr.bf16.mxu1 %v207_v40  ;;  %v209_v50 = vpack.c.bf16 %v132_v47, %v131_v46  ;;  %v133_v51 = vld [vmem:[#allocation4 + $0x38] sm:$0xff]  ;;  %v3835_v53 = vld [vmem:[#allocation7 + $0x120] sm:$0xff]   ;;  %v3836_v54 = vld [vmem:[#allocation7 + $0x128] sm:$0xff]  }
  0x8f   :  { %3278 = vmatpush3.bf16.msra.mxu1 %v3814_v15  ;;  %v210_v56 = vpack.c.bf16 %v134_v52, %v133_v51  ;;  %v3837_v57 = vld [vmem:[#allocation7 + $0x130] sm:$0xff]   ;;  %v135_v58 = vld [vmem:[#allocation4 + $0x48] sm:$0xff]  ;;  %v3838_v60 = vld [vmem:[#allocation7 + $0x138] sm:$0xff]   ;;  %v178_v61 = vpack.c.bf16 %v133_v51, %v132_v47 }
  0x90   :  { %3279 = vmatprep.subr.bf16.mxu1 %v3817_v18  ;;  %v136_v59 = vld [vmem:[#allocation4 + $0x50] sm:$0xff]  ;;  %v137_v63 = vld [vmem:[#allocation4 + $0x58] sm:$0xff]  ;;  %v138_v0 = vld [vmem:[#allocation4 + $0x60] sm:$0xff]  ;;  %v179_v1 = vpack.c.bf16 %v135_v58, %v134_v52 }
  0x91   :  { %3216 = vmatpush3.bf16.msra.mxu0 %v3816_v17  ;;  %v211_v62 = vpack.c.bf16 %v136_v59, %v135_v58  ;;  %v212_v2 = vpack.c.bf16 %v138_v0, %v137_v63  ;;  %v139_v3 = vld [vmem:[#allocation4 + $0x68] sm:$0xff]  ;;  %v140_v4 = vld [vmem:[#allocation4 + $0x70] sm:$0xff]  ;;  %v180_v5 = vpack.c.bf16 %v137_v63, %v136_v59  ;;  %v141_v7 = vld [vmem:[#allocation4 + $0x78] sm:$0xff] }
  0x92   :  { %3217 = vmatprep.subr.bf16.mxu0 %v3819_v20  ;;  %v213_v6 = vpack.c.bf16 %v140_v4, %v139_v3  ;;  %v181_v8 = vpack.c.bf16 %v139_v3, %v138_v0  ;;  %v277_v9 = vpack.c.bf16 %v4148_v33, %v141_v7  ;;  %v245_v10 = vpack.c.bf16 %v141_v7, %v140_v4  ;;  %v3839_v11 = vld [vmem:[#allocation9 + $0x40] sm:$0xff]   ;;  %v3841_v13 = vld [vmem:[#allocation9 + $0x48] sm:$0xff]   ;;  %v3843_v15 = vld [vmem:[#allocation9 + $0x50] sm:$0xff]  }
  0x93   :  { %3280 = vmatpush3.bf16.msra.mxu1 %v3818_v19  ;;  %v3840_v12 = vld [vmem:[#allocation9] sm:$0xff]   ;;  %v3842_v14 = vld [vmem:[#allocation9 + $0x8] sm:$0xff]   ;;  %v3844_v16 = vld [vmem:[#allocation9 + $0x10] sm:$0xff]  }
  0x94   :  { %3281 = vmatprep.subr.bf16.mxu1 %v3821_v22  ;;  %v3845_v17 = vld [vmem:[#allocation9 + $0x58] sm:$0xff]   ;;  %v3849_v19 = vld [vmem:[#allocation9 + $0xc0] sm:$0xff]   ;;  %v3859_v34 = vld [vmem:[#allocation9 + $0x70] sm:$0xff]  }
  0x95   :  { %3218 = vmatpush3.bf16.msra.mxu0 %v3820_v21  ;;  %v3846_v18 = vld [vmem:[#allocation9 + $0x18] sm:$0xff]   ;;  %v3850_v20 = vld [vmem:[#allocation9 + $0x80] sm:$0xff]   ;;  %v3867_v38 = vld [vmem:[#allocation9 + $0xf0] sm:$0xff]  }
  0x96   :  { %3219 = vmatprep.subr.bf16.mxu0 %v3823_v24  ;;  %v3847_v21 = vld [vmem:[#allocation9 + $0x60] sm:$0xff]   ;;  %v3852_v24 = vld [vmem:[#allocation9 + $0x88] sm:$0xff]   ;;  %v3868_v39 = vld [vmem:[#allocation9 + $0xb0] sm:$0xff]  }
  0x97   :  { %3282 = vmatpush3.bf16.msra.mxu1 %v3822_v23  ;;  %v3848_v22 = vld [vmem:[#allocation9 + $0x20] sm:$0xff]   ;;  %v3851_v23 = vld [vmem:[#allocation9 + $0xc8] sm:$0xff]   ;;  %v3869_v43 = vld [vmem:[#allocation9 + $0xf8] sm:$0xff]  }
  0x98   :  { %3283 = vmatprep.subr.bf16.mxu1 %v3825_v26  ;;  %v3856_v26 = vld [vmem:[#allocation9 + $0x90] sm:$0xff]   ;;  %v3861_v31 = vld [vmem:[#allocation9 + $0xe0] sm:$0xff]  }
  0x99   :  { %3220 = vmatpush3.bf16.msra.mxu0 %v3824_v25  ;;  %v3855_v25 = vld [vmem:[#allocation9 + $0xd0] sm:$0xff]   ;;  %v3862_v32 = vld [vmem:[#allocation9 + $0xa0] sm:$0xff]  }
  0x9a   :  { %3221 = vmatprep.subr.bf16.mxu0 %v3827_v28  ;;  %v3854_v28 = vld [vmem:[#allocation9 + $0x28] sm:$0xff]   ;;  %v4306_v47 = vld [vmem:[#allocation12] ss:$0 sm:$0xff] }
  0x9b   :  { %3284 = vmatpush3.bf16.msra.mxu1 %v3826_v27  ;;  %v3853_v27 = vld [vmem:[#allocation9 + $0x68] sm:$0xff]  }
  0x9c   :  { %3285 = vmatprep.subr.bf16.mxu1 %v3829_v30  ;;  %v3858_v30 = vld [vmem:[#allocation9 + $0x98] sm:$0xff]  }
  0x9d   :  { %3222 = vmatpush3.bf16.msra.mxu0 %v3828_v29  ;;  %v3857_v29 = vld [vmem:[#allocation9 + $0xd8] sm:$0xff]  }
  0x9e   :  { %3655 = vmatprep.subr.bf16.mxu0 %v3831_v37 }
  0x9f   :  { %3286 = vmatpush3.bf16.msra.mxu1 %v3830_v35  ;;  %v3860_v35 = vld [vmem:[#allocation9 + $0x30] sm:$0xff]  }
  0xa0   :  { %716 = vmatmul.mubr.bf16.vlgmr.msra.gmra.mrb[0].mxu0 %v4149_v41  ;;  %3351 = vmatprep.subr.bf16.mxu1 %v3839_v11 }
  0xa1   :  { %3656 = vmatpush3.bf16.msra.mxu0 %v3831_v37  ;;  %723 = vmatprep.mubr.bf16.mxu0 %v207_v40  ;;  %v3864_v37 = vld [vmem:[#allocation9 + $0xa8] sm:$0xff]   ;;  %v3865_v40 = vld [vmem:[#allocation9 + $0x78] sm:$0xff]  }
  0xa2   :  { %813 = vmatmul.mubr.bf16.vlgmr.msra.gmra.mrb[0].mxu1 %v175_v36  ;;  %3657 = vmatprep.subr.bf16.mxu0 %v3832_v42 }
  0xa3   :  { %820 = vmatprep.mubr.bf16.mxu1 %v208_v44  ;;  %3352 = vmatpush3.bf16.msra.mxu1 %v3840_v12 }
  0xa4   :  { %3353 = vmatprep.subr.bf16.mxu1 %v3841_v13 }
  0xa5   :  { %3658 = vmatpush3.bf16.msra.mxu0 %v3832_v42  ;;  %v3866_v42 = vld [vmem:[#allocation9 + $0x38] sm:$0xff]  }
  0xa6   :  { %3659 = vmatprep.subr.bf16.mxu0 %v3833_v45 }
  0xa7   :  { %3354 = vmatpush3.bf16.msra.mxu1 %v3842_v14 }
  0xa8   :  { %724 = vmatmul.mubr.bf16.gmra.mrb[4].mxu0 %v175_v36  ;;  %3355 = vmatprep.subr.bf16.mxu1 %v3843_v15  ;;  %v3863_v36 = vld [vmem:[#allocation9 + $0xe8] sm:$0xff]  }
  0xa9   :  { %731 = vmatprep.mubr.bf16.mxu0 %v208_v44  ;;  %3660 = vmatpush3.bf16.msra.mxu0 %v3833_v45  ;;  %v3870_v44 = vld [vmem:[#allocation9 + $0xb8] sm:$0xff]   ;;  %v4303_v45 = vld [vmem:[#allocation9 + $0x100] sm:$0xff]  }
  0xaa   :  { %821 = vmatmul.mubr.bf16.gmra.mrb[4].mxu1 %v4296_v48  ;;  %3661 = vmatprep.subr.bf16.mxu0 %v3834_v49 }
  0xab   :  { %828 = vmatprep.mubr.bf16.mxu1 %v209_v50  ;;  %3356 = vmatpush3.bf16.msra.mxu1 %v3844_v16 }
  0xac   :  { %3357 = vmatprep.subr.bf16.mxu1 %v3845_v17 }
  0xad   :  { %3662 = vmatpush3.bf16.msra.mxu0 %v3834_v49 }
  0xae   :  { %3663 = vmatprep.subr.bf16.mxu0 %v3835_v53 }
  0xaf   :  { %3358 = vmatpush3.bf16.msra.mxu1 %v3846_v18 }
  0xb0   :  { %732 = vmatmul.mubr.bf16.gmra.mrb[8].mxu0 %v4296_v48  ;;  %3359 = vmatprep.subr.bf16.mxu1 %v3847_v21 }
  0xb1   :  { %739 = vmatprep.mubr.bf16.mxu0 %v209_v50  ;;  %3664 = vmatpush3.bf16.msra.mxu0 %v3835_v53 }
  0xb2   :  { %829 = vmatmul.mubr.bf16.gmra.mrb[8].mxu1 %v177_v55  ;;  %3665 = vmatprep.subr.bf16.mxu0 %v3836_v54 }
  0xb3   :  { %836 = vmatprep.mubr.bf16.mxu1 %v210_v56  ;;  %3360 = vmatpush3.bf16.msra.mxu1 %v3848_v22 }
  0xb4   :  { %3361 = vmatprep.subr.bf16.mxu1 %v3853_v27 }
  0xb5   :  { %3666 = vmatpush3.bf16.msra.mxu0 %v3836_v54 }
  0xb6   :  { %3667 = vmatprep.subr.bf16.mxu0 %v3837_v57 }
  0xb7   :  { %3362 = vmatpush3.bf16.msra.mxu1 %v3854_v28 }
  0xb8   :  { %740 = vmatmul.mubr.bf16.gmra.mrb[12].mxu0 %v177_v55  ;;  %3363 = vmatprep.subr.bf16.mxu1 %v3859_v34 }
  0xb9   :  { %747 = vmatprep.mubr.bf16.mxu0 %v210_v56  ;;  %3668 = vmatpush3.bf16.msra.mxu0 %v3837_v57 }
  0xba   :  { %837 = vmatmul.mubr.bf16.gmra.mrb[12].mxu1 %v178_v61  ;;  %3669 = vmatprep.subr.bf16.mxu0 %v3838_v60 }
  0xbb   :  { %844 = vmatprep.mubr.bf16.mxu1 %v211_v62  ;;  %3364 = vmatpush3.bf16.msra.mxu1 %v3860_v35 }
  0xbc   :  { %3365 = vmatprep.subr.bf16.mxu1 %v3865_v40 }
  0xbd   :  { %3670 = vmatpush3.bf16.msra.mxu0 %v3838_v60 }
  0xbe   :  { %3415 = vmatprep.subr.bf16.mxu0 %v3849_v19 }
  0xbf   :  { %3366 = vmatpush3.bf16.msra.mxu1 %v3866_v42 }
  0xc0   :  { %748 = vmatmul.mubr.bf16.gmra.mrb[16].mxu0 %v178_v61  ;;  %3687 = vmatprep.subr.bf16.mxu1 %v4303_v45 }
  0xc1   :  { %755 = vmatprep.mubr.bf16.mxu0 %v211_v62 }
  0xc2   :  { %845 = vmatmul.mubr.bf16.gmra.mrb[16].mxu1 %v179_v1 }
  0xc3   :  { %852 = vmatprep.mubr.bf16.mxu1 %v212_v2 }
  0xc8   :  { %756 = vmatmul.mubr.bf16.gmra.mrb[20].mxu0 %v179_v1 }
  0xc9   :  { %763 = vmatprep.mubr.bf16.mxu0 %v212_v2 }
  0xca   :  { %853 = vmatmul.mubr.bf16.gmra.mrb[20].mxu1 %v180_v5 }
  0xcb   :  { %860 = vmatprep.mubr.bf16.mxu1 %v213_v6 }
  0xd0   :  { %764 = vmatmul.mubr.bf16.gmra.mrb[24].mxu0 %v180_v5 }
  0xd1   :  { %771 = vmatprep.mubr.bf16.mxu0 %v213_v6 }
  0xd2   :  { %861 = vmatmul.mubr.bf16.gmra.mrb[24].mxu1 %v181_v8 }
  0xd3   :  { %868 = vmatprep.mubr.bf16.mxu1 %v277_v9 }
  0xd8   :  { %772 = vmatmul.mubr.bf16.gmra.mrb[28].mxu0 %v181_v8 }
  0xd9   :  { %3671 = vmatprep.mubr.bf16.mxu0 %v4296_v48 }
  0xda   :  { %869 = vmatmul.mubr.bf16.gmra.mrb[28].mxu1 %v245_v10 }
  0xe0   :  { %3672 = vmatmul.mubr.bf16.vlgmr.msra.gmra.mrb[32].mxu0 %v177_v55 }
  0xe1   :  { %3675 = vmatprep.mubr.bf16.mxu0 %v178_v61  ;;  %3416 = vmatpush3.bf16.msra.mxu0 %v3850_v20 }
  0xe2   :  { %3417 = vmatprep.subr.bf16.mxu0 %v3851_v23 }
  0xe5   :  { %3418 = vmatpush3.bf16.msra.mxu0 %v3852_v24 }
  0xe6   :  { %3419 = vmatprep.subr.bf16.mxu0 %v3855_v25 }
  0xe8   :  { %3676 = vmatmul.mubr.bf16.gmra.mrb[36].mxu0 %v179_v1 }
  0xe9   :  { %3679 = vmatprep.mubr.bf16.mxu0 %v180_v5  ;;  %3420 = vmatpush3.bf16.msra.mxu0 %v3856_v26 }
  0xea   :  { %3421 = vmatprep.subr.bf16.mxu0 %v3857_v29 }
  0xed   :  { %3422 = vmatpush3.bf16.msra.mxu0 %v3858_v30 }
  0xee   :  { %3423 = vmatprep.subr.bf16.mxu0 %v3861_v31 }
  0xf0   :  { %3680 = vmatmul.mubr.bf16.gmra.mrb[40].mxu0 %v181_v8 }
  0xf1   :  { %3683 = vmatprep.mubr.bf16.mxu0 %v245_v10  ;;  %3424 = vmatpush3.bf16.msra.mxu0 %v3862_v32 }
  0xf2   :  { %3425 = vmatprep.subr.bf16.mxu0 %v3863_v36 }
  0xf5   :  { %3426 = vmatpush3.bf16.msra.mxu0 %v3864_v37 }
  0xf6   :  { %3427 = vmatprep.subr.bf16.mxu0 %v3867_v38 }
  0xf8   :  { %3684 = vmatmul.mubr.bf16.gmra.mrb[44].mxu0 %v4149_v41 }
  0xf9   :  { %3428 = vmatpush3.bf16.msra.mxu0 %v3868_v39 }
  0xfa   :  { %3429 = vmatprep.subr.bf16.mxu0 %v3869_v43 }
  0xfd   :  { %3430 = vmatpush3.bf16.msra.mxu0 %v3870_v44 }
 0x173   :  { %v3223_v46 = vpop.f32.mrb[0].mxu0 }
 0x174   :  { %v3224_v48 = vpop.f32.mrb[1].mxu0 }
 0x175   :  { %v3225_v49 = vadd.f32 %v3224_v48, %v3223_v46  ;;  %v3226_v50 = vpop.f32.mrb[2].mxu0  ;;  %v3287_v51 = vpop.f32.mrb[0].mxu1 }
 0x176   :  { %v3227_v52 = vpop.f32.mrb[3].mxu0  ;;  %v3288_v53 = vpop.f32.mrb[1].mxu1 }
 0x177   :  { %v718_v54 = vadd.f32 %v3225_v49, %v4306_v47  ;;  %v3228_v55 = vadd.f32 %v3227_v52, %v3226_v50  ;;  %v3289_v56 = vadd.f32 %v3288_v53, %v3287_v51  ;;  %v3290_v57 = vpop.f32.mrb[2].mxu1 }
 0x178   :  { %v3291_v58 = vpop.f32.mrb[3].mxu1 }
 0x179   :  { %v721_v59 = vadd.f32 %v3228_v55, %v4306_v47  ;;  %v3292_v60 = vadd.f32 %v3291_v58, %v3290_v57  ;;  %v4310_v61 = vadd.f32 %v3289_v56, %v718_v54 }
 0x17b   :  { %v3229_v62 = vpop.f32.mrb[4].mxu0  ;;  %v4312_v63 = vadd.f32 %v3292_v60, %v721_v59 }
 0x17c   :  { %v3230_v0 = vpop.f32.mrb[5].mxu0 }
 0x17d   :  { %v3231_v1 = vadd.f32 %v3230_v0, %v3229_v62  ;;  %v3232_v2 = vpop.f32.mrb[6].mxu0  ;;  %v3293_v3 = vpop.f32.mrb[4].mxu1 }
 0x17e   :  { %v3233_v4 = vpop.f32.mrb[7].mxu0  ;;  %v3294_v5 = vpop.f32.mrb[5].mxu1 }
 0x17f   :  { %v726_v6 = vadd.f32 %v3231_v1, %v4306_v47  ;;  %v3234_v7 = vadd.f32 %v3233_v4, %v3232_v2  ;;  %v3295_v8 = vadd.f32 %v3294_v5, %v3293_v3  ;;  %v3296_v9 = vpop.f32.mrb[6].mxu1 }
 0x180   :  { %v3297_v10 = vpop.f32.mrb[7].mxu1 }
 0x181   :  { %v729_v11 = vadd.f32 %v3234_v7, %v4306_v47  ;;  %v3298_v12 = vadd.f32 %v3297_v10, %v3296_v9  ;;  %v4316_v13 = vadd.f32 %v3295_v8, %v726_v6 }
 0x183   :  { %v3235_v14 = vpop.f32.mrb[8].mxu0  ;;  %v4318_v15 = vadd.f32 %v3298_v12, %v729_v11 }
 0x184   :  { %v3236_v16 = vpop.f32.mrb[9].mxu0 }
 0x185   :  { %v3237_v17 = vadd.f32 %v3236_v16, %v3235_v14  ;;  %v3238_v18 = vpop.f32.mrb[10].mxu0  ;;  %v3299_v19 = vpop.f32.mrb[8].mxu1 }
 0x186   :  { %v3239_v20 = vpop.f32.mrb[11].mxu0  ;;  %v3300_v21 = vpop.f32.mrb[9].mxu1 }
 0x187   :  { %v734_v22 = vadd.f32 %v3237_v17, %v4306_v47  ;;  %v3240_v23 = vadd.f32 %v3239_v20, %v3238_v18  ;;  %v3301_v24 = vadd.f32 %v3300_v21, %v3299_v19  ;;  %v3302_v25 = vpop.f32.mrb[10].mxu1 }
 0x188   :  { %v3303_v26 = vpop.f32.mrb[11].mxu1 }
 0x189   :  { %v737_v27 = vadd.f32 %v3240_v23, %v4306_v47  ;;  %v3304_v28 = vadd.f32 %v3303_v26, %v3302_v25  ;;  %v4322_v29 = vadd.f32 %v3301_v24, %v734_v22 }
 0x18b   :  { %v3241_v30 = vpop.f32.mrb[12].mxu0  ;;  %v4324_v31 = vadd.f32 %v3304_v28, %v737_v27 }
 0x18c   :  { %v3242_v32 = vpop.f32.mrb[13].mxu0 }
 0x18d   :  { %v3243_v34 = vadd.f32 %v3242_v32, %v3241_v30  ;;  %v3244_v35 = vpop.f32.mrb[14].mxu0  ;;  %v3305_v36 = vpop.f32.mrb[12].mxu1 }
 0x18e   :  { %v3245_v37 = vpop.f32.mrb[15].mxu0  ;;  %v3306_v38 = vpop.f32.mrb[13].mxu1 }
 0x18f   :  { %v742_v39 = vadd.f32 %v3243_v34, %v4306_v47  ;;  %v3246_v40 = vadd.f32 %v3245_v37, %v3244_v35  ;;  %v3307_v42 = vadd.f32 %v3306_v38, %v3305_v36  ;;  %v3308_v43 = vpop.f32.mrb[14].mxu1 }
 0x190   :  { %v3309_v44 = vpop.f32.mrb[15].mxu1 }
 0x191   :  { %v745_v46 = vadd.f32 %v3246_v40, %v4306_v47  ;;  %v3310_v48 = vadd.f32 %v3309_v44, %v3308_v43  ;;  %v4328_v49 = vadd.f32 %v3307_v42, %v742_v39 }
 0x193   :  { %v3247_v50 = vpop.f32.mrb[16].mxu0  ;;  %v4330_v51 = vadd.f32 %v3310_v48, %v745_v46 }
 0x194   :  { %v3248_v52 = vpop.f32.mrb[17].mxu0 }
 0x195   :  { %v3249_v53 = vadd.f32 %v3248_v52, %v3247_v50  ;;  %v3250_v54 = vpop.f32.mrb[18].mxu0  ;;  %v3311_v55 = vpop.f32.mrb[16].mxu1 }
 0x196   :  { %v3251_v56 = vpop.f32.mrb[19].mxu0  ;;  %v3312_v57 = vpop.f32.mrb[17].mxu1 }
 0x197   :  { %v750_v58 = vadd.f32 %v3249_v53, %v4306_v47  ;;  %v3252_v59 = vadd.f32 %v3251_v56, %v3250_v54  ;;  %v3313_v60 = vadd.f32 %v3312_v57, %v3311_v55  ;;  %v3314_v62 = vpop.f32.mrb[18].mxu1 }
 0x198   :  { %v3315_v0 = vpop.f32.mrb[19].mxu1 }
 0x199   :  { %v753_v1 = vadd.f32 %v3252_v59, %v4306_v47  ;;  %v3316_v2 = vadd.f32 %v3315_v0, %v3314_v62  ;;  %v4334_v3 = vadd.f32 %v3313_v60, %v750_v58 }
 0x19b   :  { %v3253_v4 = vpop.f32.mrb[20].mxu0  ;;  %v4336_v5 = vadd.f32 %v3316_v2, %v753_v1 }
 0x19c   :  { %v3254_v6 = vpop.f32.mrb[21].mxu0 }
 0x19d   :  { %v3255_v7 = vadd.f32 %v3254_v6, %v3253_v4  ;;  %v3256_v8 = vpop.f32.mrb[22].mxu0  ;;  %v3317_v9 = vpop.f32.mrb[20].mxu1 }
 0x19e   :  { %v3257_v10 = vpop.f32.mrb[23].mxu0  ;;  %v3318_v11 = vpop.f32.mrb[21].mxu1 }
 0x19f   :  { %v758_v12 = vadd.f32 %v3255_v7, %v4306_v47  ;;  %v3258_v14 = vadd.f32 %v3257_v10, %v3256_v8  ;;  %v3319_v16 = vadd.f32 %v3318_v11, %v3317_v9  ;;  %v3320_v17 = vpop.f32.mrb[22].mxu1 }
 0x1a0   :  { %v3321_v18 = vpop.f32.mrb[23].mxu1 }
 0x1a1   :  { %v761_v19 = vadd.f32 %v3258_v14, %v4306_v47  ;;  %v3322_v20 = vadd.f32 %v3321_v18, %v3320_v17  ;;  %v4340_v21 = vadd.f32 %v3319_v16, %v758_v12 }
 0x1a3   :  { %v3259_v22 = vpop.f32.mrb[24].mxu0  ;;  %v4342_v23 = vadd.f32 %v3322_v20, %v761_v19  ;;  %v3872_v20 = vld [vmem:[#allocation9 + $0x108] sm:$0xff]  }
 0x1a4   :  { %v3260_v24 = vpop.f32.mrb[25].mxu0 }
 0x1a5   :  { %v3261_v25 = vadd.f32 %v3260_v24, %v3259_v22  ;;  %v3262_v26 = vpop.f32.mrb[26].mxu0  ;;  %v3323_v27 = vpop.f32.mrb[24].mxu1 }
 0x1a6   :  { %v3263_v28 = vpop.f32.mrb[27].mxu0  ;;  %v3324_v30 = vpop.f32.mrb[25].mxu1 }
 0x1a7   :  { %v766_v32 = vadd.f32 %v3261_v25, %v4306_v47  ;;  %v3264_v34 = vadd.f32 %v3263_v28, %v3262_v26  ;;  %v3325_v35 = vadd.f32 %v3324_v30, %v3323_v27  ;;  %v3326_v36 = vpop.f32.mrb[26].mxu1  ;;  %v3873_v28 = vld [vmem:[#allocation9 + $0x110] sm:$0xff]  }
 0x1a8   :  { %v3327_v37 = vpop.f32.mrb[27].mxu1 }
 0x1a9   :  { %v769_v38 = vadd.f32 %v3264_v34, %v4306_v47  ;;  %v3328_v39 = vadd.f32 %v3327_v37, %v3326_v36  ;;  %v4346_v40 = vadd.f32 %v3325_v35, %v766_v32 }
 0x1ab   :  { %v3265_v42 = vpop.f32.mrb[28].mxu0  ;;  %v4348_v43 = vadd.f32 %v3328_v39, %v769_v38 }
 0x1ac   :  { %v3266_v44 = vpop.f32.mrb[29].mxu0 }
 0x1ad   :  { %v3267_v46 = vadd.f32 %v3266_v44, %v3265_v42  ;;  %v3268_v48 = vpop.f32.mrb[30].mxu0  ;;  %v3329_v50 = vpop.f32.mrb[28].mxu1 }
 0x1ae   :  { %v3269_v52 = vpop.f32.mrb[31].mxu0  ;;  %v3330_v53 = vpop.f32.mrb[29].mxu1 }
 0x1af   :  { %v774_v54 = vadd.f32 %v3267_v46, %v4306_v47  ;;  %v3270_v55 = vadd.f32 %v3269_v52, %v3268_v48  ;;  %v3331_v56 = vadd.f32 %v3330_v53, %v3329_v50  ;;  %v3332_v57 = vpop.f32.mrb[30].mxu1  ;;  %v3875_v50 = vld [vmem:[#allocation9 + $0x120] sm:$0xff]  }
 0x1b0   :  { %v3333_v58 = vpop.f32.mrb[31].mxu1 }
 0x1b1   :  { %v777_v59 = vadd.f32 %v3270_v55, %v4306_v47  ;;  %v3334_v60 = vadd.f32 %v3333_v58, %v3332_v57  ;;  %v4352_v62 = vadd.f32 %v3331_v56, %v774_v54 }
 0x1b3   :  { %v3673_v0 = vpop.f32.mrb[32].mxu0  ;;  %v4354_v1 = vadd.f32 %v3334_v60, %v777_v59 }
 0x1b4   :  { %v920_v2 = vadd.f32 %v3673_v0, %v4316_v13  ;;  %v911_v4 = vpop.f32.mrb[33].mxu0 }
 0x1b5   :  { %v912_v6 = vadd.f32 %v911_v4, %v4310_v61  ;;  %v3674_v7 = vpop.f32.mrb[34].mxu0 }
 0x1b6   :  { %v923_v8 = vadd.f32 %v3674_v7, %v4318_v15  ;;  %v914_v9 = vpop.f32.mrb[35].mxu0  ;;  %v976_v12 = vmax.f32 %v920_v2, 0.0  ;;  %v3877_v7 = vld [vmem:[#allocation9 + $0x130] sm:$0xff]  }
 0x1b7   :  { %v974_v10 = vmax.f32 %v912_v6, 0.0  ;;  %v915_v11 = vadd.f32 %v914_v9, %v4312_v63 }
 0x1b8   :  { %v977_v47 = vmax.f32 %v923_v8, 0.0 }
 0x1b9   :  { %v1054_v14 = vpack.c.bf16 %v974_v10, %v4148_v33  ;;  %v975_v16 = vmax.f32 %v915_v11, 0.0 }
 0x1ba   :  { %v4361_v17 = vpack.c.bf16 %v977_v47, %v976_v12 }
 0x1bb   :  { %v1023_v18 = vpack.c.bf16 %v975_v16, %v974_v10  ;;  %v1055_v19 = vpack.c.bf16 %v976_v12, %v975_v16  ;;  %v3677_v13 = vpop.f32.mrb[36].mxu0  ;;  %1563 = vmatprep.mubr.bf16.mxu1 %v1054_v14  ;;  %v3880_v14 = vld [vmem:[#allocation10] sm:$0xff]   ;;  %v3881_v16 = vld [vmem:[#allocation10 + $0x48] sm:$0xff]  }
 0x1bc   :  { %v936_v61 = vadd.f32 %v3677_v13, %v4328_v49  ;;  %v927_v22 = vpop.f32.mrb[37].mxu0  ;;  %1564 = vmatmul.mubr.bf16.vlgmr.msra.gmra.mrb[32].mxu1 %v4149_v41  ;;  %v3885_v13 = vld [vmem:[#allocation10 + $0x58] sm:$0xff]  }
 0x1bd   :  { %v928_v15 = vadd.f32 %v927_v22, %v4322_v29  ;;  %v3678_v63 = vpop.f32.mrb[38].mxu0  ;;  %1571 = vmatprep.mubr.bf16.mxu1 %v1055_v19  ;;  %1660 = vmatprep.mubr.bf16.mxu0 %v1055_v19  ;;  %v3884_v19 = vld [vmem:[#allocation10 + $0x10] sm:$0xff]   ;;  %v3890_v22 = vld [vmem:[#allocation10 + $0x80] sm:$0xff]  }
 0x1be   :  { %v939_v24 = vadd.f32 %v3678_v63, %v4330_v51  ;;  %3688 = vmatpush3.bf16.msra.mxu1 %v4303_v45  ;;  %v930_v25 = vpop.f32.mrb[39].mxu0  ;;  %1661 = vmatmul.mubr.bf16.vlgmr.msra.gmra.mrb[48].mxu0 %v1023_v18  ;;  %v980_v49 = vmax.f32 %v936_v61, 0.0  ;;  %v3874_v45 = vld [vmem:[#allocation9 + $0x118] sm:$0xff]   ;;  %v3889_v61 = vld [vmem:[#allocation10 + $0xc0] sm:$0xff]  }
 0x1bf   :  { %v978_v26 = vmax.f32 %v928_v15, 0.0  ;;  %v931_v27 = vadd.f32 %v930_v25, %v4324_v31  ;;  %3689 = vmatprep.subr.bf16.mxu1 %v3872_v20  ;;  %v3887_v15 = vld [vmem:[#allocation10 + $0x60] sm:$0xff]   ;;  %v3892_v25 = vld [vmem:[#allocation10 + $0x88] sm:$0xff]  }
 0x1c0   :  { %v981_v30 = vmax.f32 %v939_v24, 0.0  ;;  %v3888_v63 = vld [vmem:[#allocation10 + $0x20] sm:$0xff]   ;;  %v3891_v24 = vld [vmem:[#allocation10 + $0xc8] sm:$0xff]  }
 0x1c1   :  { %v1056_v32 = vpack.c.bf16 %v978_v26, %v977_v47  ;;  %v979_v34 = vmax.f32 %v931_v27, 0.0  ;;  %v3879_v47 = vld [vmem:[#allocation10 + $0x40] sm:$0xff]   ;;  %v3896_v27 = vld [vmem:[#allocation10 + $0x90] sm:$0xff]  }
 0x1c2   :  { %v4369_v35 = vpack.c.bf16 %v981_v30, %v980_v49  ;;  %3690 = vmatpush3.bf16.msra.mxu1 %v3872_v20  ;;  %3495 = vmatprep.subr.bf16.mxu0 %v3879_v47  ;;  %v3886_v20 = vld [vmem:[#allocation10 + $0x18] sm:$0xff]  }
 0x1c3   :  { %v4371_v29 = vpack.c.bf16 %v979_v34, %v978_v26  ;;  %v1057_v36 = vpack.c.bf16 %v980_v49, %v979_v34  ;;  %v3681_v51 = vpop.f32.mrb[40].mxu0  ;;  %1668 = vmatprep.mubr.bf16.mxu0 %v1056_v32  ;;  %3691 = vmatprep.subr.bf16.mxu1 %v3873_v28  ;;  %v3895_v26 = vld [vmem:[#allocation10 + $0xd0] sm:$0xff]   ;;  %v3894_v49 = vld [vmem:[#allocation10 + $0x28] sm:$0xff]   ;;  %v3901_v34 = vld [vmem:[#allocation10 + $0xe0] sm:$0xff]  }
 0x1c4   :  { %v952_v37 = vadd.f32 %v3681_v51, %v4340_v21  ;;  %v943_v38 = vpop.f32.mrb[41].mxu0  ;;  %1572 = vmatmul.mubr.bf16.gmra.mrb[36].mxu1 %v1023_v18  ;;  %3496 = vmatpush3.bf16.msra.mxu0 %v3880_v14  ;;  %v3882_v18 = vld [vmem:[#allocation10 + $0x8] sm:$0xff]  }
 0x1c5   :  { %v944_v31 = vadd.f32 %v943_v38, %v4334_v3  ;;  %v3682_v39 = vpop.f32.mrb[42].mxu0  ;;  %1579 = vmatprep.mubr.bf16.mxu1 %v1056_v32  ;;  %3497 = vmatprep.subr.bf16.mxu0 %v3881_v16  ;;  %v3898_v32 = vld [vmem:[#allocation10 + $0x98] sm:$0xff]   ;;  %v3903_v51 = vld [vmem:[#allocation10 + $0xe8] sm:$0xff]   ;;  %v3908_v38 = vld [vmem:[#allocation10 + $0xb0] sm:$0xff]  }
 0x1c6   :  { %v955_v42 = vadd.f32 %v3682_v39, %v4342_v23  ;;  %v946_v44 = vpop.f32.mrb[43].mxu0  ;;  %1669 = vmatmul.mubr.bf16.gmra.mrb[52].mxu0 %v4361_v17  ;;  %3692 = vmatpush3.bf16.msra.mxu1 %v3873_v28  ;;  %v984_v52 = vmax.f32 %v952_v37, 0.0  ;;  %v3876_v23 = vld [vmem:[#allocation9 + $0x128] sm:$0xff]   ;;  %v3907_v37 = vld [vmem:[#allocation10 + $0xf0] sm:$0xff]   ;;  %v3906_v39 = vld [vmem:[#allocation10 + $0x38] sm:$0xff]  }
 0x1c7   :  { %v982_v46 = vmax.f32 %v944_v31, 0.0  ;;  %v947_v48 = vadd.f32 %v946_v44, %v4336_v5  ;;  %1676 = vmatprep.mubr.bf16.mxu0 %v1057_v36  ;;  %3693 = vmatprep.subr.bf16.mxu1 %v3874_v45  ;;  %v3893_v28 = vld [vmem:[#allocation10 + $0x68] sm:$0xff]   ;;  %v3905_v31 = vld [vmem:[#allocation10 + $0x78] sm:$0xff]  }
 0x1c8   :  { %v985_v21 = vmax.f32 %v955_v42, 0.0  ;;  %3498 = vmatpush3.bf16.msra.mxu0 %v3882_v18  ;;  %v3909_v42 = vld [vmem:[#allocation10 + $0xf8] sm:$0xff]  }
 0x1c9   :  { %v1058_v53 = vpack.c.bf16 %v982_v46, %v981_v30  ;;  %v983_v54 = vmax.f32 %v947_v48, 0.0  ;;  %v3897_v30 = vld [vmem:[#allocation10 + $0xd8] sm:$0xff]  }
 0x1ca   :  { %v1028_v55 = vpack.c.bf16 %v985_v21, %v984_v52  ;;  %3694 = vmatpush3.bf16.msra.mxu1 %v3874_v45  ;;  %v3904_v45 = vld [vmem:[#allocation10 + $0xa8] sm:$0xff]   ;;  %v3910_v44 = vld [vmem:[#allocation10 + $0xb8] sm:$0xff]  }
 0x1cb   :  { %v1027_v3 = vpack.c.bf16 %v983_v54, %v982_v46  ;;  %v1059_v56 = vpack.c.bf16 %v984_v52, %v983_v54  ;;  %v3685_v57 = vpop.f32.mrb[44].mxu0  ;;  %3695 = vmatprep.subr.bf16.mxu1 %v3875_v50  ;;  %v4392_v46 = vld [vmem:[#allocation10 + $0x100] sm:$0xff]  }
 0x1cc   :  { %v968_v58 = vadd.f32 %v3685_v57, %v4352_v62  ;;  %v959_v59 = vpop.f32.mrb[45].mxu0  ;;  %1580 = vmatmul.mubr.bf16.gmra.mrb[40].mxu1 %v4361_v17 }
 0x1cd   :  { %v960_v5 = vadd.f32 %v959_v59, %v4346_v40  ;;  %v3686_v60 = vpop.f32.mrb[46].mxu0  ;;  %1587 = vmatprep.mubr.bf16.mxu1 %v1057_v36  ;;  %v3900_v36 = vld [vmem:[#allocation10 + $0x30] sm:$0xff]  }
 0x1ce   :  { %v971_v0 = vadd.f32 %v3686_v60, %v4354_v1  ;;  %v962_v2 = vpop.f32.mrb[47].mxu0  ;;  %1677 = vmatmul.mubr.bf16.gmra.mrb[56].mxu0 %v4371_v29  ;;  %3696 = vmatpush3.bf16.msra.mxu1 %v3875_v50  ;;  %v988_v62 = vmax.f32 %v968_v58, 0.0  ;;  %v3878_v1 = vld [vmem:[#allocation9 + $0x138] sm:$0xff]   ;;  %v4395_v50 = vld [vmem:[#allocation12 + $0x1] ss:$0 sm:$0xff] }
 0x1cf   :  { %v986_v4 = vmax.f32 %v960_v5, 0.0  ;;  %v963_v6 = vadd.f32 %v962_v2, %v4348_v43  ;;  %1684 = vmatprep.mubr.bf16.mxu0 %v1058_v53  ;;  %3697 = vmatprep.subr.bf16.mxu1 %v3876_v23 }
 0x1d0   :  { %v989_v8 = vmax.f32 %v971_v0, 0.0 }
 0x1d1   :  { %v1060_v9 = vpack.c.bf16 %v986_v4, %v985_v21  ;;  %v987_v10 = vmax.f32 %v963_v6, 0.0 }
 0x1d2   :  { %v1093_v11 = vpack.c.bf16 %v989_v8, %v988_v62  ;;  %3698 = vmatpush3.bf16.msra.mxu1 %v3876_v23  ;;  %v1125_v43 = vpack.c.bf16 %v4148_v33, %v989_v8 }
 0x1d3   :  { %v1029_v40 = vpack.c.bf16 %v987_v10, %v986_v4  ;;  %v1061_v12 = vpack.c.bf16 %v988_v62, %v987_v10  ;;  %3699 = vmatprep.subr.bf16.mxu1 %v3877_v7 }
 0x1d4   :  { %1588 = vmatmul.mubr.bf16.gmra.mrb[44].mxu1 %v4371_v29 }
 0x1d5   :  { %1595 = vmatprep.mubr.bf16.mxu1 %v1058_v53 }
 0x1d6   :  { %1685 = vmatmul.mubr.bf16.gmra.mrb[60].mxu0 %v4369_v35  ;;  %3700 = vmatpush3.bf16.msra.mxu1 %v3877_v7 }
 0x1d7   :  { %1692 = vmatprep.mubr.bf16.mxu0 %v1059_v56  ;;  %3701 = vmatprep.subr.bf16.mxu1 %v3878_v1 }
 0x1da   :  { %3702 = vmatpush3.bf16.msra.mxu1 %v3878_v1 }
 0x1db   :  { %3559 = vmatprep.subr.bf16.mxu1 %v3889_v61 }
 0x1dc   :  { %1596 = vmatmul.mubr.bf16.gmra.mrb[48].mxu1 %v4369_v35 }
 0x1dd   :  { %1603 = vmatprep.mubr.bf16.mxu1 %v1059_v56 }
 0x1de   :  { %1693 = vmatmul.mubr.bf16.gmra.mrb[64].mxu0 %v1027_v3 }
 0x1df   :  { %1700 = vmatprep.mubr.bf16.mxu0 %v1060_v9 }
 0x1e4   :  { %1604 = vmatmul.mubr.bf16.gmra.mrb[52].mxu1 %v1027_v3 }
 0x1e5   :  { %1611 = vmatprep.mubr.bf16.mxu1 %v1060_v9 }
 0x1e6   :  { %1701 = vmatmul.mubr.bf16.gmra.mrb[68].mxu0 %v1028_v55 }
 0x1e7   :  { %1708 = vmatprep.mubr.bf16.mxu0 %v1061_v12 }
 0x1ec   :  { %1612 = vmatmul.mubr.bf16.gmra.mrb[56].mxu1 %v1028_v55 }
 0x1ed   :  { %1619 = vmatprep.mubr.bf16.mxu1 %v1061_v12 }
 0x1ee   :  { %1709 = vmatmul.mubr.bf16.gmra.mrb[72].mxu0 %v1029_v40 }
 0x1ef   :  { %1716 = vmatprep.mubr.bf16.mxu0 %v1125_v43 }
 0x1f4   :  { %1620 = vmatmul.mubr.bf16.gmra.mrb[60].mxu1 %v1029_v40 }
 0x1f5   :  { %3703 = vmatprep.mubr.bf16.mxu1 %v4361_v17  ;;  %v3883_v17 = vld [vmem:[#allocation10 + $0x50] sm:$0xff]  }
 0x1f6   :  { %1717 = vmatmul.mubr.bf16.gmra.mrb[76].mxu0 %v1093_v11  ;;  %3499 = vmatprep.subr.bf16.mxu0 %v3883_v17 }
 0x1f7   :  { %3500 = vmatpush3.bf16.msra.mxu0 %v3884_v19 }
 0x1f8   :  { %3501 = vmatprep.subr.bf16.mxu0 %v3885_v13 }
 0x1fb   :  { %3502 = vmatpush3.bf16.msra.mxu0 %v3886_v20 }
 0x1fc   :  { %3704 = vmatmul.mubr.bf16.vlgmr.msra.gmra.mrb[64].mxu1 %v4371_v29  ;;  %3503 = vmatprep.subr.bf16.mxu0 %v3887_v15  ;;  %v3899_v29 = vld [vmem:[#allocation10 + $0x70] sm:$0xff]  }
 0x1fd   :  { %3707 = vmatprep.mubr.bf16.mxu1 %v4369_v35  ;;  %3560 = vmatpush3.bf16.msra.mxu1 %v3890_v22  ;;  %v3902_v35 = vld [vmem:[#allocation10 + $0xa0] sm:$0xff]  }
 0x1fe   :  { %3561 = vmatprep.subr.bf16.mxu1 %v3891_v24 }
 0x1ff   :  { %3504 = vmatpush3.bf16.msra.mxu0 %v3888_v63 }
 0x200   :  { %3505 = vmatprep.subr.bf16.mxu0 %v3893_v28 }
 0x201   :  { %3562 = vmatpush3.bf16.msra.mxu1 %v3892_v25 }
 0x202   :  { %3563 = vmatprep.subr.bf16.mxu1 %v3895_v26 }
 0x203   :  { %3506 = vmatpush3.bf16.msra.mxu0 %v3894_v49 }
 0x204   :  { %3708 = vmatmul.mubr.bf16.gmra.mrb[68].mxu1 %v1027_v3  ;;  %3507 = vmatprep.subr.bf16.mxu0 %v3899_v29 }
 0x205   :  { %3711 = vmatprep.mubr.bf16.mxu1 %v1028_v55  ;;  %3564 = vmatpush3.bf16.msra.mxu1 %v3896_v27 }
 0x206   :  { %3565 = vmatprep.subr.bf16.mxu1 %v3897_v30 }
 0x207   :  { %3508 = vmatpush3.bf16.msra.mxu0 %v3900_v36 }
 0x208   :  { %3509 = vmatprep.subr.bf16.mxu0 %v3905_v31 }
 0x209   :  { %3566 = vmatpush3.bf16.msra.mxu1 %v3898_v32 }
 0x20a   :  { %3567 = vmatprep.subr.bf16.mxu1 %v3901_v34 }
 0x20b   :  { %3510 = vmatpush3.bf16.msra.mxu0 %v3906_v39 }
 0x20c   :  { %3712 = vmatmul.mubr.bf16.gmra.mrb[72].mxu1 %v1029_v40  ;;  %3719 = vmatprep.subr.bf16.mxu0 %v4392_v46 }
 0x20d   :  { %3715 = vmatprep.mubr.bf16.mxu1 %v1093_v11  ;;  %3568 = vmatpush3.bf16.msra.mxu1 %v3902_v35 }
 0x20e   :  { %3569 = vmatprep.subr.bf16.mxu1 %v3903_v51 }
 0x211   :  { %3570 = vmatpush3.bf16.msra.mxu1 %v3904_v45 }
 0x212   :  { %3571 = vmatprep.subr.bf16.mxu1 %v3907_v37 }
 0x214   :  { %3716 = vmatmul.mubr.bf16.gmra.mrb[76].mxu1 %v4149_v41 }
 0x215   :  { %3572 = vmatpush3.bf16.msra.mxu1 %v3908_v38 }
 0x216   :  { %3573 = vmatprep.subr.bf16.mxu1 %v3909_v42 }
 0x219   :  { %3574 = vmatpush3.bf16.msra.mxu1 %v3910_v44 }
 0x28f   :  { %v3367_v48 = vpop.f32.mrb[32].mxu1 }
 0x290   :  { %v3368_v52 = vpop.f32.mrb[33].mxu1 }
 0x291   :  { %v3369_v21 = vadd.f32 %v3368_v52, %v3367_v48  ;;  %v3370_v53 = vpop.f32.mrb[34].mxu1  ;;  %v3431_v54 = vpop.f32.mrb[48].mxu0 }
 0x292   :  { %v3371_v55 = vpop.f32.mrb[35].mxu1  ;;  %v3432_v3 = vpop.f32.mrb[49].mxu0 }
 0x293   :  { %v1566_v56 = vadd.f32 %v3369_v21, %v4395_v50  ;;  %v3372_v57 = vadd.f32 %v3371_v55, %v3370_v53  ;;  %v3433_v23 = vadd.f32 %v3432_v3, %v3431_v54  ;;  %v3434_v58 = vpop.f32.mrb[50].mxu0 }
 0x294   :  { %v3435_v59 = vpop.f32.mrb[51].mxu0 }
 0x295   :  { %v1569_v5 = vadd.f32 %v3372_v57, %v4395_v50  ;;  %v3436_v60 = vadd.f32 %v3435_v59, %v3434_v58  ;;  %v4399_v0 = vadd.f32 %v3433_v23, %v1566_v56 }
 0x297   :  { %v3373_v2 = vpop.f32.mrb[36].mxu1  ;;  %v4401_v4 = vadd.f32 %v3436_v60, %v1569_v5 }
 0x298   :  { %v3374_v6 = vpop.f32.mrb[37].mxu1 }
 0x299   :  { %v3375_v7 = vadd.f32 %v3374_v6, %v3373_v2  ;;  %v3376_v62 = vpop.f32.mrb[38].mxu1  ;;  %v3437_v8 = vpop.f32.mrb[52].mxu0 }
 0x29a   :  { %v3377_v9 = vpop.f32.mrb[39].mxu1  ;;  %v3438_v10 = vpop.f32.mrb[53].mxu0 }
 0x29b   :  { %v1574_v11 = vadd.f32 %v3375_v7, %v4395_v50  ;;  %v3378_v40 = vadd.f32 %v3377_v9, %v3376_v62  ;;  %v3439_v12 = vadd.f32 %v3438_v10, %v3437_v8  ;;  %v3440_v1 = vpop.f32.mrb[54].mxu0 }
 0x29c   :  { %v3441_v43 = vpop.f32.mrb[55].mxu0 }
 0x29d   :  { %v1577_v47 = vadd.f32 %v3378_v40, %v4395_v50  ;;  %v3442_v14 = vadd.f32 %v3441_v43, %v3440_v1  ;;  %v4405_v16 = vadd.f32 %v3439_v12, %v1574_v11 }
 0x29f   :  { %v3379_v18 = vpop.f32.mrb[40].mxu1  ;;  %v4407_v17 = vadd.f32 %v3442_v14, %v1577_v47 }
 0x2a0   :  { %v3380_v19 = vpop.f32.mrb[41].mxu1 }
 0x2a1   :  { %v3381_v13 = vadd.f32 %v3380_v19, %v3379_v18  ;;  %v3382_v20 = vpop.f32.mrb[42].mxu1  ;;  %v3443_v61 = vpop.f32.mrb[56].mxu0 }
 0x2a2   :  { %v3383_v22 = vpop.f32.mrb[43].mxu1  ;;  %v3444_v15 = vpop.f32.mrb[57].mxu0 }
 0x2a3   :  { %v1582_v63 = vadd.f32 %v3381_v13, %v4395_v50  ;;  %v3384_v24 = vadd.f32 %v3383_v22, %v3382_v20  ;;  %v3445_v25 = vadd.f32 %v3444_v15, %v3443_v61  ;;  %v3446_v26 = vpop.f32.mrb[58].mxu0 }
 0x2a4   :  { %v3447_v27 = vpop.f32.mrb[59].mxu0 }
 0x2a5   :  { %v1585_v28 = vadd.f32 %v3384_v24, %v4395_v50  ;;  %v3448_v49 = vadd.f32 %v3447_v27, %v3446_v26  ;;  %v4411_v30 = vadd.f32 %v3445_v25, %v1582_v63 }
 0x2a7   :  { %v3385_v32 = vpop.f32.mrb[44].mxu1  ;;  %v4413_v34 = vadd.f32 %v3448_v49, %v1585_v28 }
 0x2a8   :  { %v3386_v35 = vpop.f32.mrb[45].mxu1 }
 0x2a9   :  { %v3387_v29 = vadd.f32 %v3386_v35, %v3385_v32  ;;  %v3388_v36 = vpop.f32.mrb[46].mxu1  ;;  %v3449_v51 = vpop.f32.mrb[60].mxu0 }
 0x2aa   :  { %v3389_v45 = vpop.f32.mrb[47].mxu1  ;;  %v3450_v37 = vpop.f32.mrb[61].mxu0 }
 0x2ab   :  { %v1590_v38 = vadd.f32 %v3387_v29, %v4395_v50  ;;  %v3390_v31 = vadd.f32 %v3389_v45, %v3388_v36  ;;  %v3451_v39 = vadd.f32 %v3450_v37, %v3449_v51  ;;  %v3452_v42 = vpop.f32.mrb[62].mxu0 }
 0x2ac   :  { %v3453_v44 = vpop.f32.mrb[63].mxu0 }
 0x2ad   :  { %v1593_v48 = vadd.f32 %v3390_v31, %v4395_v50  ;;  %v3454_v52 = vadd.f32 %v3453_v44, %v3452_v42  ;;  %v4417_v21 = vadd.f32 %v3451_v39, %v1590_v38 }
 0x2af   :  { %v3391_v53 = vpop.f32.mrb[48].mxu1  ;;  %v4419_v54 = vadd.f32 %v3454_v52, %v1593_v48 }
 0x2b0   :  { %v3392_v55 = vpop.f32.mrb[49].mxu1 }
 0x2b1   :  { %v3393_v3 = vadd.f32 %v3392_v55, %v3391_v53  ;;  %v3394_v56 = vpop.f32.mrb[50].mxu1  ;;  %v3455_v57 = vpop.f32.mrb[64].mxu0 }
 0x2b2   :  { %v3395_v23 = vpop.f32.mrb[51].mxu1  ;;  %v3456_v58 = vpop.f32.mrb[65].mxu0 }
 0x2b3   :  { %v1598_v59 = vadd.f32 %v3393_v3, %v4395_v50  ;;  %v3396_v5 = vadd.f32 %v3395_v23, %v3394_v56  ;;  %v3457_v60 = vadd.f32 %v3456_v58, %v3455_v57  ;;  %v3458_v2 = vpop.f32.mrb[66].mxu0 }
 0x2b4   :  { %v3459_v6 = vpop.f32.mrb[67].mxu0 }
 0x2b5   :  { %v1601_v7 = vadd.f32 %v3396_v5, %v4395_v50  ;;  %v3460_v62 = vadd.f32 %v3459_v6, %v3458_v2  ;;  %v4423_v8 = vadd.f32 %v3457_v60, %v1598_v59 }
 0x2b7   :  { %v3397_v9 = vpop.f32.mrb[52].mxu1  ;;  %v4425_v10 = vadd.f32 %v3460_v62, %v1601_v7 }
 0x2b8   :  { %v3398_v11 = vpop.f32.mrb[53].mxu1 }
 0x2b9   :  { %v3399_v40 = vadd.f32 %v3398_v11, %v3397_v9  ;;  %v3400_v12 = vpop.f32.mrb[54].mxu1  ;;  %v3461_v1 = vpop.f32.mrb[68].mxu0 }
 0x2ba   :  { %v3401_v43 = vpop.f32.mrb[55].mxu1  ;;  %v3462_v47 = vpop.f32.mrb[69].mxu0 }
 0x2bb   :  { %v1606_v14 = vadd.f32 %v3399_v40, %v4395_v50  ;;  %v3402_v18 = vadd.f32 %v3401_v43, %v3400_v12  ;;  %v3463_v19 = vadd.f32 %v3462_v47, %v3461_v1  ;;  %v3464_v13 = vpop.f32.mrb[70].mxu0 }
 0x2bc   :  { %v3465_v20 = vpop.f32.mrb[71].mxu0 }
 0x2bd   :  { %v1609_v61 = vadd.f32 %v3402_v18, %v4395_v50  ;;  %v3466_v22 = vadd.f32 %v3465_v20, %v3464_v13  ;;  %v4429_v15 = vadd.f32 %v3463_v19, %v1606_v14 }
 0x2bf   :  { %v3403_v63 = vpop.f32.mrb[56].mxu1  ;;  %v4431_v24 = vadd.f32 %v3466_v22, %v1609_v61  ;;  %v3912_v22 = vld [vmem:[#allocation10 + $0x108] sm:$0xff]  }
 0x2c0   :  { %v3404_v25 = vpop.f32.mrb[57].mxu1 }
 0x2c1   :  { %v3405_v26 = vadd.f32 %v3404_v25, %v3403_v63  ;;  %v3406_v27 = vpop.f32.mrb[58].mxu1  ;;  %v3467_v28 = vpop.f32.mrb[72].mxu0 }
 0x2c2   :  { %v3407_v49 = vpop.f32.mrb[59].mxu1  ;;  %v3468_v32 = vpop.f32.mrb[73].mxu0 }
 0x2c3   :  { %v1614_v35 = vadd.f32 %v3405_v26, %v4395_v50  ;;  %v3408_v29 = vadd.f32 %v3407_v49, %v3406_v27  ;;  %v3469_v36 = vadd.f32 %v3468_v32, %v3467_v28  ;;  %v3470_v51 = vpop.f32.mrb[74].mxu0  ;;  %v3913_v49 = vld [vmem:[#allocation10 + $0x110] sm:$0xff]  }
 0x2c4   :  { %v3471_v45 = vpop.f32.mrb[75].mxu0 }
 0x2c5   :  { %v1617_v37 = vadd.f32 %v3408_v29, %v4395_v50  ;;  %v3472_v38 = vadd.f32 %v3471_v45, %v3470_v51  ;;  %v4435_v31 = vadd.f32 %v3469_v36, %v1614_v35 }
 0x2c7   :  { %v3409_v39 = vpop.f32.mrb[60].mxu1  ;;  %v4437_v42 = vadd.f32 %v3472_v38, %v1617_v37 }
 0x2c8   :  { %v3410_v44 = vpop.f32.mrb[61].mxu1 }
 0x2c9   :  { %v3411_v48 = vadd.f32 %v3410_v44, %v3409_v39  ;;  %v3412_v52 = vpop.f32.mrb[62].mxu1  ;;  %v3473_v53 = vpop.f32.mrb[76].mxu0 }
 0x2ca   :  { %v3413_v55 = vpop.f32.mrb[63].mxu1  ;;  %v3474_v3 = vpop.f32.mrb[77].mxu0 }
 0x2cb   :  { %v1622_v56 = vadd.f32 %v3411_v48, %v4395_v50  ;;  %v3414_v57 = vadd.f32 %v3413_v55, %v3412_v52  ;;  %v3475_v23 = vadd.f32 %v3474_v3, %v3473_v53  ;;  %v3476_v58 = vpop.f32.mrb[78].mxu0  ;;  %v3915_v53 = vld [vmem:[#allocation10 + $0x120] sm:$0xff]  }
 0x2cc   :  { %v3477_v59 = vpop.f32.mrb[79].mxu0 }
 0x2cd   :  { %v1625_v5 = vadd.f32 %v3414_v57, %v4395_v50  ;;  %v3478_v60 = vadd.f32 %v3477_v59, %v3476_v58  ;;  %v4441_v2 = vadd.f32 %v3475_v23, %v1622_v56 }
 0x2cf   :  { %v3705_v6 = vpop.f32.mrb[64].mxu1  ;;  %v4443_v7 = vadd.f32 %v3478_v60, %v1625_v5 }
 0x2d0   :  { %v1768_v62 = vadd.f32 %v3705_v6, %v4405_v16  ;;  %v1759_v9 = vpop.f32.mrb[65].mxu1 }
 0x2d1   :  { %v1760_v11 = vadd.f32 %v1759_v9, %v4399_v0  ;;  %v3706_v40 = vpop.f32.mrb[66].mxu1 }
 0x2d2   :  { %v1771_v12 = vadd.f32 %v3706_v40, %v4407_v17  ;;  %v1762_v1 = vpop.f32.mrb[67].mxu1  ;;  %v1824_v14 = vmax.f32 %v1768_v62, 0.0  ;;  %v3917_v40 = vld [vmem:[#allocation10 + $0x130] sm:$0xff]  }
 0x2d3   :  { %v1822_v43 = vmax.f32 %v1760_v11, 0.0  ;;  %v1763_v47 = vadd.f32 %v1762_v1, %v4401_v4 }
 0x2d4   :  { %v1825_v50 = vmax.f32 %v1771_v12, 0.0 }
 0x2d5   :  { %v1902_v18 = vpack.c.bf16 %v1822_v43, %v4148_v33  ;;  %v1823_v19 = vmax.f32 %v1763_v47, 0.0 }
 0x2d6   :  { %v4450_v13 = vpack.c.bf16 %v1825_v50, %v1824_v14 }
 0x2d7   :  { %v1871_v20 = vpack.c.bf16 %v1823_v19, %v1822_v43  ;;  %v1903_v61 = vpack.c.bf16 %v1824_v14, %v1823_v19  ;;  %v3709_v16 = vpop.f32.mrb[68].mxu1  ;;  %2411 = vmatprep.mubr.bf16.mxu0 %v1902_v18  ;;  %v3921_v18 = vld [vmem:[#allocation13 + $0x10] sm:$0xff]   ;;  %v3922_v19 = vld [vmem:[#allocation13 + $0x18] sm:$0xff]  }
 0x2d8   :  { %v1784_v0 = vadd.f32 %v3709_v16, %v4417_v21  ;;  %v1775_v63 = vpop.f32.mrb[69].mxu1  ;;  %2412 = vmatmul.mubr.bf16.vlgmr.msra.gmra.mrb[80].mxu0 %v4149_v41 }
 0x2d9   :  { %v1776_v17 = vadd.f32 %v1775_v63, %v4411_v30  ;;  %v3710_v4 = vpop.f32.mrb[70].mxu1  ;;  %2419 = vmatprep.mubr.bf16.mxu0 %v1903_v61  ;;  %2508 = vmatprep.mubr.bf16.mxu1 %v1903_v61  ;;  %v3925_v61 = vld [vmem:[#allocation13 + $0x30] sm:$0xff]  }
 0x2da   :  { %v1787_v25 = vadd.f32 %v3710_v4, %v4419_v54  ;;  %3720 = vmatpush3.bf16.msra.mxu0 %v4392_v46  ;;  %v1778_v26 = vpop.f32.mrb[71].mxu1  ;;  %2509 = vmatmul.mubr.bf16.vlgmr.msra.gmra.mrb[80].mxu1 %v1871_v20  ;;  %v1828_v21 = vmax.f32 %v1784_v0, 0.0  ;;  %v3914_v46 = vld [vmem:[#allocation10 + $0x118] sm:$0xff]  }
 0x2db   :  { %v1826_v27 = vmax.f32 %v1776_v17, 0.0  ;;  %v1779_v28 = vadd.f32 %v1778_v26, %v4413_v34  ;;  %3721 = vmatprep.subr.bf16.mxu0 %v3912_v22 }
 0x2dc   :  { %v1829_v32 = vmax.f32 %v1787_v25, 0.0 }
 0x2dd   :  { %v1904_v35 = vpack.c.bf16 %v1826_v27, %v1825_v50  ;;  %v1827_v29 = vmax.f32 %v1779_v28, 0.0  ;;  %v3919_v50 = vld [vmem:[#allocation13] sm:$0xff]  }
 0x2de   :  { %v4458_v36 = vpack.c.bf16 %v1829_v32, %v1828_v21  ;;  %3722 = vmatpush3.bf16.msra.mxu0 %v3912_v22  ;;  %3751 = vmatprep.subr.bf16.mxu1 %v3919_v50  ;;  %v4481_v22 = vld [vmem:[#allocation12 + $0x2] ss:$0 sm:$0xff] }
 0x2df   :  { %v4460_v30 = vpack.c.bf16 %v1827_v29, %v1826_v27  ;;  %v1905_v51 = vpack.c.bf16 %v1828_v21, %v1827_v29  ;;  %v3713_v54 = vpop.f32.mrb[72].mxu1  ;;  %2516 = vmatprep.mubr.bf16.mxu1 %v1904_v35  ;;  %3723 = vmatprep.subr.bf16.mxu0 %v3913_v49 }
 0x2e0   :  { %v1800_v45 = vadd.f32 %v3713_v54, %v4429_v15  ;;  %v1791_v37 = vpop.f32.mrb[73].mxu1  ;;  %2420 = vmatmul.mubr.bf16.gmra.mrb[84].mxu0 %v1871_v20  ;;  %3752 = vmatpush3.bf16.msra.mxu1 %v3919_v50  ;;  %v3924_v20 = vld [vmem:[#allocation13 + $0x28] sm:$0xff]  }
 0x2e1   :  { %v1792_v34 = vadd.f32 %v1791_v37, %v4423_v8  ;;  %v3714_v38 = vpop.f32.mrb[74].mxu1  ;;  %2427 = vmatprep.mubr.bf16.mxu0 %v1904_v35 }
 0x2e2   :  { %v1803_v39 = vadd.f32 %v3714_v38, %v4431_v24  ;;  %v1794_v44 = vpop.f32.mrb[75].mxu1  ;;  %2517 = vmatmul.mubr.bf16.gmra.mrb[84].mxu1 %v4450_v13  ;;  %3724 = vmatpush3.bf16.msra.mxu0 %v3913_v49  ;;  %v1832_v55 = vmax.f32 %v1800_v45, 0.0  ;;  %v3916_v24 = vld [vmem:[#allocation10 + $0x128] sm:$0xff]  }
 0x2e3   :  { %v1830_v48 = vmax.f32 %v1792_v34, 0.0  ;;  %v1795_v52 = vadd.f32 %v1794_v44, %v4425_v10  ;;  %2524 = vmatprep.mubr.bf16.mxu1 %v1905_v51  ;;  %3725 = vmatprep.subr.bf16.mxu0 %v3914_v46 }
 0x2e4   :  { %v1833_v15 = vmax.f32 %v1803_v39, 0.0 }
 0x2e5   :  { %v1906_v3 = vpack.c.bf16 %v1830_v48, %v1829_v32  ;;  %v1831_v56 = vmax.f32 %v1795_v52, 0.0 }
 0x2e6   :  { %v1876_v57 = vpack.c.bf16 %v1833_v15, %v1832_v55  ;;  %3726 = vmatpush3.bf16.msra.mxu0 %v3914_v46 }
 0x2e7   :  { %v1875_v8 = vpack.c.bf16 %v1831_v56, %v1830_v48  ;;  %v1907_v23 = vpack.c.bf16 %v1832_v55, %v1831_v56  ;;  %v3717_v58 = vpop.f32.mrb[76].mxu1  ;;  %3727 = vmatprep.subr.bf16.mxu0 %v3915_v53 }
 0x2e8   :  { %v1816_v59 = vadd.f32 %v3717_v58, %v4441_v2  ;;  %v1807_v5 = vpop.f32.mrb[77].mxu1  ;;  %2428 = vmatmul.mubr.bf16.gmra.mrb[88].mxu0 %v4450_v13 }
 0x2e9   :  { %v1808_v10 = vadd.f32 %v1807_v5, %v4435_v31  ;;  %v3718_v60 = vpop.f32.mrb[78].mxu1  ;;  %2435 = vmatprep.mubr.bf16.mxu0 %v1905_v51 }
 0x2ea   :  { %v1819_v6 = vadd.f32 %v3718_v60, %v4443_v7  ;;  %v1810_v62 = vpop.f32.mrb[79].mxu1  ;;  %2525 = vmatmul.mubr.bf16.gmra.mrb[88].mxu1 %v4460_v30  ;;  %3728 = vmatpush3.bf16.msra.mxu0 %v3915_v53  ;;  %v1836_v2 = vmax.f32 %v1816_v59, 0.0  ;;  %v3918_v7 = vld [vmem:[#allocation10 + $0x138] sm:$0xff]  }
 0x2eb   :  { %v1834_v9 = vmax.f32 %v1808_v10, 0.0  ;;  %v1811_v11 = vadd.f32 %v1810_v62, %v4437_v42  ;;  %2532 = vmatprep.mubr.bf16.mxu1 %v1906_v3  ;;  %3729 = vmatprep.subr.bf16.mxu0 %v3916_v24 }
 0x2ec   :  { %v1837_v12 = vmax.f32 %v1819_v6, 0.0 }
 0x2ed   :  { %v1908_v1 = vpack.c.bf16 %v1834_v9, %v1833_v15  ;;  %v1835_v43 = vmax.f32 %v1811_v11, 0.0 }
 0x2ee   :  { %v1941_v47 = vpack.c.bf16 %v1837_v12, %v1836_v2  ;;  %3730 = vmatpush3.bf16.msra.mxu0 %v3916_v24  ;;  %v1973_v42 = vpack.c.bf16 %v4148_v33, %v1837_v12  ;;  %v3920_v33 = vld [vmem:[#allocation13 + $0x8] sm:$0xff]  }
 0x2ef   :  { %v1877_v31 = vpack.c.bf16 %v1835_v43, %v1834_v9  ;;  %v1909_v14 = vpack.c.bf16 %v1836_v2, %v1835_v43  ;;  %3731 = vmatprep.subr.bf16.mxu0 %v3917_v40  ;;  %3753 = vmatprep.subr.bf16.mxu1 %v3920_v33 }
 0x2f0   :  { %2436 = vmatmul.mubr.bf16.gmra.mrb[92].mxu0 %v4460_v30  ;;  %3754 = vmatpush3.bf16.msra.mxu1 %v3920_v33 }
 0x2f1   :  { %2443 = vmatprep.mubr.bf16.mxu0 %v1906_v3  ;;  %3755 = vmatprep.subr.bf16.mxu1 %v3921_v18 }
 0x2f2   :  { %2533 = vmatmul.mubr.bf16.gmra.mrb[92].mxu1 %v4458_v36  ;;  %3732 = vmatpush3.bf16.msra.mxu0 %v3917_v40 }
 0x2f3   :  { %2540 = vmatprep.mubr.bf16.mxu1 %v1907_v23  ;;  %3733 = vmatprep.subr.bf16.mxu0 %v3918_v7 }
 0x2f4   :  { %3756 = vmatpush3.bf16.msra.mxu1 %v3921_v18 }
 0x2f5   :  { %3757 = vmatprep.subr.bf16.mxu1 %v3922_v19 }
 0x2f6   :  { %3734 = vmatpush3.bf16.msra.mxu0 %v3918_v7 }
 0x2f8   :  { %2444 = vmatmul.mubr.bf16.gmra.mrb[96].mxu0 %v4458_v36  ;;  %3758 = vmatpush3.bf16.msra.mxu1 %v3922_v19 }
 0x2f9   :  { %2451 = vmatprep.mubr.bf16.mxu0 %v1907_v23 }
 0x2fa   :  { %2541 = vmatmul.mubr.bf16.gmra.mrb[96].mxu1 %v1875_v8 }
 0x2fb   :  { %2548 = vmatprep.mubr.bf16.mxu1 %v1908_v1 }
 0x300   :  { %2452 = vmatmul.mubr.bf16.gmra.mrb[100].mxu0 %v1875_v8 }
 0x301   :  { %2459 = vmatprep.mubr.bf16.mxu0 %v1908_v1 }
 0x302   :  { %2549 = vmatmul.mubr.bf16.gmra.mrb[100].mxu1 %v1876_v57 }
 0x303   :  { %2556 = vmatprep.mubr.bf16.mxu1 %v1909_v14 }
 0x308   :  { %2460 = vmatmul.mubr.bf16.gmra.mrb[104].mxu0 %v1876_v57 }
 0x309   :  { %2467 = vmatprep.mubr.bf16.mxu0 %v1909_v14 }
 0x30a   :  { %2557 = vmatmul.mubr.bf16.gmra.mrb[104].mxu1 %v1877_v31 }
 0x30b   :  { %2564 = vmatprep.mubr.bf16.mxu1 %v1973_v42 }
 0x310   :  { %2468 = vmatmul.mubr.bf16.gmra.mrb[108].mxu0 %v1877_v31 }
 0x311   :  { %3735 = vmatprep.mubr.bf16.mxu0 %v4450_v13  ;;  %v3923_v13 = vld [vmem:[#allocation13 + $0x20] sm:$0xff]  }
 0x312   :  { %2565 = vmatmul.mubr.bf16.gmra.mrb[108].mxu1 %v1941_v47  ;;  %3759 = vmatprep.subr.bf16.mxu1 %v3923_v13 }
 0x313   :  { %3760 = vmatpush3.bf16.msra.mxu1 %v3923_v13 }
 0x314   :  { %3761 = vmatprep.subr.bf16.mxu1 %v3924_v20 }
 0x317   :  { %3762 = vmatpush3.bf16.msra.mxu1 %v3924_v20 }
 0x318   :  { %3736 = vmatmul.mubr.bf16.vlgmr.msra.gmra.mrb[112].mxu0 %v4460_v30  ;;  %3763 = vmatprep.subr.bf16.mxu1 %v3925_v61 }
 0x319   :  { %3739 = vmatprep.mubr.bf16.mxu0 %v4458_v36 }
 0x31b   :  { %3764 = vmatpush3.bf16.msra.mxu1 %v3925_v61 }
 0x320   :  { %3740 = vmatmul.mubr.bf16.gmra.mrb[116].mxu0 %v1875_v8 }
 0x321   :  { %3743 = vmatprep.mubr.bf16.mxu0 %v1876_v57 }
 0x328   :  { %3744 = vmatmul.mubr.bf16.gmra.mrb[120].mxu0 %v1877_v31 }
 0x329   :  { %3747 = vmatprep.mubr.bf16.mxu0 %v1941_v47 }
 0x330   :  { %3748 = vmatmul.mubr.bf16.gmra.mrb[124].mxu0 %v4149_v41  ;;  %v3926_v41 = vld [vmem:[#allocation13 + $0x38] sm:$0xff]  }
 0x331   :  { %3765 = vmatprep.subr.bf16.mxu1 %v3926_v41 }
 0x332   :  { %3766 = vmatpush3.bf16.msra.mxu1 %v3926_v41 }
 0x3ab   :  { %v3511_v16 = vpop.f32.mrb[80].mxu0 }
 0x3ac   :  { %v3512_v0 = vpop.f32.mrb[81].mxu0 }
 0x3ad   :  { %v3513_v63 = vadd.f32 %v3512_v0, %v3511_v16  ;;  %v3514_v17 = vpop.f32.mrb[82].mxu0  ;;  %v3575_v4 = vpop.f32.mrb[80].mxu1 }
 0x3ae   :  { %v3515_v25 = vpop.f32.mrb[83].mxu0  ;;  %v3576_v26 = vpop.f32.mrb[81].mxu1 }
 0x3af   :  { %v2414_v27 = vadd.f32 %v3513_v63, %v4481_v22  ;;  %v3516_v28 = vadd.f32 %v3515_v25, %v3514_v17  ;;  %v3577_v49 = vadd.f32 %v3576_v26, %v3575_v4  ;;  %v3578_v21 = vpop.f32.mrb[82].mxu1 }
 0x3b0   :  { %v3579_v32 = vpop.f32.mrb[83].mxu1 }
 0x3b1   :  { %v2417_v35 = vadd.f32 %v3516_v28, %v4481_v22  ;;  %v3580_v29 = vadd.f32 %v3579_v32, %v3578_v21  ;;  %v4485_v36 = vadd.f32 %v3577_v49, %v2414_v27 }
 0x3b3   :  { %v3517_v30 = vpop.f32.mrb[84].mxu0  ;;  %v4487_v51 = vadd.f32 %v3580_v29, %v2417_v35 }
 0x3b4   :  { %v3518_v54 = vpop.f32.mrb[85].mxu0 }
 0x3b5   :  { %v3519_v46 = vadd.f32 %v3518_v54, %v3517_v30  ;;  %v3520_v45 = vpop.f32.mrb[86].mxu0  ;;  %v3581_v37 = vpop.f32.mrb[84].mxu1 }
 0x3b6   :  { %v3521_v34 = vpop.f32.mrb[87].mxu0  ;;  %v3582_v38 = vpop.f32.mrb[85].mxu1 }
 0x3b7   :  { %v2422_v39 = vadd.f32 %v3519_v46, %v4481_v22  ;;  %v3522_v44 = vadd.f32 %v3521_v34, %v3520_v45  ;;  %v3583_v48 = vadd.f32 %v3582_v38, %v3581_v37  ;;  %v3584_v52 = vpop.f32.mrb[86].mxu1 }
 0x3b8   :  { %v3585_v53 = vpop.f32.mrb[87].mxu1 }
 0x3b9   :  { %v2425_v55 = vadd.f32 %v3522_v44, %v4481_v22  ;;  %v3586_v15 = vadd.f32 %v3585_v53, %v3584_v52  ;;  %v4491_v3 = vadd.f32 %v3583_v48, %v2422_v39 }
 0x3bb   :  { %v3523_v56 = vpop.f32.mrb[88].mxu0  ;;  %v4493_v57 = vadd.f32 %v3586_v15, %v2425_v55 }
 0x3bc   :  { %v3524_v8 = vpop.f32.mrb[89].mxu0 }
 0x3bd   :  { %v3525_v23 = vadd.f32 %v3524_v8, %v3523_v56  ;;  %v3526_v58 = vpop.f32.mrb[90].mxu0  ;;  %v3587_v24 = vpop.f32.mrb[88].mxu1 }
 0x3be   :  { %v3527_v59 = vpop.f32.mrb[91].mxu0  ;;  %v3588_v5 = vpop.f32.mrb[89].mxu1 }
 0x3bf   :  { %v2430_v10 = vadd.f32 %v3525_v23, %v4481_v22  ;;  %v3528_v60 = vadd.f32 %v3527_v59, %v3526_v58  ;;  %v3589_v6 = vadd.f32 %v3588_v5, %v3587_v24  ;;  %v3590_v62 = vpop.f32.mrb[90].mxu1 }
 0x3c0   :  { %v3591_v9 = vpop.f32.mrb[91].mxu1 }
 0x3c1   :  { %v2433_v11 = vadd.f32 %v3528_v60, %v4481_v22  ;;  %v3592_v40 = vadd.f32 %v3591_v9, %v3590_v62  ;;  %v4497_v2 = vadd.f32 %v3589_v6, %v2430_v10 }
 0x3c3   :  { %v3529_v12 = vpop.f32.mrb[92].mxu0  ;;  %v4499_v1 = vadd.f32 %v3592_v40, %v2433_v11 }
 0x3c4   :  { %v3530_v43 = vpop.f32.mrb[93].mxu0 }
 0x3c5   :  { %v3531_v47 = vadd.f32 %v3530_v43, %v3529_v12  ;;  %v3532_v31 = vpop.f32.mrb[94].mxu0  ;;  %v3593_v14 = vpop.f32.mrb[92].mxu1 }
 0x3c6   :  { %v3533_v7 = vpop.f32.mrb[95].mxu0  ;;  %v3594_v42 = vpop.f32.mrb[93].mxu1 }
 0x3c7   :  { %v2438_v50 = vadd.f32 %v3531_v47, %v4481_v22  ;;  %v3534_v33 = vadd.f32 %v3533_v7, %v3532_v31  ;;  %v3595_v18 = vadd.f32 %v3594_v42, %v3593_v14  ;;  %v3596_v19 = vpop.f32.mrb[94].mxu1 }
 0x3c8   :  { %v3597_v13 = vpop.f32.mrb[95].mxu1 }
 0x3c9   :  { %v2441_v20 = vadd.f32 %v3534_v33, %v4481_v22  ;;  %v3598_v61 = vadd.f32 %v3597_v13, %v3596_v19  ;;  %v4503_v41 = vadd.f32 %v3595_v18, %v2438_v50 }
 0x3cb   :  { %v3535_v16 = vpop.f32.mrb[96].mxu0  ;;  %v4505_v0 = vadd.f32 %v3598_v61, %v2441_v20 }
 0x3cc   :  { %v3536_v63 = vpop.f32.mrb[97].mxu0 }
 0x3cd   :  { %v3537_v17 = vadd.f32 %v3536_v63, %v3535_v16  ;;  %v3538_v4 = vpop.f32.mrb[98].mxu0  ;;  %v3599_v25 = vpop.f32.mrb[96].mxu1 }
 0x3ce   :  { %v3539_v26 = vpop.f32.mrb[99].mxu0  ;;  %v3600_v27 = vpop.f32.mrb[97].mxu1 }
 0x3cf   :  { %v2446_v28 = vadd.f32 %v3537_v17, %v4481_v22  ;;  %v3540_v49 = vadd.f32 %v3539_v26, %v3538_v4  ;;  %v3601_v21 = vadd.f32 %v3600_v27, %v3599_v25  ;;  %v3602_v32 = vpop.f32.mrb[98].mxu1 }
 0x3d0   :  { %v3603_v35 = vpop.f32.mrb[99].mxu1 }
 0x3d1   :  { %v2449_v29 = vadd.f32 %v3540_v49, %v4481_v22  ;;  %v3604_v30 = vadd.f32 %v3603_v35, %v3602_v32  ;;  %v4509_v54 = vadd.f32 %v3601_v21, %v2446_v28 }
 0x3d3   :  { %v3541_v46 = vpop.f32.mrb[100].mxu0  ;;  %v4511_v45 = vadd.f32 %v3604_v30, %v2449_v29 }
 0x3d4   :  { %v3542_v37 = vpop.f32.mrb[101].mxu0 }
 0x3d5   :  { %v3543_v34 = vadd.f32 %v3542_v37, %v3541_v46  ;;  %v3544_v38 = vpop.f32.mrb[102].mxu0  ;;  %v3605_v39 = vpop.f32.mrb[100].mxu1 }
 0x3d6   :  { %v3545_v44 = vpop.f32.mrb[103].mxu0  ;;  %v3606_v48 = vpop.f32.mrb[101].mxu1 }
 0x3d7   :  { %v2454_v52 = vadd.f32 %v3543_v34, %v4481_v22  ;;  %v3546_v53 = vadd.f32 %v3545_v44, %v3544_v38  ;;  %v3607_v55 = vadd.f32 %v3606_v48, %v3605_v39  ;;  %v3608_v15 = vpop.f32.mrb[102].mxu1 }
 0x3d8   :  { %v3609_v56 = vpop.f32.mrb[103].mxu1 }
 0x3d9   :  { %v2457_v8 = vadd.f32 %v3546_v53, %v4481_v22  ;;  %v3610_v23 = vadd.f32 %v3609_v56, %v3608_v15  ;;  %v4515_v58 = vadd.f32 %v3607_v55, %v2454_v52 }
 0x3db   :  { %v3547_v24 = vpop.f32.mrb[104].mxu0  ;;  %v4517_v59 = vadd.f32 %v3610_v23, %v2457_v8 }
 0x3dc   :  { %v3548_v5 = vpop.f32.mrb[105].mxu0 }
 0x3dd   :  { %v3549_v10 = vadd.f32 %v3548_v5, %v3547_v24  ;;  %v3550_v60 = vpop.f32.mrb[106].mxu0  ;;  %v3611_v6 = vpop.f32.mrb[104].mxu1 }
 0x3de   :  { %v3551_v62 = vpop.f32.mrb[107].mxu0  ;;  %v3612_v9 = vpop.f32.mrb[105].mxu1 }
 0x3df   :  { %v2462_v11 = vadd.f32 %v3549_v10, %v4481_v22  ;;  %v3552_v40 = vadd.f32 %v3551_v62, %v3550_v60  ;;  %v3613_v12 = vadd.f32 %v3612_v9, %v3611_v6  ;;  %v3614_v43 = vpop.f32.mrb[106].mxu1 }
 0x3e0   :  { %v3615_v47 = vpop.f32.mrb[107].mxu1 }
 0x3e1   :  { %v2465_v31 = vadd.f32 %v3552_v40, %v4481_v22  ;;  %v3616_v14 = vadd.f32 %v3615_v47, %v3614_v43  ;;  %v4521_v7 = vadd.f32 %v3613_v12, %v2462_v11 }
 0x3e3   :  { %v3553_v42 = vpop.f32.mrb[108].mxu0  ;;  %v4523_v50 = vadd.f32 %v3616_v14, %v2465_v31 }
 0x3e4   :  { %v3554_v33 = vpop.f32.mrb[109].mxu0 }
 0x3e5   :  { %v3555_v18 = vadd.f32 %v3554_v33, %v3553_v42  ;;  %v3556_v19 = vpop.f32.mrb[110].mxu0  ;;  %v3617_v13 = vpop.f32.mrb[108].mxu1 }
 0x3e6   :  { %v3557_v20 = vpop.f32.mrb[111].mxu0  ;;  %v3618_v61 = vpop.f32.mrb[109].mxu1 }
 0x3e7   :  { %v2470_v16 = vadd.f32 %v3555_v18, %v4481_v22  ;;  %v3558_v63 = vadd.f32 %v3557_v20, %v3556_v19  ;;  %v3619_v17 = vadd.f32 %v3618_v61, %v3617_v13  ;;  %v3620_v4 = vpop.f32.mrb[110].mxu1 }
 0x3e8   :  { %v3621_v25 = vpop.f32.mrb[111].mxu1 }
 0x3e9   :  { %v2473_v26 = vadd.f32 %v3558_v63, %v4481_v22  ;;  %v3622_v27 = vadd.f32 %v3621_v25, %v3620_v4  ;;  %v2567_v28 = vadd.f32 %v3619_v17, %v2470_v16  ;;  %v4541_v4 = vld [vmem:[#allocation15] ss:$0 sm:$0xff] }
 0x3eb   :  { %v3737_v49 = vpop.f32.mrb[112].mxu0  ;;  %v2570_v21 = vadd.f32 %v3622_v27, %v2473_v26 }
 0x3ec   :  { %v2616_v32 = vadd.f32 %v3737_v49, %v4491_v3  ;;  %v2607_v35 = vpop.f32.mrb[113].mxu0 }
 0x3ed   :  { %v2608_v29 = vadd.f32 %v2607_v35, %v4485_v36  ;;  %v3738_v30 = vpop.f32.mrb[114].mxu0 }
 0x3ee   :  { %v2619_v46 = vadd.f32 %v3738_v30, %v4493_v57  ;;  %v2610_v37 = vpop.f32.mrb[115].mxu0  ;;  %v2672_v38 = vmax.f32 %v2616_v32, 0.0 }
 0x3ef   :  { %v2611_v34 = vadd.f32 %v2610_v37, %v4487_v51  ;;  %v2670_v44 = vmax.f32 %v2608_v29, 0.0 }
 0x3f0   :  { %v2673_v39 = vmax.f32 %v2619_v46, 0.0 }
 0x3f1   :  { %v2671_v48 = vmax.f32 %v2611_v34, 0.0 }
 0x3f2   :  { %v2687_v22 = vpack.c.bf16 %v2673_v39, %v2672_v38 }
 0x3f3   :  { %v2686_v52 = vpack.c.bf16 %v2671_v48, %v2670_v44  ;;  %v3741_v53 = vpop.f32.mrb[116].mxu0 }
 0x3f4   :  { %v2632_v55 = vadd.f32 %v3741_v53, %v4503_v41  ;;  %v2623_v15 = vpop.f32.mrb[117].mxu0 }
 0x3f5   :  { %v2624_v3 = vadd.f32 %v2623_v15, %v4497_v2  ;;  %v3742_v56 = vpop.f32.mrb[118].mxu0  ;;  %3767 = vmatprep.mubr.bf16.mxu1 %v2686_v52 }
 0x3f6   :  { %v2635_v36 = vadd.f32 %v3742_v56, %v4505_v0  ;;  %v2626_v57 = vpop.f32.mrb[119].mxu0  ;;  %3768 = vmatmul.mubr.bf16.vlgmr.msra.gmra.mrb[112].mxu1 %v2687_v22  ;;  %v2676_v8 = vmax.f32 %v2632_v55, 0.0 }
 0x3f7   :  { %v2627_v51 = vadd.f32 %v2626_v57, %v4499_v1  ;;  %v2674_v24 = vmax.f32 %v2624_v3, 0.0 }
 0x3f8   :  { %v2677_v23 = vmax.f32 %v2635_v36, 0.0 }
 0x3f9   :  { %v2675_v5 = vmax.f32 %v2627_v51, 0.0 }
 0x3fa   :  { %v2689_v10 = vpack.c.bf16 %v2677_v23, %v2676_v8 }
 0x3fb   :  { %v2688_v60 = vpack.c.bf16 %v2675_v5, %v2674_v24  ;;  %v3745_v6 = vpop.f32.mrb[120].mxu0 }
 0x3fc   :  { %v2648_v41 = vadd.f32 %v3745_v6, %v4515_v58  ;;  %v2639_v62 = vpop.f32.mrb[121].mxu0 }
 0x3fd   :  { %v2640_v2 = vadd.f32 %v2639_v62, %v4509_v54  ;;  %v3746_v9 = vpop.f32.mrb[122].mxu0  ;;  %3771 = vmatprep.mubr.bf16.mxu1 %v2688_v60 }
 0x3fe   :  { %v2651_v0 = vadd.f32 %v3746_v9, %v4517_v59  ;;  %v2642_v11 = vpop.f32.mrb[123].mxu0  ;;  %3772 = vmatmul.mubr.bf16.gmra.mrb[116].mxu1 %v2689_v10  ;;  %v2680_v40 = vmax.f32 %v2648_v41, 0.0 }
 0x3ff   :  { %v2643_v1 = vadd.f32 %v2642_v11, %v4511_v45  ;;  %v2678_v43 = vmax.f32 %v2640_v2, 0.0 }
 0x400   :  { %v2681_v12 = vmax.f32 %v2651_v0, 0.0 }
 0x401   :  { %v2679_v47 = vmax.f32 %v2643_v1, 0.0 }
 0x402   :  { %v2691_v31 = vpack.c.bf16 %v2681_v12, %v2680_v40 }
 0x403   :  { %v2690_v14 = vpack.c.bf16 %v2679_v47, %v2678_v43  ;;  %v3749_v42 = vpop.f32.mrb[124].mxu0 }
 0x404   :  { %v2664_v33 = vadd.f32 %v3749_v42, %v2567_v28  ;;  %v2655_v58 = vpop.f32.mrb[125].mxu0 }
 0x405   :  { %v2656_v18 = vadd.f32 %v2655_v58, %v4521_v7  ;;  %v3750_v54 = vpop.f32.mrb[126].mxu0  ;;  %3775 = vmatprep.mubr.bf16.mxu1 %v2690_v14 }
 0x406   :  { %v2667_v19 = vadd.f32 %v3750_v54, %v2570_v21  ;;  %v2658_v13 = vpop.f32.mrb[127].mxu0  ;;  %3776 = vmatmul.mubr.bf16.gmra.mrb[120].mxu1 %v2691_v31  ;;  %v2684_v20 = vmax.f32 %v2664_v33, 0.0 }
 0x407   :  { %v2659_v59 = vadd.f32 %v2658_v13, %v4523_v50  ;;  %v2682_v61 = vmax.f32 %v2656_v18, 0.0 }
 0x408   :  { %v2685_v45 = vmax.f32 %v2667_v19, 0.0 }
 0x409   :  { %v2683_v16 = vmax.f32 %v2659_v59, 0.0 }
 0x40a   :  { %v2693_v63 = vpack.c.bf16 %v2685_v45, %v2684_v20 }
 0x40b   :  { %v2692_v17 = vpack.c.bf16 %v2683_v16, %v2682_v61 }
 0x40d   :  { %3779 = vmatprep.mubr.bf16.mxu1 %v2692_v17 }
 0x40e   :  { %3780 = vmatmul.mubr.bf16.gmra.mrb[124].mxu1 %v2693_v63 }
 0x4c9   :  { %v3769_v25 = vpop.f32.mrb[112].mxu1 }
 0x4ca   :  { %v2808_v7 = vadd.f32 %v3769_v25, %v4541_v4  ;;  %v2799_v26 = vpop.f32.mrb[113].mxu1 }
 0x4cb   :  { %v2800_v27 = vadd.f32 %v4541_v4, %v2799_v26  ;;  %v3770_v28 = vpop.f32.mrb[114].mxu1 }
 0x4cc   :  { %v3193_v49 = vpack.c.bf16 %v2808_v7, %v2808_v7  ;;  %v2811_v50 = vadd.f32 %v3770_v28, %v4541_v4  ;;  %v2802_v21 = vpop.f32.mrb[115].mxu1 }
 0x4cd   :  { %v3191_v32 = vpack.c.bf16 %v2800_v27, %v2800_v27  ;;  %v2803_v35 = vadd.f32 %v4541_v4, %v2802_v21 }
 0x4ce   :  { %2929 = vst.msk [vmem:[#allocation16 + $0x8] sm:$0xf] %vm2926_vm0, %v3193_v49  ;;  %v3194_v29 = vpack.c.bf16 %v2811_v50, %v2811_v50  ;;  %2947 = vrot.lane.b32.xlu1 %v3193_v49, %s4150_s6 }
 0x4cf   :  { %2927 = vst.msk [vmem:[#allocation16] sm:$0xf] %vm2926_vm0, %v3191_v32  ;;  %v3192_v30 = vpack.c.bf16 %v2803_v35, %v2803_v35  ;;  %2943 = vrot.lane.b32.xlu0 %v3191_v32, %s4150_s6 }
 0x4d0   :  { %2930 = vst.msk [vmem:[#allocation16 + $0xc] sm:$0xf] %vm2926_vm0, %v3194_v29 }
 0x4d1   :  { %2928 = vst.msk [vmem:[#allocation16 + $0x4] sm:$0xf] %vm2926_vm0, %v3192_v30  ;;  %v3773_v46 = vpop.f32.mrb[116].mxu1 }
 0x4d2   :  { %v2824_v37 = vadd.f32 %v3773_v46, %v4541_v4  ;;  %2949 = vrot.lane.b32.xlu1 %v3194_v29, %s4150_s6  ;;  %v2815_v34 = vpop.f32.mrb[117].mxu1 }
 0x4d3   :  { %v2816_v38 = vadd.f32 %v4541_v4, %v2815_v34  ;;  %2945 = vrot.lane.b32.xlu0 %v3192_v30, %s4150_s6  ;;  %v3774_v39 = vpop.f32.mrb[118].mxu1 }
 0x4d4   :  { %v3197_v44 = vpack.c.bf16 %v2824_v37, %v2824_v37  ;;  %v2827_v48 = vadd.f32 %v3774_v39, %v4541_v4  ;;  %v2818_v22 = vpop.f32.mrb[119].mxu1 }
 0x4d5   :  { %v3195_v52 = vpack.c.bf16 %v2816_v38, %v2816_v38  ;;  %v2819_v53 = vadd.f32 %v4541_v4, %v2818_v22 }
 0x4d6   :  { %2933 = vst.msk [vmem:[#allocation16 + $0x18] sm:$0xf] %vm2926_vm0, %v3197_v44  ;;  %v3198_v55 = vpack.c.bf16 %v2827_v48, %v2827_v48 }
 0x4d7   :  { %2931 = vst.msk [vmem:[#allocation16 + $0x10] sm:$0xf] %vm2926_vm0, %v3195_v52  ;;  %v3196_v15 = vpack.c.bf16 %v2819_v53, %v2819_v53  ;;  %2955 = vrot.lane.b32.xlu0 %v3197_v44, %s4150_s6 }
 0x4d8   :  { %2934 = vst.msk [vmem:[#allocation16 + $0x1c] sm:$0xf] %vm2926_vm0, %v3198_v55  ;;  %2957 = vrot.lane.b32.xlu1 %v3198_v55, %s4150_s6 }
 0x4d9   :  { %2932 = vst.msk [vmem:[#allocation16 + $0x14] sm:$0xf] %vm2926_vm0, %v3196_v15  ;;  %v3777_v3 = vpop.f32.mrb[120].mxu1 }
 0x4da   :  { %v2840_v56 = vadd.f32 %v3777_v3, %v4541_v4  ;;  %v2831_v36 = vpop.f32.mrb[121].mxu1 }
 0x4db   :  { %v2832_v57 = vadd.f32 %v4541_v4, %v2831_v36  ;;  %v3778_v51 = vpop.f32.mrb[122].mxu1  ;;  %2951 = vrot.lane.b32.xlu0 %v3195_v52, %s4150_s6 }
 0x4dc   :  { %v3201_v8 = vpack.c.bf16 %v2840_v56, %v2840_v56  ;;  %v2843_v23 = vadd.f32 %v3778_v51, %v4541_v4  ;;  %v2834_v24 = vpop.f32.mrb[123].mxu1  ;;  %2953 = vrot.lane.b32.xlu1 %v3196_v15, %s4150_s6 }
 0x4dd   :  { %v3199_v5 = vpack.c.bf16 %v2832_v57, %v2832_v57  ;;  %v2835_v10 = vadd.f32 %v4541_v4, %v2834_v24 }
 0x4de   :  { %2937 = vst.msk [vmem:[#allocation16 + $0x28] sm:$0xf] %vm2926_vm0, %v3201_v8  ;;  %v3202_v60 = vpack.c.bf16 %v2843_v23, %v2843_v23 }
 0x4df   :  { %2935 = vst.msk [vmem:[#allocation16 + $0x20] sm:$0xf] %vm2926_vm0, %v3199_v5  ;;  %v3200_v6 = vpack.c.bf16 %v2835_v10, %v2835_v10  ;;  %2963 = vrot.lane.b32.xlu0 %v3201_v8, %s4150_s6 }
 0x4e0   :  { %2938 = vst.msk [vmem:[#allocation16 + $0x2c] sm:$0xf] %vm2926_vm0, %v3202_v60  ;;  %2965 = vrot.lane.b32.xlu1 %v3202_v60, %s4150_s6 }
 0x4e1   :  { %2936 = vst.msk [vmem:[#allocation16 + $0x24] sm:$0xf] %vm2926_vm0, %v3200_v6  ;;  %v3781_v41 = vpop.f32.mrb[124].mxu1 }
 0x4e2   :  { %v2856_v62 = vadd.f32 %v3781_v41, %v4541_v4  ;;  %v2847_v2 = vpop.f32.mrb[125].mxu1 }
 0x4e3   :  { %v2848_v9 = vadd.f32 %v4541_v4, %v2847_v2  ;;  %v3782_v0 = vpop.f32.mrb[126].mxu1  ;;  %2959 = vrot.lane.b32.xlu0 %v3199_v5, %s4150_s6 }
 0x4e4   :  { %v3205_v11 = vpack.c.bf16 %v2856_v62, %v2856_v62  ;;  %v2859_v1 = vadd.f32 %v3782_v0, %v4541_v4  ;;  %v2850_v40 = vpop.f32.mrb[127].mxu1  ;;  %2961 = vrot.lane.b32.xlu1 %v3200_v6, %s4150_s6 }
 0x4e5   :  { %v3203_v12 = vpack.c.bf16 %v2848_v9, %v2848_v9  ;;  %v2851_v43 = vadd.f32 %v4541_v4, %v2850_v40 }
 0x4e6   :  { %2941 = vst.msk [vmem:[#allocation16 + $0x38] sm:$0xf] %vm2926_vm0, %v3205_v11  ;;  %v3206_v47 = vpack.c.bf16 %v2859_v1, %v2859_v1 }
 0x4e7   :  { %2939 = vst.msk [vmem:[#allocation16 + $0x30] sm:$0xf] %vm2926_vm0, %v3203_v12  ;;  %v3204_v31 = vpack.c.bf16 %v2851_v43, %v2851_v43  ;;  %2967 = vrot.lane.b32.xlu0 %v3203_v12, %s4150_s6 }
 0x4e8   :  { %2942 = vst.msk [vmem:[#allocation16 + $0x3c] sm:$0xf] %vm2926_vm0, %v3206_v47 }
 0x4e9   :  { %2940 = vst.msk [vmem:[#allocation16 + $0x34] sm:$0xf] %vm2926_vm0, %v3204_v31  ;;  %2969 = vrot.lane.b32.xlu1 %v3204_v31, %s4150_s6 }
 0x4ea   :  { %4092 = shalt.err (!%p4089_p4)
}
 0x4eb   :  { %s4093_s29 = scalar_lea.hbm %s4644_s7, 1024 }
 0x4ec   :  { %p4094_p5 = scmp.ne.s32.totalorder %s4644_s7, %s4093_s29  ;;  %p4097_p6 = scmp.lt.u32.totalorder %s4093_s29, %s4644_s7 }
 0x4ee   :  { %p4099_p7 = pnand %p4097_p6, %p4094_p5 }
 0x4f0   :  { %4102 = shalt.err (!%p4099_p7)
}
 0x4f1   :  { %3018 = dma.vmem_to_hbm [thread:$0]  %s3013_s23, 1024, %s4644_s7, [#allocation6], %s4138_s15, %s4138_s15, %s4139_s16  }
 0x4f2   :  { %2971 = vrot.lane.b32.xlu0 %v3205_v11, %s4150_s6  ;;  %2973 = vrot.lane.b32.xlu1 %v3206_v47, %s4150_s6  ;;  %s4152_s7 = smov [#allocation17]  }
 0x4f3   :  { %s3024_s9 = sshll.u32 %s4152_s7, 4  ;;  %s3025_s9 = int_to_ptr.vmem [resolvable:$true] %s3024_s9 }
 0x4f4   :  { %s4103_s10 = scalar_lea.vmem %s3025_s9, 1024  ;;  %p4108_p9 = scmp.lt.s32.totalorder %s3025_s9, %s3025_s9 }
 0x4f5   :  { %p4104_p8 = scmp.ne.s32.totalorder %s3025_s9, %s4103_s10  ;;  %p4109_p10 = scmp.lt.s32.totalorder %s4103_s10, %s4103_s10 }
 0x4f7   :  { %p4110_p11 = por %p4109_p10, %p4108_p9 }
 0x4f9   :  { %p4111_p12 = pnand %p4110_p11, %p4104_p8 }
 0x540   :  { %v2948_v14 = vpop.permute.xlu1 %2947 }
 0x541   :  { %2993 = vst.msk [vmem:[#allocation17 + $0x8] sm:$0xf] %vm2926_vm0, %v2948_v14  ;;  %v2944_v42 = vpop.permute.xlu0 %2943 }
 0x542   :  { %2991 = vst.msk [vmem:[#allocation17] sm:$0xf] %vm2926_vm0, %v2944_v42 }
 0x544   :  { %v2950_v33 = vpop.permute.xlu1 %2949 }
 0x545   :  { %2994 = vst.msk [vmem:[#allocation17 + $0xc] sm:$0xf] %vm2926_vm0, %v2950_v33  ;;  %v2946_v58 = vpop.permute.xlu0 %2945 }
 0x546   :  { %2992 = vst.msk [vmem:[#allocation17 + $0x4] sm:$0xf] %vm2926_vm0, %v2946_v58 }
 0x549   :  { %v2956_v18 = vpop.permute.xlu0 %2955 }
 0x54a   :  { %2997 = vst.msk [vmem:[#allocation17 + $0x18] sm:$0xf] %vm2926_vm0, %v2956_v18  ;;  %v2958_v54 = vpop.permute.xlu1 %2957 }
 0x54b   :  { %2998 = vst.msk [vmem:[#allocation17 + $0x1c] sm:$0xf] %vm2926_vm0, %v2958_v54 }
 0x54d   :  { %v2952_v19 = vpop.permute.xlu0 %2951 }
 0x54e   :  { %2995 = vst.msk [vmem:[#allocation17 + $0x10] sm:$0xf] %vm2926_vm0, %v2952_v19  ;;  %v2954_v13 = vpop.permute.xlu1 %2953 }
 0x54f   :  { %2996 = vst.msk [vmem:[#allocation17 + $0x14] sm:$0xf] %vm2926_vm0, %v2954_v13 }
 0x551   :  { %v2964_v59 = vpop.permute.xlu0 %2963 }
 0x552   :  { %3001 = vst.msk [vmem:[#allocation17 + $0x28] sm:$0xf] %vm2926_vm0, %v2964_v59  ;;  %v2966_v20 = vpop.permute.xlu1 %2965 }
 0x553   :  { %3002 = vst.msk [vmem:[#allocation17 + $0x2c] sm:$0xf] %vm2926_vm0, %v2966_v20 }
 0x555   :  { %v2960_v45 = vpop.permute.xlu0 %2959 }
 0x556   :  { %2999 = vst.msk [vmem:[#allocation17 + $0x20] sm:$0xf] %vm2926_vm0, %v2960_v45  ;;  %v2962_v61 = vpop.permute.xlu1 %2961 }
 0x557   :  { %3000 = vst.msk [vmem:[#allocation17 + $0x24] sm:$0xf] %vm2926_vm0, %v2962_v61 }
 0x559   :  { %v2968_v16 = vpop.permute.xlu0 %2967 }
 0x55a   :  { %3003 = vst.msk [vmem:[#allocation17 + $0x30] sm:$0xf] %vm2926_vm0, %v2968_v16 }
 0x55b   :  { %v2970_v63 = vpop.permute.xlu1 %2969 }
 0x55c   :  { %3004 = vst.msk [vmem:[#allocation17 + $0x34] sm:$0xf] %vm2926_vm0, %v2970_v63 }
 0x564   :  { %v2972_v17 = vpop.permute.xlu0 %2971  ;;  %v2974_v4 = vpop.permute.xlu1 %2973 }
 0x565   :  { %3005 = vst.msk [vmem:[#allocation17 + $0x38] sm:$0xf] %vm2926_vm0, %v2972_v17  ;;  %3006 = vst.msk [vmem:[#allocation17 + $0x3c] sm:$0xf] %vm2926_vm0, %v2974_v4 }
 0x566   :  { %4114 = shalt.err (!%p4111_p12)
}
 0x567   :  { %s4115_s13 = scalar_lea.hbm %s4645_s8, 1024 }
 0x568   :  { %p4116_p13 = scmp.ne.s32.totalorder %s4645_s8, %s4115_s13  ;;  %p4119_p0 = scmp.lt.u32.totalorder %s4115_s13, %s4645_s8 }
 0x56a   :  { %p4121_p1 = pnand %p4119_p0, %p4116_p13 }
 0x56c   :  { %4124 = shalt.err (!%p4121_p1)
}
 0x56d   :  { %3030 = dma.vmem_to_hbm [thread:$0]  %s3025_s9, 1024, %s4645_s8, [#allocation18], %s4138_s15, %s4138_s15, %s4139_s16  }
 0x56e   :  { %4133 = dma.done.wait [#allocation6], 1024  }
 0x56f   :  { %4134 = vsyncadd [#allocation6], 4294966272 }
 0x570   :  { %4135 = dma.done.wait [#allocation18], 1024  }
 0x571   :  { %4136 = vsyncadd [#allocation18], 4294966272 }
 0x572   :  { %3037 = vsyncpa [#allocation5], 1 }
 0x573   :  { %3038 = vsyncpa [#allocation8], 1 }
 0x574   :  { %3039 = vsyncpa [#allocation11], 1 }
 0x575   :  { %3040 = vsyncpa [#allocation14], 1 }
 0x576   :  { %3041 = vsyncpa [#allocation6], 1 }
 0x577   :  { %3042 = vsyncpa [#allocation18], 1 }

</bundles_post_ra>
